<compile_context>
chip_gen: v7x
topology: tpu7x:2x2x1
jax: 0.10.0
libtpu: 0.0.40
codegen_flags: <defaults>
</compile_context>

<pallas_src>
import functools
import math

import jax
import jax.numpy as jnp
from jax.experimental import pallas as pl
from jax.experimental.pallas import tpu as pltpu


_LANE = 128
_VMEM_LIMIT = 64 * 1024 * 1024


def _round_up(x, m):
    return (x + m - 1) // m * m


# ----------------------------------------------------------------------------
# Pallas kernel 1: direct 3x3 conv (+bias, +optional ReLU), flat-spatial,
# lane-dense, 9 whole-tile MXU dots per grid step.
# ----------------------------------------------------------------------------
def _conv3x3_kernel(x_ref, w_ref, b_ref, o_ref, *, cin, taps, act):
    """One batch element per grid step.

    x_ref : (1, G*Cin, Lin)  spatially padded input, spatial dims flattened
                             (and polyphase-split along channels for stride 2)
    w_ref : (9, Cout, Cin)   tap-major weights
    b_ref : (Cout, 1)
    o_ref : (1, Cout, Lout)  Lout = round_up(Ho*Wcols, 128) -> lane-dense
    """
    cout = o_ref.shape[1]
    lout = o_ref.shape[2]
    acc = jnp.zeros((cout, lout), jnp.float32)
    # 9 whole-tile dots (lane dim >= 128), accumulated in f32.  Each tap
    # window is one contiguous static slice along the flattened spatial axis.
    for t, (g, s) in enumerate(taps):
        win = x_ref[0, g * cin:(g + 1) * cin, s:s + lout]       # (Cin, Lout)
        acc = acc + jnp.dot(w_ref[t], win,
                            preferred_element_type=jnp.float32)
    res = acc + b_ref[...]
    if act == "relu":
        res = jnp.maximum(res, 0.0)
    o_ref[0, :, :] = res.astype(o_ref.dtype)


def conv2d_3x3(x, w, b, *, stride=1, act="none"):
    """3x3 'same' conv, stride 1 or 2.  x:(N,Cin,H,W), w:(Cout,Cin,3,3)."""
    assert stride in (1, 2)
    N, Cin, H, W = x.shape
    Cout = w.shape[0]
    Ho = (H + 2 - 3) // stride + 1
    Wo = (W + 2 - 3) // stride + 1

    xpad = jnp.pad(x, ((0, 0), (0, 0), (1, 1), (1, 1)))
    if stride == 1:
        G = 1
        Hq, Wq = H + 2, W + 2
        xg = xpad
        # tap (ki,kj): contiguous slice of the flat padded image starting at
        # ki*Wq + kj; local position oh*Wq + ow == xpad[oh+ki, ow+kj].
        taps = tuple((0, ki * Wq + kj) for ki in range(3) for kj in range(3))
    else:
        # Polyphase (space-to-depth) split: tap windows stay unit-stride.
        G = 4
        Hq, Wq = Ho + 1, Wo + 1
        pad_h = max(0, 2 * Hq - (H + 2))
        pad_w = max(0, 2 * Wq - (W + 2))
        xpad = jnp.pad(xpad, ((0, 0), (0, 0), (0, pad_h), (0, pad_w)))
        phases = [xpad[:, :, a::2, bb::2][:, :, :Hq, :Wq]
                  for a in range(2) for bb in range(2)]
        xg = jnp.concatenate(phases, axis=1)            # (N, 4*Cin, Hq, Wq)
        taps = tuple(((ki % 2) * 2 + (kj % 2), (ki // 2) * Wq + (kj // 2))
                     for ki in range(3) for kj in range(3))

    # Lane-dense sizes: Lout is a multiple of 128; the 2 (or 1) extra columns
    # per output row (width Wq instead of Wo) are garbage and sliced off in
    # XLA afterwards.
    Lout = _round_up(Ho * Wq, _LANE)
    max_start = max(s for _, s in taps)
    Lin = _round_up(max_start + Lout, _LANE)

    xflat = xg.reshape(N, G * Cin, Hq * Wq)
    xflat = jnp.pad(xflat, ((0, 0), (0, 0), (0, Lin - Hq * Wq)))

    w9 = jnp.transpose(w, (2, 3, 0, 1)).reshape(9, Cout, Cin)
    b2 = b.reshape(Cout, 1)

    kern = functools.partial(_conv3x3_kernel, cin=Cin, taps=taps, act=act)
    out_flat = pl.pallas_call(
        kern,
        out_shape=jax.ShapeDtypeStruct((N, Cout, Lout), x.dtype),
        grid_spec=pltpu.PrefetchScalarGridSpec(
            num_scalar_prefetch=0,
            grid=(N,),
            in_specs=[
                pl.BlockSpec((1, G * Cin, Lin), lambda n: (n, 0, 0)),
                pl.BlockSpec((9, Cout, Cin), lambda n: (0, 0, 0)),
                pl.BlockSpec((Cout, 1), lambda n: (0, 0)),
            ],
            out_specs=pl.BlockSpec((1, Cout, Lout), lambda n: (n, 0, 0)),
        ),
        compiler_params=pltpu.CompilerParams(
            dimension_semantics=("parallel",),
            vmem_limit_bytes=_VMEM_LIMIT),
    )(xflat, w9, b2)

    out = out_flat[:, :, :Ho * Wq].reshape(N, Cout, Ho, Wq)[:, :, :, :Wo]
    return out


def upsample2x(x):
    # TODO(synk): fuse into the following decoder conv kernel (per-parity 2x2
    # taps on the low-res input) to avoid the 4x intermediate in HBM.
    return jnp.repeat(jnp.repeat(x, 2, axis=2), 2, axis=3)


# ----------------------------------------------------------------------------
# Pallas kernel 2: fused latent quantization + factorized-logistic bit cost.
# Layout: one (N*C) row per channel instance, h*w padded to 128 lanes, so the
# median is a single scalar per row (no broadcast-medians HBM stream).
# ----------------------------------------------------------------------------
_INV_LN2 = 1.0 / math.log(2.0)


def _quant_bits_kernel(y_ref, m_ref, q_ref, bits_ref):
    y = y_ref[...]                                   # (tr, L)
    m = m_ref[...]                                   # (tr, 1) one median/row
    # TODO(synk): floor(x+0.5) rounds half-up around the medians; torch.round
    # is half-to-even, so exact .5 offsets may differ by one step.
    q = jnp.floor(y - m + 0.5) + m
    q_ref[...] = q.astype(q_ref.dtype)
    # sigmoid(a) - sigmoid(b) == 0.5*(tanh(a/2) - tanh(b/2)):
    # 2 tanh + 1 log on the EUP instead of 2 exp + 2 div + 1 log.
    hi = jnp.tanh(0.5 * (q + 0.5 - m))
    lo = jnp.tanh(0.5 * (q - 0.5 - m))
    p = jnp.maximum(0.5 * (hi - lo), 1e-9)
    bits_ref[...] = ((-_INV_LN2) * jnp.log(p)).astype(bits_ref.dtype)


def quantize_and_bits(lat, medians):
    """lat:(N,C,h,w) -> (q_lat:(N,C,h,w), bits_map:(N,1,h,w))."""
    N, C, h, w = lat.shape
    rows, cols = N * C, h * w
    L = _round_up(cols, _LANE)
    # Row tile: multiple of 8 rows, ~<= 1 MiB per stream per block.
    tr = max(8, min(_round_up(rows, 8), max(8, (1 << 20) // (L * 4)) // 8 * 8))
    rows_p = _round_up(rows, tr)

    y = lat.reshape(rows, cols)
    y = jnp.pad(y, ((0, rows_p - rows), (0, L - cols)))
    m_rows = jnp.tile(medians, N).reshape(rows, 1)          # median per row
    m_rows = jnp.pad(m_rows, ((0, rows_p - rows), (0, 0)))

    q_p, bits_p = pl.pallas_call(
        _quant_bits_kernel,
        out_shape=(jax.ShapeDtypeStruct((rows_p, L), lat.dtype),
                   jax.ShapeDtypeStruct((rows_p, L), jnp.float32)),
        grid_spec=pltpu.PrefetchScalarGridSpec(
            num_scalar_prefetch=0,
            grid=(rows_p // tr,),
            in_specs=[pl.BlockSpec((tr, L), lambda i: (i, 0)),
                      pl.BlockSpec((tr, 1), lambda i: (i, 0))],
            out_specs=[pl.BlockSpec((tr, L), lambda i: (i, 0)),
                       pl.BlockSpec((tr, L), lambda i: (i, 0))],
        ),
        compiler_params=pltpu.CompilerParams(
            dimension_semantics=("parallel",),
            vmem_limit_bytes=_VMEM_LIMIT),
    )(y, m_rows)

    q = q_p[:rows, :cols].reshape(N, C, h, w)
    bits = bits_p[:rows, :cols].reshape(N, C, h, w)
    bits_map = jnp.sum(bits, axis=1, keepdims=True)   # tiny XLA channel sum
    return q, bits_map


# ----------------------------------------------------------------------------
# Scale-space warp helpers (data-dependent gather stays in plain JAX glue)
# ----------------------------------------------------------------------------
def _gaussian_kernel1d(sigma, radius):
    x = jnp.arange(-radius, radius + 1, dtype=jnp.float32)
    k = jnp.exp(-0.5 * (x / sigma) ** 2)
    return k / jnp.sum(k)


def gaussian_pyramids(x, base_sigma, levels):
    # TODO(synk): gaussian_pyramids source not provided; using separable
    # gaussian blurs with sigma = base_sigma * 2**k and edge padding.
    out = [x]
    for k in range(levels):
        sigma = base_sigma * (2.0 ** k)
        radius = max(int(3 * sigma + 0.5), 1)
        ker = _gaussian_kernel1d(sigma, radius)
        xp = jnp.pad(x, ((0, 0), (0, 0), (radius, radius), (0, 0)), mode="edge")
        xb = sum(ker[i] * xp[:, :, i:i + x.shape[2], :]
                 for i in range(2 * radius + 1))
        xp = jnp.pad(xb, ((0, 0), (0, 0), (0, 0), (radius, radius)), mode="edge")
        xb = sum(ker[i] * xp[:, :, :, i:i + x.shape[3]]
                 for i in range(2 * radius + 1))
        out.append(xb)
    return jnp.stack(out, axis=2)  # (N, C, levels+1, H, W)


def grid_sample_3d(vol, gx, gy, gz):
    """Trilinear grid_sample, padding_mode='border', align_corners=True.

    vol:(N,C,D,H,W); gx,gy,gz:(N,1,H,W) normalized coords in [-1,1].
    Returns (N,C,1,H,W).
    """
    # TODO(synk): the data-dependent gather has no clean Pallas TPU equivalent
    # (would need DMA gather / row-tiled VMEM-resident pyramid); kept in XLA.
    N, C, D, H, W = vol.shape
    ix = jnp.clip((gx + 1.0) * 0.5 * (W - 1), 0.0, float(W - 1))
    iy = jnp.clip((gy + 1.0) * 0.5 * (H - 1), 0.0, float(H - 1))
    iz = jnp.clip((gz + 1.0) * 0.5 * (D - 1), 0.0, float(D - 1))
    x0f, y0f, z0f = jnp.floor(ix), jnp.floor(iy), jnp.floor(iz)
    fx, fy, fz = ix - x0f, iy - y0f, iz - z0f
    x0 = jnp.clip(x0f.astype(jnp.int32), 0, W - 1)
    y0 = jnp.clip(y0f.astype(jnp.int32), 0, H - 1)
    z0 = jnp.clip(z0f.astype(jnp.int32), 0, D - 1)
    x1 = jnp.clip(x0 + 1, 0, W - 1)
    y1 = jnp.clip(y0 + 1, 0, H - 1)
    z1 = jnp.clip(z0 + 1, 0, D - 1)

    vol_f = vol.reshape(N, C, D * H * W)

    def gather(zi, yi, xi):
        idx = ((zi * H + yi) * W + xi).reshape(N, 1, -1)          # (N,1,H*W)
        idx = jnp.broadcast_to(idx, (N, C, H * W))
        g = jnp.take_along_axis(vol_f, idx, axis=2)
        return g.reshape(N, C, 1, H, W)

    c000, c001 = gather(z0, y0, x0), gather(z0, y0, x1)
    c010, c011 = gather(z0, y1, x0), gather(z0, y1, x1)
    c100, c101 = gather(z1, y0, x0), gather(z1, y0, x1)
    c110, c111 = gather(z1, y1, x0), gather(z1, y1, x1)

    wx = fx[:, :, None]  # (N,1,1,H,W)
    wy = fy[:, :, None]
    wz = fz[:, :, None]
    c00 = c000 * (1 - wx) + c001 * wx
    c01 = c010 * (1 - wx) + c011 * wx
    c10 = c100 * (1 - wx) + c101 * wx
    c11 = c110 * (1 - wx) + c111 * wx
    c0 = c00 * (1 - wy) + c01 * wy
    c1 = c10 * (1 - wy) + c11 * wy
    return c0 * (1 - wz) + c1 * wz


# ----------------------------------------------------------------------------
# SimpleModel stand-in (encoder / quantize+entropy / decoder)
# ----------------------------------------------------------------------------
class SimpleModel:
    # TODO(synk): original SimpleModel source not provided; minimal 2-conv
    # encoder + quantizer/entropy-model + 2-conv decoder stand-in with the
    # same interface ({'output','bpp','bpp_map','q_latent','q_hyper_latent'}).
    def __init__(self, key, in_dim, dims, hyper_dims, out_dim,
                 activation="relu", dec_add_latent=False):
        ks = jax.random.split(key, 5)
        s = 0.1
        self.act = activation
        self.dec_add_latent = dec_add_latent
        self.enc_w1 = jax.random.normal(ks[0], (dims, in_dim, 3, 3), jnp.float32) * s
        self.enc_b1 = jnp.zeros((dims,), jnp.float32)
        self.enc_w2 = jax.random.normal(ks[1], (hyper_dims, dims, 3, 3), jnp.float32) * s
        self.enc_b2 = jnp.zeros((hyper_dims,), jnp.float32)
        self.dec_w1 = jax.random.normal(ks[2], (dims, hyper_dims, 3, 3), jnp.float32) * s
        self.dec_b1 = jnp.zeros((dims,), jnp.float32)
        self.dec_w2 = jax.random.normal(ks[3], (out_dim, dims, 3, 3), jnp.float32) * s
        self.dec_b2 = jnp.zeros((out_dim,), jnp.float32)
        self.medians = jax.random.normal(ks[4], (hyper_dims,), jnp.float32) * 0.01

    def __call__(self, x, extra_latent=None, cond=None):
        # TODO(synk): cond / vbr_dim conditioning path not defined in source.
        N, _, H, W = x.shape
        h1 = conv2d_3x3(x, self.enc_w1, self.enc_b1, stride=2, act=self.act)
        lat = conv2d_3x3(h1, self.enc_w2, self.enc_b2, stride=2, act="none")
        q_lat, bits_map = quantize_and_bits(lat, self.medians)

        dec_in = q_lat
        if self.dec_add_latent and extra_latent is not None:
            dec_in = dec_in + extra_latent

        d1 = upsample2x(dec_in)
        d1 = conv2d_3x3(d1, self.dec_w1, self.dec_b1, stride=1, act=self.act)
        d2 = upsample2x(d1)
        out = conv2d_3x3(d2, self.dec_w2, self.dec_b2, stride=1, act="none")

        bpp = jnp.sum(bits_map, axis=(1, 2, 3)) / float(H * W)   # (N,)
        return {"output": out, "bpp": bpp, "bpp_map": bits_map,
                "q_latent": q_lat, "q_hyper_latent": q_lat}


# ----------------------------------------------------------------------------
# VideoCompressionModel
# ----------------------------------------------------------------------------
class VideoCompressionModel:
    def __init__(self, key, dims, hyper_dims, use_scaler=False,
                 use_cond_residual=False, gaussian_dim=5, base_scale=1.0,
                 activation="relu", vbr_dim=0):
        k1, k2, k3 = jax.random.split(key, 3)
        self.iframe_model = SimpleModel(k1, 3, dims, hyper_dims, 3, activation)
        self.flow_model = SimpleModel(k2, 6, dims, hyper_dims,
                                      6 if use_scaler else 3, activation)
        # TODO(synk): CondModel (use_cond_residual=True path) not provided.
        self.residual_model = SimpleModel(k3, 3, dims, hyper_dims, 3, activation,
                                          dec_add_latent=True)
        self.gaussian_dim = int(gaussian_dim)
        self.base_scale = base_scale
        self.use_scaler = use_scaler
        self.use_cond_residual = use_cond_residual

    def scale_space_warp(self, inp, flow):
        N, C, H, W = inp.shape
        assert flow.shape == (N, 3, H, W)
        vol = gaussian_pyramids(inp, self.base_scale, self.gaussian_dim)
        hh = jnp.arange(H, dtype=inp.dtype)
        ww = jnp.arange(W, dtype=inp.dtype)
        gy, gx = jnp.meshgrid(hh, ww, indexing="ij")              # (H,W)
        flow_p = jnp.transpose(flow, (0, 2, 3, 1))[:, None]        # (N,1,H,W,3)
        # depth channel is used directly as a normalized [-1,1] coordinate
        # (grid z = 0), matching the reference which only rescales x/y.
        d_off = jnp.clip(flow_p[..., 2], -1.0, 1.0)
        fx = flow_p[..., 0] + gx[None, None]
        fy = flow_p[..., 1] + gy[None, None]
        fz = d_off
        fx = 2.0 * fx / max(W - 1.0, 1.0) - 1.0
        fy = 2.0 * fy / max(H - 1.0, 1.0) - 1.0
        warped = grid_sample_3d(vol, fx, fy, fz)                   # (N,C,1,H,W)
        return jnp.squeeze(warped, axis=2)

    def iframe_forward(self, frame, cond=None):
        return self.iframe_model(frame, cond=cond)

    def pframe_forward(self, cur_frame, prev_frame, cond=None):
        flow_input = jnp.concatenate([cur_frame, prev_frame], axis=1)
        flow_state = self.flow_model(flow_input, cond=cond)
        if self.use_scaler:
            flow = flow_state["output"][:, :3]
            scale = jnp.exp(flow_state["output"][:, 3:])
        else:
            flow = flow_state["output"]
            scale = 1.0
        warped = self.scale_space_warp(prev_frame, flow)
        residual = (cur_frame - warped) / scale
        residual_state = self.residual_model(
            residual, extra_latent=flow_state["q_latent"], cond=cond)
        output = warped + residual_state["output"] * scale
        bpp = flow_state["bpp"] + residual_state["bpp"]
        return {"output": output, "bpp": bpp,
                "warped": jnp.clip(warped, 0.0, 1.0),
                "bpp_map": flow_state["bpp_map"] + residual_state["bpp_map"]}

    def __call__(self, video, cond=None):
        T = video.shape[0]
        states, prev_frame = [], None
        for t in range(T):
            if t == 0:
                state = self.iframe_forward(video[0], cond=cond)
                # detach only the I-frame output, as in the reference.
                prev_frame = jax.lax.stop_gradient(state["output"])
            else:
                state = self.pframe_forward(
                    video[t], jnp.clip(prev_frame, 0.0, 1.0), cond=cond)
                prev_frame = state["output"]
            states.append(state)
        return {"output": jnp.stack([s["output"] for s in states], 0),
                "bpp": jnp.stack([s["bpp"] for s in states], 0),
                "warped": jnp.stack([s["warped"] for s in states[1:]], 0)}


if __name__ == "__main__":
    key = jax.random.PRNGKey(0)
    k_params, k_video = jax.random.split(key)
    model = VideoCompressionModel(k_params, dims=8, hyper_dims=8,
                                  gaussian_dim=3, base_scale=1.0)
    # video: (T, N, C, H, W) in [0, 1], matching the PyTorch forward.
    video = jax.random.uniform(k_video, (3, 2, 3, 16, 16), jnp.float32)
    fwd = jax.jit(model.__call__)          # one compiled forward (all frames)
    out = fwd(video)
    jax.block_until_ready(out)
    assert out["output"].shape == (3, 2, 3, 16, 16)
    assert out["bpp"].shape == (3, 2)
    assert out["warped"].shape == (2, 2, 3, 16, 16)
    print("KERNEL_OK")
</pallas_src>

<mosaic_0001>
module attributes {stable_mosaic.version = 11 : i64} {
  func.func private @main(%arg0: i32) attributes {dimension_semantics = [#tpu.dimension_semantics<core_parallel>], iteration_bounds = array<i64: 2>, tpu.core_type = #tpu.core_type<sc_scalar_subcore>, window_params = []} {
    return
  }
}

module attributes {stable_mosaic.version = 11 : i64} {
  func.func private @main(%arg0: i32) attributes {dimension_semantics = [#tpu.dimension_semantics<core_parallel>], iteration_bounds = array<i64: 2>, tpu.core_type = #tpu.core_type<sc_scalar_subcore>, window_params = []} {
    return
  }
}

module attributes {stable_mosaic.version = 11 : i64} {
  func.func @_conv3x3_kernel(%arg0: i32, %arg1: memref<1x12x256xf32, #tpu.memory_space<vmem>>, %arg2: memref<9x8x3xf32, #tpu.memory_space<vmem>>, %arg3: memref<8x1xf32, #tpu.memory_space<vmem>>, %arg4: memref<1x8x128xf32, #tpu.memory_space<vmem>>) attributes {dimension_semantics = [#tpu.dimension_semantics<parallel>], iteration_bounds = array<i64: 2>, scalar_prefetch = 0 : i64, scratch_operands = 0 : i64, tpu.core_type = #tpu.core_type<tc>, window_params = [{transform_indices = @transform_0, window_bounds = array<i64: 1, 12, 256>}, {pipeline_mode = #tpu.pipeline_mode<synchronous>, transform_indices = @transform_1, window_bounds = array<i64: 9, 8, 3>}, {pipeline_mode = #tpu.pipeline_mode<synchronous>, transform_indices = @transform_2, window_bounds = array<i64: 8, 1>}, {transform_indices = @transform_3, window_bounds = array<i64: 1, 8, 128>}]} {
    %cst = arith.constant 0.000000e+00 : f32
    %0 = vector.broadcast %cst : f32 to vector<8x128xf32>
    %c0 = arith.constant 0 : index
    %c0_0 = arith.constant 0 : index
    %c0_1 = arith.constant 0 : index
    %1 = vector.load %arg1[%c0, %c0_0, %c0_1] : memref<1x12x256xf32, #tpu.memory_space<vmem>>, vector<1x3x128xf32>
    %2 = vector.shape_cast %1 : vector<1x3x128xf32> to vector<3x128xf32>
    %c0_2 = arith.constant 0 : index
    %c0_3 = arith.constant 0 : index
    %c0_4 = arith.constant 0 : index
    %3 = vector.load %arg2[%c0_2, %c0_3, %c0_4] : memref<9x8x3xf32, #tpu.memory_space<vmem>>, vector<1x8x3xf32>
    %4 = vector.shape_cast %3 : vector<1x8x3xf32> to vector<8x3xf32>
    %cst_5 = arith.constant dense<0.000000e+00> : vector<8x128xf32>
    %5 = tpu.matmul %4, %2, %cst_5 {dimension_numbers = #tpu.dot_dimension_numbers<[1], [0], [0], [1], [0, 0, 1, 1], [], []>} : vector<8x3xf32>, vector<3x128xf32>, vector<8x128xf32> -> vector<8x128xf32>
    %6 = arith.addf %0, %5 : vector<8x128xf32>
    %c0_6 = arith.constant 0 : index
    %c3 = arith.constant 3 : index
    %c0_7 = arith.constant 0 : index
    %7 = vector.load %arg1[%c0_6, %c3, %c0_7] : memref<1x12x256xf32, #tpu.memory_space<vmem>>, vector<1x3x128xf32>
    %8 = vector.shape_cast %7 : vector<1x3x128xf32> to vector<3x128xf32>
    %c1 = arith.constant 1 : index
    %c0_8 = arith.constant 0 : index
    %c0_9 = arith.constant 0 : index
    %9 = vector.load %arg2[%c1, %c0_8, %c0_9] : memref<9x8x3xf32, #tpu.memory_space<vmem>>, vector<1x8x3xf32>
    %10 = vector.shape_cast %9 : vector<1x8x3xf32> to vector<8x3xf32>
    %cst_10 = arith.constant dense<0.000000e+00> : vector<8x128xf32>
    %11 = tpu.matmul %10, %8, %cst_10 {dimension_numbers = #tpu.dot_dimension_numbers<[1], [0], [0], [1], [0, 0, 1, 1], [], []>} : vector<8x3xf32>, vector<3x128xf32>, vector<8x128xf32> -> vector<8x128xf32>
    %12 = arith.addf %6, %11 : vector<8x128xf32>
    %c0_11 = arith.constant 0 : index
    %c0_12 = arith.constant 0 : index
    %c1_13 = arith.constant 1 : index
    %13 = vector.load %arg1[%c0_11, %c0_12, %c1_13] : memref<1x12x256xf32, #tpu.memory_space<vmem>>, vector<1x3x128xf32>
    %14 = vector.shape_cast %13 : vector<1x3x128xf32> to vector<3x128xf32>
    %c2 = arith.constant 2 : index
    %c0_14 = arith.constant 0 : index
    %c0_15 = arith.constant 0 : index
    %15 = vector.load %arg2[%c2, %c0_14, %c0_15] : memref<9x8x3xf32, #tpu.memory_space<vmem>>, vector<1x8x3xf32>
    %16 = vector.shape_cast %15 : vector<1x8x3xf32> to vector<8x3xf32>
    %cst_16 = arith.constant dense<0.000000e+00> : vector<8x128xf32>
    %17 = tpu.matmul %16, %14, %cst_16 {dimension_numbers = #tpu.dot_dimension_numbers<[1], [0], [0], [1], [0, 0, 1, 1], [], []>} : vector<8x3xf32>, vector<3x128xf32>, vector<8x128xf32> -> vector<8x128xf32>
    %18 = arith.addf %12, %17 : vector<8x128xf32>
    %c0_17 = arith.constant 0 : index
    %c6 = arith.constant 6 : index
    %c0_18 = arith.constant 0 : index
    %19 = vector.load %arg1[%c0_17, %c6, %c0_18] : memref<1x12x256xf32, #tpu.memory_space<vmem>>, vector<1x3x128xf32>
    %20 = vector.shape_cast %19 : vector<1x3x128xf32> to vector<3x128xf32>
    %c3_19 = arith.constant 3 : index
    %c0_20 = arith.constant 0 : index
    %c0_21 = arith.constant 0 : index
    %21 = vector.load %arg2[%c3_19, %c0_20, %c0_21] : memref<9x8x3xf32, #tpu.memory_space<vmem>>, vector<1x8x3xf32>
    %22 = vector.shape_cast %21 : vector<1x8x3xf32> to vector<8x3xf32>
    %cst_22 = arith.constant dense<0.000000e+00> : vector<8x128xf32>
    %23 = tpu.matmul %22, %20, %cst_22 {dimension_numbers = #tpu.dot_dimension_numbers<[1], [0], [0], [1], [0, 0, 1, 1], [], []>} : vector<8x3xf32>, vector<3x128xf32>, vector<8x128xf32> -> vector<8x128xf32>
    %24 = arith.addf %18, %23 : vector<8x128xf32>
    %c0_23 = arith.constant 0 : index
    %c9 = arith.constant 9 : index
    %c0_24 = arith.constant 0 : index
    %25 = vector.load %arg1[%c0_23, %c9, %c0_24] : memref<1x12x256xf32, #tpu.memory_space<vmem>>, vector<1x3x128xf32>
    %26 = vector.shape_cast %25 : vector<1x3x128xf32> to vector<3x128xf32>
    %c4 = arith.constant 4 : index
    %c0_25 = arith.constant 0 : index
    %c0_26 = arith.constant 0 : index
    %27 = vector.load %arg2[%c4, %c0_25, %c0_26] : memref<9x8x3xf32, #tpu.memory_space<vmem>>, vector<1x8x3xf32>
    %28 = vector.shape_cast %27 : vector<1x8x3xf32> to vector<8x3xf32>
    %cst_27 = arith.constant dense<0.000000e+00> : vector<8x128xf32>
    %29 = tpu.matmul %28, %26, %cst_27 {dimension_numbers = #tpu.dot_dimension_numbers<[1], [0], [0], [1], [0, 0, 1, 1], [], []>} : vector<8x3xf32>, vector<3x128xf32>, vector<8x128xf32> -> vector<8x128xf32>
    %30 = arith.addf %24, %29 : vector<8x128xf32>
    %c0_28 = arith.constant 0 : index
    %c6_29 = arith.constant 6 : index
    %c1_30 = arith.constant 1 : index
    %31 = vector.load %arg1[%c0_28, %c6_29, %c1_30] : memref<1x12x256xf32, #tpu.memory_space<vmem>>, vector<1x3x128xf32>
    %32 = vector.shape_cast %31 : vector<1x3x128xf32> to vector<3x128xf32>
    %c5 = arith.constant 5 : index
    %c0_31 = arith.constant 0 : index
    %c0_32 = arith.constant 0 : index
    %33 = vector.load %arg2[%c5, %c0_31, %c0_32] : memref<9x8x3xf32, #tpu.memory_space<vmem>>, vector<1x8x3xf32>
    %34 = vector.shape_cast %33 : vector<1x8x3xf32> to vector<8x3xf32>
    %cst_33 = arith.constant dense<0.000000e+00> : vector<8x128xf32>
    %35 = tpu.matmul %34, %32, %cst_33 {dimension_numbers = #tpu.dot_dimension_numbers<[1], [0], [0], [1], [0, 0, 1, 1], [], []>} : vector<8x3xf32>, vector<3x128xf32>, vector<8x128xf32> -> vector<8x128xf32>
    %36 = arith.addf %30, %35 : vector<8x128xf32>
    %c0_34 = arith.constant 0 : index
    %c0_35 = arith.constant 0 : index
    %c9_36 = arith.constant 9 : index
    %37 = vector.load %arg1[%c0_34, %c0_35, %c9_36] : memref<1x12x256xf32, #tpu.memory_space<vmem>>, vector<1x3x128xf32>
    %38 = vector.shape_cast %37 : vector<1x3x128xf32> to vector<3x128xf32>
    %c6_37 = arith.constant 6 : index
    %c0_38 = arith.constant 0 : index
    %c0_39 = arith.constant 0 : index
    %39 = vector.load %arg2[%c6_37, %c0_38, %c0_39] : memref<9x8x3xf32, #tpu.memory_space<vmem>>, vector<1x8x3xf32>
    %40 = vector.shape_cast %39 : vector<1x8x3xf32> to vector<8x3xf32>
    %cst_40 = arith.constant dense<0.000000e+00> : vector<8x128xf32>
    %41 = tpu.matmul %40, %38, %cst_40 {dimension_numbers = #tpu.dot_dimension_numbers<[1], [0], [0], [1], [0, 0, 1, 1], [], []>} : vector<8x3xf32>, vector<3x128xf32>, vector<8x128xf32> -> vector<8x128xf32>
    %42 = arith.addf %36, %41 : vector<8x128xf32>
    %c0_41 = arith.constant 0 : index
    %c3_42 = arith.constant 3 : index
    %c9_43 = arith.constant 9 : index
    %43 = vector.load %arg1[%c0_41, %c3_42, %c9_43] : memref<1x12x256xf32, #tpu.memory_space<vmem>>, vector<1x3x128xf32>
    %44 = vector.shape_cast %43 : vector<1x3x128xf32> to vector<3x128xf32>
    %c7 = arith.constant 7 : index
    %c0_44 = arith.constant 0 : index
    %c0_45 = arith.constant 0 : index
    %45 = vector.load %arg2[%c7, %c0_44, %c0_45] : memref<9x8x3xf32, #tpu.memory_space<vmem>>, vector<1x8x3xf32>
    %46 = vector.shape_cast %45 : vector<1x8x3xf32> to vector<8x3xf32>
    %cst_46 = arith.constant dense<0.000000e+00> : vector<8x128xf32>
    %47 = tpu.matmul %46, %44, %cst_46 {dimension_numbers = #tpu.dot_dimension_numbers<[1], [0], [0], [1], [0, 0, 1, 1], [], []>} : vector<8x3xf32>, vector<3x128xf32>, vector<8x128xf32> -> vector<8x128xf32>
    %48 = arith.addf %42, %47 : vector<8x128xf32>
    %c0_47 = arith.constant 0 : index
    %c0_48 = arith.constant 0 : index
    %c10 = arith.constant 10 : index
    %49 = vector.load %arg1[%c0_47, %c0_48, %c10] : memref<1x12x256xf32, #tpu.memory_space<vmem>>, vector<1x3x128xf32>
    %50 = vector.shape_cast %49 : vector<1x3x128xf32> to vector<3x128xf32>
    %c8 = arith.constant 8 : index
    %c0_49 = arith.constant 0 : index
    %c0_50 = arith.constant 0 : index
    %51 = vector.load %arg2[%c8, %c0_49, %c0_50] : memref<9x8x3xf32, #tpu.memory_space<vmem>>, vector<1x8x3xf32>
    %52 = vector.shape_cast %51 : vector<1x8x3xf32> to vector<8x3xf32>
    %cst_51 = arith.constant dense<0.000000e+00> : vector<8x128xf32>
    %53 = tpu.matmul %52, %50, %cst_51 {dimension_numbers = #tpu.dot_dimension_numbers<[1], [0], [0], [1], [0, 0, 1, 1], [], []>} : vector<8x3xf32>, vector<3x128xf32>, vector<8x128xf32> -> vector<8x128xf32>
    %54 = arith.addf %48, %53 : vector<8x128xf32>
    %c0_52 = arith.constant 0 : index
    %c0_53 = arith.constant 0 : index
    %55 = vector.load %arg3[%c0_52, %c0_53] : memref<8x1xf32, #tpu.memory_space<vmem>>, vector<8x1xf32>
    %56 = vector.broadcast %55 : vector<8x1xf32> to vector<8x128xf32>
    %57 = arith.addf %54, %56 : vector<8x128xf32>
    %cst_54 = arith.constant 0.000000e+00 : f32
    %58 = vector.broadcast %cst_54 : f32 to vector<8x128xf32>
    %59 = arith.maximumf %57, %58 : vector<8x128xf32>
    %c0_55 = arith.constant 0 : index
    %c0_56 = arith.constant 0 : index
    %c0_57 = arith.constant 0 : index
    %60 = vector.load %arg4[%c0_55, %c0_56, %c0_57] : memref<1x8x128xf32, #tpu.memory_space<vmem>>, vector<1x8x128xf32>
    %61 = vector.shape_cast %60 : vector<1x8x128xf32> to vector<8x128xf32>
    %62 = vector.shape_cast %59 : vector<8x128xf32> to vector<1x8x128xf32>
    tpu.vector_store %arg4[%c0_55, %c0_56, %c0_57], %62 {strides = array<i32>} : memref<1x8x128xf32, #tpu.memory_space<vmem>>, vector<1x8x128xf32>,
    return
  }
  func.func @transform_0(%arg0: i32) -> (i32, i32, i32) {
    %c0_i32 = arith.constant 0 : i32
    %c0_i32_0 = arith.constant 0 : i32
    %c0_i32_1 = arith.constant 0 : i32
    return %arg0, %c0_i32, %c0_i32_0 : i32, i32, i32
  }
  func.func @transform_1(%arg0: i32) -> (i32, i32, i32) {
    %c0_i32 = arith.constant 0 : i32
    %c0_i32_0 = arith.constant 0 : i32
    %c0_i32_1 = arith.constant 0 : i32
    %c0_i32_2 = arith.constant 0 : i32
    return %c0_i32, %c0_i32_0, %c0_i32_1 : i32, i32, i32
  }
  func.func @transform_2(%arg0: i32) -> (i32, i32) {
    %c0_i32 = arith.constant 0 : i32
    %c0_i32_0 = arith.constant 0 : i32
    %c0_i32_1 = arith.constant 0 : i32
    return %c0_i32, %c0_i32_0 : i32, i32
  }
  func.func @transform_3(%arg0: i32) -> (i32, i32, i32) {
    %c0_i32 = arith.constant 0 : i32
    %c0_i32_0 = arith.constant 0 : i32
    %c0_i32_1 = arith.constant 0 : i32
    return %arg0, %c0_i32, %c0_i32_0 : i32, i32, i32
  }
}

module attributes {stable_mosaic.version = 11 : i64} {
  func.func @_conv3x3_kernel(%arg0: i32, %arg1: memref<1x32x256xf32, #tpu.memory_space<vmem>>, %arg2: memref<9x8x8xf32, #tpu.memory_space<vmem>>, %arg3: memref<8x1xf32, #tpu.memory_space<vmem>>, %arg4: memref<1x8x128xf32, #tpu.memory_space<vmem>>) attributes {dimension_semantics = [#tpu.dimension_semantics<parallel>], iteration_bounds = array<i64: 2>, scalar_prefetch = 0 : i64, scratch_operands = 0 : i64, tpu.core_type = #tpu.core_type<tc>, window_params = [{transform_indices = @transform_0, window_bounds = array<i64: 1, 32, 256>}, {pipeline_mode = #tpu.pipeline_mode<synchronous>, transform_indices = @transform_1, window_bounds = array<i64: 9, 8, 8>}, {pipeline_mode = #tpu.pipeline_mode<synchronous>, transform_indices = @transform_2, window_bounds = array<i64: 8, 1>}, {transform_indices = @transform_3, window_bounds = array<i64: 1, 8, 128>}]} {
    %cst = arith.constant 0.000000e+00 : f32
    %0 = vector.broadcast %cst : f32 to vector<8x128xf32>
    %c0 = arith.constant 0 : index
    %c0_0 = arith.constant 0 : index
    %c0_1 = arith.constant 0 : index
    %1 = vector.load %arg1[%c0, %c0_0, %c0_1] : memref<1x32x256xf32, #tpu.memory_space<vmem>>, vector<1x8x128xf32>
    %2 = vector.shape_cast %1 : vector<1x8x128xf32> to vector<8x128xf32>
    %c0_2 = arith.constant 0 : index
    %c0_3 = arith.constant 0 : index
    %c0_4 = arith.constant 0 : index
    %3 = vector.load %arg2[%c0_2, %c0_3, %c0_4] : memref<9x8x8xf32, #tpu.memory_space<vmem>>, vector<1x8x8xf32>
    %4 = vector.shape_cast %3 : vector<1x8x8xf32> to vector<8x8xf32>
    %cst_5 = arith.constant dense<0.000000e+00> : vector<8x128xf32>
    %5 = tpu.matmul %4, %2, %cst_5 {dimension_numbers = #tpu.dot_dimension_numbers<[1], [0], [0], [1], [0, 0, 1, 1], [], []>} : vector<8x8xf32>, vector<8x128xf32>, vector<8x128xf32> -> vector<8x128xf32>
    %6 = arith.addf %0, %5 : vector<8x128xf32>
    %c0_6 = arith.constant 0 : index
    %c8 = arith.constant 8 : index
    %c0_7 = arith.constant 0 : index
    %7 = vector.load %arg1[%c0_6, %c8, %c0_7] : memref<1x32x256xf32, #tpu.memory_space<vmem>>, vector<1x8x128xf32>
    %8 = vector.shape_cast %7 : vector<1x8x128xf32> to vector<8x128xf32>
    %c1 = arith.constant 1 : index
    %c0_8 = arith.constant 0 : index
    %c0_9 = arith.constant 0 : index
    %9 = vector.load %arg2[%c1, %c0_8, %c0_9] : memref<9x8x8xf32, #tpu.memory_space<vmem>>, vector<1x8x8xf32>
    %10 = vector.shape_cast %9 : vector<1x8x8xf32> to vector<8x8xf32>
    %cst_10 = arith.constant dense<0.000000e+00> : vector<8x128xf32>
    %11 = tpu.matmul %10, %8, %cst_10 {dimension_numbers = #tpu.dot_dimension_numbers<[1], [0], [0], [1], [0, 0, 1, 1], [], []>} : vector<8x8xf32>, vector<8x128xf32>, vector<8x128xf32> -> vector<8x128xf32>
    %12 = arith.addf %6, %11 : vector<8x128xf32>
    %c0_11 = arith.constant 0 : index
    %c0_12 = arith.constant 0 : index
    %c1_13 = arith.constant 1 : index
    %13 = vector.load %arg1[%c0_11, %c0_12, %c1_13] : memref<1x32x256xf32, #tpu.memory_space<vmem>>, vector<1x8x128xf32>
    %14 = vector.shape_cast %13 : vector<1x8x128xf32> to vector<8x128xf32>
    %c2 = arith.constant 2 : index
    %c0_14 = arith.constant 0 : index
    %c0_15 = arith.constant 0 : index
    %15 = vector.load %arg2[%c2, %c0_14, %c0_15] : memref<9x8x8xf32, #tpu.memory_space<vmem>>, vector<1x8x8xf32>
    %16 = vector.shape_cast %15 : vector<1x8x8xf32> to vector<8x8xf32>
    %cst_16 = arith.constant dense<0.000000e+00> : vector<8x128xf32>
    %17 = tpu.matmul %16, %14, %cst_16 {dimension_numbers = #tpu.dot_dimension_numbers<[1], [0], [0], [1], [0, 0, 1, 1], [], []>} : vector<8x8xf32>, vector<8x128xf32>, vector<8x128xf32> -> vector<8x128xf32>
    %18 = arith.addf %12, %17 : vector<8x128xf32>
    %c0_17 = arith.constant 0 : index
    %c16 = arith.constant 16 : index
    %c0_18 = arith.constant 0 : index
    %19 = vector.load %arg1[%c0_17, %c16, %c0_18] : memref<1x32x256xf32, #tpu.memory_space<vmem>>, vector<1x8x128xf32>
    %20 = vector.shape_cast %19 : vector<1x8x128xf32> to vector<8x128xf32>
    %c3 = arith.constant 3 : index
    %c0_19 = arith.constant 0 : index
    %c0_20 = arith.constant 0 : index
    %21 = vector.load %arg2[%c3, %c0_19, %c0_20] : memref<9x8x8xf32, #tpu.memory_space<vmem>>, vector<1x8x8xf32>
    %22 = vector.shape_cast %21 : vector<1x8x8xf32> to vector<8x8xf32>
    %cst_21 = arith.constant dense<0.000000e+00> : vector<8x128xf32>
    %23 = tpu.matmul %22, %20, %cst_21 {dimension_numbers = #tpu.dot_dimension_numbers<[1], [0], [0], [1], [0, 0, 1, 1], [], []>} : vector<8x8xf32>, vector<8x128xf32>, vector<8x128xf32> -> vector<8x128xf32>
    %24 = arith.addf %18, %23 : vector<8x128xf32>
    %c0_22 = arith.constant 0 : index
    %c24 = arith.constant 24 : index
    %c0_23 = arith.constant 0 : index
    %25 = vector.load %arg1[%c0_22, %c24, %c0_23] : memref<1x32x256xf32, #tpu.memory_space<vmem>>, vector<1x8x128xf32>
    %26 = vector.shape_cast %25 : vector<1x8x128xf32> to vector<8x128xf32>
    %c4 = arith.constant 4 : index
    %c0_24 = arith.constant 0 : index
    %c0_25 = arith.constant 0 : index
    %27 = vector.load %arg2[%c4, %c0_24, %c0_25] : memref<9x8x8xf32, #tpu.memory_space<vmem>>, vector<1x8x8xf32>
    %28 = vector.shape_cast %27 : vector<1x8x8xf32> to vector<8x8xf32>
    %cst_26 = arith.constant dense<0.000000e+00> : vector<8x128xf32>
    %29 = tpu.matmul %28, %26, %cst_26 {dimension_numbers = #tpu.dot_dimension_numbers<[1], [0], [0], [1], [0, 0, 1, 1], [], []>} : vector<8x8xf32>, vector<8x128xf32>, vector<8x128xf32> -> vector<8x128xf32>
    %30 = arith.addf %24, %29 : vector<8x128xf32>
    %c0_27 = arith.constant 0 : index
    %c16_28 = arith.constant 16 : index
    %c1_29 = arith.constant 1 : index
    %31 = vector.load %arg1[%c0_27, %c16_28, %c1_29] : memref<1x32x256xf32, #tpu.memory_space<vmem>>, vector<1x8x128xf32>
    %32 = vector.shape_cast %31 : vector<1x8x128xf32> to vector<8x128xf32>
    %c5 = arith.constant 5 : index
    %c0_30 = arith.constant 0 : index
    %c0_31 = arith.constant 0 : index
    %33 = vector.load %arg2[%c5, %c0_30, %c0_31] : memref<9x8x8xf32, #tpu.memory_space<vmem>>, vector<1x8x8xf32>
    %34 = vector.shape_cast %33 : vector<1x8x8xf32> to vector<8x8xf32>
    %cst_32 = arith.constant dense<0.000000e+00> : vector<8x128xf32>
    %35 = tpu.matmul %34, %32, %cst_32 {dimension_numbers = #tpu.dot_dimension_numbers<[1], [0], [0], [1], [0, 0, 1, 1], [], []>} : vector<8x8xf32>, vector<8x128xf32>, vector<8x128xf32> -> vector<8x128xf32>
    %36 = arith.addf %30, %35 : vector<8x128xf32>
    %c0_33 = arith.constant 0 : index
    %c0_34 = arith.constant 0 : index
    %c5_35 = arith.constant 5 : index
    %37 = vector.load %arg1[%c0_33, %c0_34, %c5_35] : memref<1x32x256xf32, #tpu.memory_space<vmem>>, vector<1x8x128xf32>
    %38 = vector.shape_cast %37 : vector<1x8x128xf32> to vector<8x128xf32>
    %c6 = arith.constant 6 : index
    %c0_36 = arith.constant 0 : index
    %c0_37 = arith.constant 0 : index
    %39 = vector.load %arg2[%c6, %c0_36, %c0_37] : memref<9x8x8xf32, #tpu.memory_space<vmem>>, vector<1x8x8xf32>
    %40 = vector.shape_cast %39 : vector<1x8x8xf32> to vector<8x8xf32>
    %cst_38 = arith.constant dense<0.000000e+00> : vector<8x128xf32>
    %41 = tpu.matmul %40, %38, %cst_38 {dimension_numbers = #tpu.dot_dimension_numbers<[1], [0], [0], [1], [0, 0, 1, 1], [], []>} : vector<8x8xf32>, vector<8x128xf32>, vector<8x128xf32> -> vector<8x128xf32>
    %42 = arith.addf %36, %41 : vector<8x128xf32>
    %c0_39 = arith.constant 0 : index
    %c8_40 = arith.constant 8 : index
    %c5_41 = arith.constant 5 : index
    %43 = vector.load %arg1[%c0_39, %c8_40, %c5_41] : memref<1x32x256xf32, #tpu.memory_space<vmem>>, vector<1x8x128xf32>
    %44 = vector.shape_cast %43 : vector<1x8x128xf32> to vector<8x128xf32>
    %c7 = arith.constant 7 : index
    %c0_42 = arith.constant 0 : index
    %c0_43 = arith.constant 0 : index
    %45 = vector.load %arg2[%c7, %c0_42, %c0_43] : memref<9x8x8xf32, #tpu.memory_space<vmem>>, vector<1x8x8xf32>
    %46 = vector.shape_cast %45 : vector<1x8x8xf32> to vector<8x8xf32>
    %cst_44 = arith.constant dense<0.000000e+00> : vector<8x128xf32>
    %47 = tpu.matmul %46, %44, %cst_44 {dimension_numbers = #tpu.dot_dimension_numbers<[1], [0], [0], [1], [0, 0, 1, 1], [], []>} : vector<8x8xf32>, vector<8x128xf32>, vector<8x128xf32> -> vector<8x128xf32>
    %48 = arith.addf %42, %47 : vector<8x128xf32>
    %c0_45 = arith.constant 0 : index
    %c0_46 = arith.constant 0 : index
    %c6_47 = arith.constant 6 : index
    %49 = vector.load %arg1[%c0_45, %c0_46, %c6_47] : memref<1x32x256xf32, #tpu.memory_space<vmem>>, vector<1x8x128xf32>
    %50 = vector.shape_cast %49 : vector<1x8x128xf32> to vector<8x128xf32>
    %c8_48 = arith.constant 8 : index
    %c0_49 = arith.constant 0 : index
    %c0_50 = arith.constant 0 : index
    %51 = vector.load %arg2[%c8_48, %c0_49, %c0_50] : memref<9x8x8xf32, #tpu.memory_space<vmem>>, vector<1x8x8xf32>
    %52 = vector.shape_cast %51 : vector<1x8x8xf32> to vector<8x8xf32>
    %cst_51 = arith.constant dense<0.000000e+00> : vector<8x128xf32>
    %53 = tpu.matmul %52, %50, %cst_51 {dimension_numbers = #tpu.dot_dimension_numbers<[1], [0], [0], [1], [0, 0, 1, 1], [], []>} : vector<8x8xf32>, vector<8x128xf32>, vector<8x128xf32> -> vector<8x128xf32>
    %54 = arith.addf %48, %53 : vector<8x128xf32>
    %c0_52 = arith.constant 0 : index
    %c0_53 = arith.constant 0 : index
    %55 = vector.load %arg3[%c0_52, %c0_53] : memref<8x1xf32, #tpu.memory_space<vmem>>, vector<8x1xf32>
    %56 = vector.broadcast %55 : vector<8x1xf32> to vector<8x128xf32>
    %57 = arith.addf %54, %56 : vector<8x128xf32>
    %c0_54 = arith.constant 0 : index
    %c0_55 = arith.constant 0 : index
    %c0_56 = arith.constant 0 : index
    %58 = vector.load %arg4[%c0_54, %c0_55, %c0_56] : memref<1x8x128xf32, #tpu.memory_space<vmem>>, vector<1x8x128xf32>
    %59 = vector.shape_cast %58 : vector<1x8x128xf32> to vector<8x128xf32>
    %60 = vector.shape_cast %57 : vector<8x128xf32> to vector<1x8x128xf32>
    tpu.vector_store %arg4[%c0_54, %c0_55, %c0_56], %60 {strides = array<i32>} : memref<1x8x128xf32, #tpu.memory_space<vmem>>, vector<1x8x128xf32>,
    return
  }
  func.func @transform_0(%arg0: i32) -> (i32, i32, i32) {
    %c0_i32 = arith.constant 0 : i32
    %c0_i32_0 = arith.constant 0 : i32
    %c0_i32_1 = arith.constant 0 : i32
    return %arg0, %c0_i32, %c0_i32_0 : i32, i32, i32
  }
  func.func @transform_1(%arg0: i32) -> (i32, i32, i32) {
    %c0_i32 = arith.constant 0 : i32
    %c0_i32_0 = arith.constant 0 : i32
    %c0_i32_1 = arith.constant 0 : i32
    %c0_i32_2 = arith.constant 0 : i32
    return %c0_i32, %c0_i32_0, %c0_i32_1 : i32, i32, i32
  }
  func.func @transform_2(%arg0: i32) -> (i32, i32) {
    %c0_i32 = arith.constant 0 : i32
    %c0_i32_0 = arith.constant 0 : i32
    %c0_i32_1 = arith.constant 0 : i32
    return %c0_i32, %c0_i32_0 : i32, i32
  }
  func.func @transform_3(%arg0: i32) -> (i32, i32, i32) {
    %c0_i32 = arith.constant 0 : i32
    %c0_i32_0 = arith.constant 0 : i32
    %c0_i32_1 = arith.constant 0 : i32
    return %arg0, %c0_i32, %c0_i32_0 : i32, i32, i32
  }
}

module attributes {stable_mosaic.version = 11 : i64} {
  func.func @_quant_bits_kernel(%arg0: i32, %arg1: memref<16x128xf32, #tpu.memory_space<vmem>>, %arg2: memref<16x1xf32, #tpu.memory_space<vmem>>, %arg3: memref<16x128xf32, #tpu.memory_space<vmem>>, %arg4: memref<16x128xf32, #tpu.memory_space<vmem>>) attributes {dimension_semantics = [#tpu.dimension_semantics<parallel>], iteration_bounds = array<i64: 1>, scalar_prefetch = 0 : i64, scratch_operands = 0 : i64, tpu.core_type = #tpu.core_type<tc>, window_params = [{transform_indices = @transform_0, window_bounds = array<i64: 16, 128>}, {transform_indices = @transform_1, window_bounds = array<i64: 16, 1>}, {transform_indices = @transform_2, window_bounds = array<i64: 16, 128>}, {transform_indices = @transform_3, window_bounds = array<i64: 16, 128>}]} {
    %c0 = arith.constant 0 : index
    %c0_0 = arith.constant 0 : index
    %0 = vector.load %arg1[%c0, %c0_0] : memref<16x128xf32, #tpu.memory_space<vmem>>, vector<16x128xf32>
    %c0_1 = arith.constant 0 : index
    %c0_2 = arith.constant 0 : index
    %1 = vector.load %arg2[%c0_1, %c0_2] : memref<16x1xf32, #tpu.memory_space<vmem>>, vector<16x1xf32>
    %2 = vector.broadcast %1 : vector<16x1xf32> to vector<16x128xf32>
    %3 = arith.subf %0, %2 : vector<16x128xf32>
    %cst = arith.constant 5.000000e-01 : f32
    %4 = vector.broadcast %cst : f32 to vector<16x128xf32>
    %5 = arith.addf %3, %4 : vector<16x128xf32>
    %6 = math.floor %5 : vector<16x128xf32>
    %7 = vector.broadcast %1 : vector<16x1xf32> to vector<16x128xf32>
    %8 = arith.addf %6, %7 : vector<16x128xf32>
    %c0_3 = arith.constant 0 : index
    %c0_4 = arith.constant 0 : index
    %9 = vector.load %arg3[%c0_3, %c0_4] : memref<16x128xf32, #tpu.memory_space<vmem>>, vector<16x128xf32>
    tpu.vector_store %arg3[%c0_3, %c0_4], %8 {strides = array<i32>} : memref<16x128xf32, #tpu.memory_space<vmem>>, vector<16x128xf32>,
    %cst_5 = arith.constant 5.000000e-01 : f32
    %10 = vector.broadcast %cst_5 : f32 to vector<16x128xf32>
    %11 = arith.addf %8, %10 : vector<16x128xf32>
    %12 = vector.broadcast %1 : vector<16x1xf32> to vector<16x128xf32>
    %13 = arith.subf %11, %12 : vector<16x128xf32>
    %cst_6 = arith.constant 5.000000e-01 : f32
    %14 = vector.broadcast %cst_6 : f32 to vector<16x128xf32>
    %15 = arith.mulf %14, %13 : vector<16x128xf32>
    %16 = math.tanh %15 : vector<16x128xf32>
    %cst_7 = arith.constant 5.000000e-01 : f32
    %17 = vector.broadcast %cst_7 : f32 to vector<16x128xf32>
    %18 = arith.subf %8, %17 : vector<16x128xf32>
    %19 = vector.broadcast %1 : vector<16x1xf32> to vector<16x128xf32>
    %20 = arith.subf %18, %19 : vector<16x128xf32>
    %cst_8 = arith.constant 5.000000e-01 : f32
    %21 = vector.broadcast %cst_8 : f32 to vector<16x128xf32>
    %22 = arith.mulf %21, %20 : vector<16x128xf32>
    %23 = math.tanh %22 : vector<16x128xf32>
    %24 = arith.subf %16, %23 : vector<16x128xf32>
    %cst_9 = arith.constant 5.000000e-01 : f32
    %25 = vector.broadcast %cst_9 : f32 to vector<16x128xf32>
    %26 = arith.mulf %25, %24 : vector<16x128xf32>
    %cst_10 = arith.constant 9.99999971E-10 : f32
    %27 = vector.broadcast %cst_10 : f32 to vector<16x128xf32>
    %28 = arith.maximumf %26, %27 : vector<16x128xf32>
    %29 = math.log %28 : vector<16x128xf32>
    %cst_11 = arith.constant -1.44269502 : f32
    %30 = vector.broadcast %cst_11 : f32 to vector<16x128xf32>
    %31 = arith.mulf %30, %29 : vector<16x128xf32>
    %c0_12 = arith.constant 0 : index
    %c0_13 = arith.constant 0 : index
    %32 = vector.load %arg4[%c0_12, %c0_13] : memref<16x128xf32, #tpu.memory_space<vmem>>, vector<16x128xf32>
    tpu.vector_store %arg4[%c0_12, %c0_13], %31 {strides = array<i32>} : memref<16x128xf32, #tpu.memory_space<vmem>>, vector<16x128xf32>,
    return
  }
  func.func @transform_0(%arg0: i32) -> (i32, i32) {
    %c0_i32 = arith.constant 0 : i32
    %c0_i32_0 = arith.constant 0 : i32
    return %arg0, %c0_i32 : i32, i32
  }
  func.func @transform_1(%arg0: i32) -> (i32, i32) {
    %c0_i32 = arith.constant 0 : i32
    %c0_i32_0 = arith.constant 0 : i32
    return %arg0, %c0_i32 : i32, i32
  }
  func.func @transform_2(%arg0: i32) -> (i32, i32) {
    %c0_i32 = arith.constant 0 : i32
    %c0_i32_0 = arith.constant 0 : i32
    return %arg0, %c0_i32 : i32, i32
  }
  func.func @transform_3(%arg0: i32) -> (i32, i32) {
    %c0_i32 = arith.constant 0 : i32
    %c0_i32_0 = arith.constant 0 : i32
    return %arg0, %c0_i32 : i32, i32
  }
}

module attributes {stable_mosaic.version = 11 : i64} {
  func.func @_conv3x3_kernel(%arg0: i32, %arg1: memref<1x8x256xf32, #tpu.memory_space<vmem>>, %arg2: memref<9x8x8xf32, #tpu.memory_space<vmem>>, %arg3: memref<8x1xf32, #tpu.memory_space<vmem>>, %arg4: memref<1x8x128xf32, #tpu.memory_space<vmem>>) attributes {dimension_semantics = [#tpu.dimension_semantics<parallel>], iteration_bounds = array<i64: 2>, scalar_prefetch = 0 : i64, scratch_operands = 0 : i64, tpu.core_type = #tpu.core_type<tc>, window_params = [{transform_indices = @transform_0, window_bounds = array<i64: 1, 8, 256>}, {pipeline_mode = #tpu.pipeline_mode<synchronous>, transform_indices = @transform_1, window_bounds = array<i64: 9, 8, 8>}, {pipeline_mode = #tpu.pipeline_mode<synchronous>, transform_indices = @transform_2, window_bounds = array<i64: 8, 1>}, {transform_indices = @transform_3, window_bounds = array<i64: 1, 8, 128>}]} {
    %cst = arith.constant 0.000000e+00 : f32
    %0 = vector.broadcast %cst : f32 to vector<8x128xf32>
    %c0 = arith.constant 0 : index
    %c0_0 = arith.constant 0 : index
    %c0_1 = arith.constant 0 : index
    %1 = vector.load %arg1[%c0, %c0_0, %c0_1] : memref<1x8x256xf32, #tpu.memory_space<vmem>>, vector<1x8x128xf32>
    %2 = vector.shape_cast %1 : vector<1x8x128xf32> to vector<8x128xf32>
    %c0_2 = arith.constant 0 : index
    %c0_3 = arith.constant 0 : index
    %c0_4 = arith.constant 0 : index
    %3 = vector.load %arg2[%c0_2, %c0_3, %c0_4] : memref<9x8x8xf32, #tpu.memory_space<vmem>>, vector<1x8x8xf32>
    %4 = vector.shape_cast %3 : vector<1x8x8xf32> to vector<8x8xf32>
    %cst_5 = arith.constant dense<0.000000e+00> : vector<8x128xf32>
    %5 = tpu.matmul %4, %2, %cst_5 {dimension_numbers = #tpu.dot_dimension_numbers<[1], [0], [0], [1], [0, 0, 1, 1], [], []>} : vector<8x8xf32>, vector<8x128xf32>, vector<8x128xf32> -> vector<8x128xf32>
    %6 = arith.addf %0, %5 : vector<8x128xf32>
    %c0_6 = arith.constant 0 : index
    %c0_7 = arith.constant 0 : index
    %c1 = arith.constant 1 : index
    %7 = vector.load %arg1[%c0_6, %c0_7, %c1] : memref<1x8x256xf32, #tpu.memory_space<vmem>>, vector<1x8x128xf32>
    %8 = vector.shape_cast %7 : vector<1x8x128xf32> to vector<8x128xf32>
    %c1_8 = arith.constant 1 : index
    %c0_9 = arith.constant 0 : index
    %c0_10 = arith.constant 0 : index
    %9 = vector.load %arg2[%c1_8, %c0_9, %c0_10] : memref<9x8x8xf32, #tpu.memory_space<vmem>>, vector<1x8x8xf32>
    %10 = vector.shape_cast %9 : vector<1x8x8xf32> to vector<8x8xf32>
    %cst_11 = arith.constant dense<0.000000e+00> : vector<8x128xf32>
    %11 = tpu.matmul %10, %8, %cst_11 {dimension_numbers = #tpu.dot_dimension_numbers<[1], [0], [0], [1], [0, 0, 1, 1], [], []>} : vector<8x8xf32>, vector<8x128xf32>, vector<8x128xf32> -> vector<8x128xf32>
    %12 = arith.addf %6, %11 : vector<8x128xf32>
    %c0_12 = arith.constant 0 : index
    %c0_13 = arith.constant 0 : index
    %c2 = arith.constant 2 : index
    %13 = vector.load %arg1[%c0_12, %c0_13, %c2] : memref<1x8x256xf32, #tpu.memory_space<vmem>>, vector<1x8x128xf32>
    %14 = vector.shape_cast %13 : vector<1x8x128xf32> to vector<8x128xf32>
    %c2_14 = arith.constant 2 : index
    %c0_15 = arith.constant 0 : index
    %c0_16 = arith.constant 0 : index
    %15 = vector.load %arg2[%c2_14, %c0_15, %c0_16] : memref<9x8x8xf32, #tpu.memory_space<vmem>>, vector<1x8x8xf32>
    %16 = vector.shape_cast %15 : vector<1x8x8xf32> to vector<8x8xf32>
    %cst_17 = arith.constant dense<0.000000e+00> : vector<8x128xf32>
    %17 = tpu.matmul %16, %14, %cst_17 {dimension_numbers = #tpu.dot_dimension_numbers<[1], [0], [0], [1], [0, 0, 1, 1], [], []>} : vector<8x8xf32>, vector<8x128xf32>, vector<8x128xf32> -> vector<8x128xf32>
    %18 = arith.addf %12, %17 : vector<8x128xf32>
    %c0_18 = arith.constant 0 : index
    %c0_19 = arith.constant 0 : index
    %c10 = arith.constant 10 : index
    %19 = vector.load %arg1[%c0_18, %c0_19, %c10] : memref<1x8x256xf32, #tpu.memory_space<vmem>>, vector<1x8x128xf32>
    %20 = vector.shape_cast %19 : vector<1x8x128xf32> to vector<8x128xf32>
    %c3 = arith.constant 3 : index
    %c0_20 = arith.constant 0 : index
    %c0_21 = arith.constant 0 : index
    %21 = vector.load %arg2[%c3, %c0_20, %c0_21] : memref<9x8x8xf32, #tpu.memory_space<vmem>>, vector<1x8x8xf32>
    %22 = vector.shape_cast %21 : vector<1x8x8xf32> to vector<8x8xf32>
    %cst_22 = arith.constant dense<0.000000e+00> : vector<8x128xf32>
    %23 = tpu.matmul %22, %20, %cst_22 {dimension_numbers = #tpu.dot_dimension_numbers<[1], [0], [0], [1], [0, 0, 1, 1], [], []>} : vector<8x8xf32>, vector<8x128xf32>, vector<8x128xf32> -> vector<8x128xf32>
    %24 = arith.addf %18, %23 : vector<8x128xf32>
    %c0_23 = arith.constant 0 : index
    %c0_24 = arith.constant 0 : index
    %c11 = arith.constant 11 : index
    %25 = vector.load %arg1[%c0_23, %c0_24, %c11] : memref<1x8x256xf32, #tpu.memory_space<vmem>>, vector<1x8x128xf32>
    %26 = vector.shape_cast %25 : vector<1x8x128xf32> to vector<8x128xf32>
    %c4 = arith.constant 4 : index
    %c0_25 = arith.constant 0 : index
    %c0_26 = arith.constant 0 : index
    %27 = vector.load %arg2[%c4, %c0_25, %c0_26] : memref<9x8x8xf32, #tpu.memory_space<vmem>>, vector<1x8x8xf32>
    %28 = vector.shape_cast %27 : vector<1x8x8xf32> to vector<8x8xf32>
    %cst_27 = arith.constant dense<0.000000e+00> : vector<8x128xf32>
    %29 = tpu.matmul %28, %26, %cst_27 {dimension_numbers = #tpu.dot_dimension_numbers<[1], [0], [0], [1], [0, 0, 1, 1], [], []>} : vector<8x8xf32>, vector<8x128xf32>, vector<8x128xf32> -> vector<8x128xf32>
    %30 = arith.addf %24, %29 : vector<8x128xf32>
    %c0_28 = arith.constant 0 : index
    %c0_29 = arith.constant 0 : index
    %c12 = arith.constant 12 : index
    %31 = vector.load %arg1[%c0_28, %c0_29, %c12] : memref<1x8x256xf32, #tpu.memory_space<vmem>>, vector<1x8x128xf32>
    %32 = vector.shape_cast %31 : vector<1x8x128xf32> to vector<8x128xf32>
    %c5 = arith.constant 5 : index
    %c0_30 = arith.constant 0 : index
    %c0_31 = arith.constant 0 : index
    %33 = vector.load %arg2[%c5, %c0_30, %c0_31] : memref<9x8x8xf32, #tpu.memory_space<vmem>>, vector<1x8x8xf32>
    %34 = vector.shape_cast %33 : vector<1x8x8xf32> to vector<8x8xf32>
    %cst_32 = arith.constant dense<0.000000e+00> : vector<8x128xf32>
    %35 = tpu.matmul %34, %32, %cst_32 {dimension_numbers = #tpu.dot_dimension_numbers<[1], [0], [0], [1], [0, 0, 1, 1], [], []>} : vector<8x8xf32>, vector<8x128xf32>, vector<8x128xf32> -> vector<8x128xf32>
    %36 = arith.addf %30, %35 : vector<8x128xf32>
    %c0_33 = arith.constant 0 : index
    %c0_34 = arith.constant 0 : index
    %c20 = arith.constant 20 : index
    %37 = vector.load %arg1[%c0_33, %c0_34, %c20] : memref<1x8x256xf32, #tpu.memory_space<vmem>>, vector<1x8x128xf32>
    %38 = vector.shape_cast %37 : vector<1x8x128xf32> to vector<8x128xf32>
    %c6 = arith.constant 6 : index
    %c0_35 = arith.constant 0 : index
    %c0_36 = arith.constant 0 : index
    %39 = vector.load %arg2[%c6, %c0_35, %c0_36] : memref<9x8x8xf32, #tpu.memory_space<vmem>>, vector<1x8x8xf32>
    %40 = vector.shape_cast %39 : vector<1x8x8xf32> to vector<8x8xf32>
    %cst_37 = arith.constant dense<0.000000e+00> : vector<8x128xf32>
    %41 = tpu.matmul %40, %38, %cst_37 {dimension_numbers = #tpu.dot_dimension_numbers<[1], [0], [0], [1], [0, 0, 1, 1], [], []>} : vector<8x8xf32>, vector<8x128xf32>, vector<8x128xf32> -> vector<8x128xf32>
    %42 = arith.addf %36, %41 : vector<8x128xf32>
    %c0_38 = arith.constant 0 : index
    %c0_39 = arith.constant 0 : index
    %c21 = arith.constant 21 : index
    %43 = vector.load %arg1[%c0_38, %c0_39, %c21] : memref<1x8x256xf32, #tpu.memory_space<vmem>>, vector<1x8x128xf32>
    %44 = vector.shape_cast %43 : vector<1x8x128xf32> to vector<8x128xf32>
    %c7 = arith.constant 7 : index
    %c0_40 = arith.constant 0 : index
    %c0_41 = arith.constant 0 : index
    %45 = vector.load %arg2[%c7, %c0_40, %c0_41] : memref<9x8x8xf32, #tpu.memory_space<vmem>>, vector<1x8x8xf32>
    %46 = vector.shape_cast %45 : vector<1x8x8xf32> to vector<8x8xf32>
    %cst_42 = arith.constant dense<0.000000e+00> : vector<8x128xf32>
    %47 = tpu.matmul %46, %44, %cst_42 {dimension_numbers = #tpu.dot_dimension_numbers<[1], [0], [0], [1], [0, 0, 1, 1], [], []>} : vector<8x8xf32>, vector<8x128xf32>, vector<8x128xf32> -> vector<8x128xf32>
    %48 = arith.addf %42, %47 : vector<8x128xf32>
    %c0_43 = arith.constant 0 : index
    %c0_44 = arith.constant 0 : index
    %c22 = arith.constant 22 : index
    %49 = vector.load %arg1[%c0_43, %c0_44, %c22] : memref<1x8x256xf32, #tpu.memory_space<vmem>>, vector<1x8x128xf32>
    %50 = vector.shape_cast %49 : vector<1x8x128xf32> to vector<8x128xf32>
    %c8 = arith.constant 8 : index
    %c0_45 = arith.constant 0 : index
    %c0_46 = arith.constant 0 : index
    %51 = vector.load %arg2[%c8, %c0_45, %c0_46] : memref<9x8x8xf32, #tpu.memory_space<vmem>>, vector<1x8x8xf32>
    %52 = vector.shape_cast %51 : vector<1x8x8xf32> to vector<8x8xf32>
    %cst_47 = arith.constant dense<0.000000e+00> : vector<8x128xf32>
    %53 = tpu.matmul %52, %50, %cst_47 {dimension_numbers = #tpu.dot_dimension_numbers<[1], [0], [0], [1], [0, 0, 1, 1], [], []>} : vector<8x8xf32>, vector<8x128xf32>, vector<8x128xf32> -> vector<8x128xf32>
    %54 = arith.addf %48, %53 : vector<8x128xf32>
    %c0_48 = arith.constant 0 : index
    %c0_49 = arith.constant 0 : index
    %55 = vector.load %arg3[%c0_48, %c0_49] : memref<8x1xf32, #tpu.memory_space<vmem>>, vector<8x1xf32>
    %56 = vector.broadcast %55 : vector<8x1xf32> to vector<8x128xf32>
    %57 = arith.addf %54, %56 : vector<8x128xf32>
    %cst_50 = arith.constant 0.000000e+00 : f32
    %58 = vector.broadcast %cst_50 : f32 to vector<8x128xf32>
    %59 = arith.maximumf %57, %58 : vector<8x128xf32>
    %c0_51 = arith.constant 0 : index
    %c0_52 = arith.constant 0 : index
    %c0_53 = arith.constant 0 : index
    %60 = vector.load %arg4[%c0_51, %c0_52, %c0_53] : memref<1x8x128xf32, #tpu.memory_space<vmem>>, vector<1x8x128xf32>
    %61 = vector.shape_cast %60 : vector<1x8x128xf32> to vector<8x128xf32>
    %62 = vector.shape_cast %59 : vector<8x128xf32> to vector<1x8x128xf32>
    tpu.vector_store %arg4[%c0_51, %c0_52, %c0_53], %62 {strides = array<i32>} : memref<1x8x128xf32, #tpu.memory_space<vmem>>, vector<1x8x128xf32>,
    return
  }
  func.func @transform_0(%arg0: i32) -> (i32, i32, i32) {
    %c0_i32 = arith.constant 0 : i32
    %c0_i32_0 = arith.constant 0 : i32
    %c0_i32_1 = arith.constant 0 : i32
    return %arg0, %c0_i32, %c0_i32_0 : i32, i32, i32
  }
  func.func @transform_1(%arg0: i32) -> (i32, i32, i32) {
    %c0_i32 = arith.constant 0 : i32
    %c0_i32_0 = arith.constant 0 : i32
    %c0_i32_1 = arith.constant 0 : i32
    %c0_i32_2 = arith.constant 0 : i32
    return %c0_i32, %c0_i32_0, %c0_i32_1 : i32, i32, i32
  }
  func.func @transform_2(%arg0: i32) -> (i32, i32) {
    %c0_i32 = arith.constant 0 : i32
    %c0_i32_0 = arith.constant 0 : i32
    %c0_i32_1 = arith.constant 0 : i32
    return %c0_i32, %c0_i32_0 : i32, i32
  }
  func.func @transform_3(%arg0: i32) -> (i32, i32, i32) {
    %c0_i32 = arith.constant 0 : i32
    %c0_i32_0 = arith.constant 0 : i32
    %c0_i32_1 = arith.constant 0 : i32
    return %arg0, %c0_i32, %c0_i32_0 : i32, i32, i32
  }
}

module attributes {stable_mosaic.version = 11 : i64} {
  func.func @_conv3x3_kernel(%arg0: i32, %arg1: memref<1x8x512xf32, #tpu.memory_space<vmem>>, %arg2: memref<9x3x8xf32, #tpu.memory_space<vmem>>, %arg3: memref<3x1xf32, #tpu.memory_space<vmem>>, %arg4: memref<1x3x384xf32, #tpu.memory_space<vmem>>) attributes {dimension_semantics = [#tpu.dimension_semantics<parallel>], iteration_bounds = array<i64: 2>, scalar_prefetch = 0 : i64, scratch_operands = 0 : i64, tpu.core_type = #tpu.core_type<tc>, window_params = [{transform_indices = @transform_0, window_bounds = array<i64: 1, 8, 512>}, {pipeline_mode = #tpu.pipeline_mode<synchronous>, transform_indices = @transform_1, window_bounds = array<i64: 9, 3, 8>}, {pipeline_mode = #tpu.pipeline_mode<synchronous>, transform_indices = @transform_2, window_bounds = array<i64: 3, 1>}, {transform_indices = @transform_3, window_bounds = array<i64: 1, 3, 384>}]} {
    %cst = arith.constant 0.000000e+00 : f32
    %0 = vector.broadcast %cst : f32 to vector<3x384xf32>
    %c0 = arith.constant 0 : index
    %c0_0 = arith.constant 0 : index
    %c0_1 = arith.constant 0 : index
    %1 = vector.load %arg1[%c0, %c0_0, %c0_1] : memref<1x8x512xf32, #tpu.memory_space<vmem>>, vector<1x8x384xf32>
    %2 = vector.shape_cast %1 : vector<1x8x384xf32> to vector<8x384xf32>
    %c0_2 = arith.constant 0 : index
    %c0_3 = arith.constant 0 : index
    %c0_4 = arith.constant 0 : index
    %3 = vector.load %arg2[%c0_2, %c0_3, %c0_4] : memref<9x3x8xf32, #tpu.memory_space<vmem>>, vector<1x3x8xf32>
    %4 = vector.shape_cast %3 : vector<1x3x8xf32> to vector<3x8xf32>
    %cst_5 = arith.constant dense<0.000000e+00> : vector<3x384xf32>
    %5 = tpu.matmul %4, %2, %cst_5 {dimension_numbers = #tpu.dot_dimension_numbers<[1], [0], [0], [1], [0, 0, 1, 1], [], []>} : vector<3x8xf32>, vector<8x384xf32>, vector<3x384xf32> -> vector<3x384xf32>
    %6 = arith.addf %0, %5 : vector<3x384xf32>
    %c0_6 = arith.constant 0 : index
    %c0_7 = arith.constant 0 : index
    %c1 = arith.constant 1 : index
    %7 = vector.load %arg1[%c0_6, %c0_7, %c1] : memref<1x8x512xf32, #tpu.memory_space<vmem>>, vector<1x8x384xf32>
    %8 = vector.shape_cast %7 : vector<1x8x384xf32> to vector<8x384xf32>
    %c1_8 = arith.constant 1 : index
    %c0_9 = arith.constant 0 : index
    %c0_10 = arith.constant 0 : index
    %9 = vector.load %arg2[%c1_8, %c0_9, %c0_10] : memref<9x3x8xf32, #tpu.memory_space<vmem>>, vector<1x3x8xf32>
    %10 = vector.shape_cast %9 : vector<1x3x8xf32> to vector<3x8xf32>
    %cst_11 = arith.constant dense<0.000000e+00> : vector<3x384xf32>
    %11 = tpu.matmul %10, %8, %cst_11 {dimension_numbers = #tpu.dot_dimension_numbers<[1], [0], [0], [1], [0, 0, 1, 1], [], []>} : vector<3x8xf32>, vector<8x384xf32>, vector<3x384xf32> -> vector<3x384xf32>
    %12 = arith.addf %6, %11 : vector<3x384xf32>
    %c0_12 = arith.constant 0 : index
    %c0_13 = arith.constant 0 : index
    %c2 = arith.constant 2 : index
    %13 = vector.load %arg1[%c0_12, %c0_13, %c2] : memref<1x8x512xf32, #tpu.memory_space<vmem>>, vector<1x8x384xf32>
    %14 = vector.shape_cast %13 : vector<1x8x384xf32> to vector<8x384xf32>
    %c2_14 = arith.constant 2 : index
    %c0_15 = arith.constant 0 : index
    %c0_16 = arith.constant 0 : index
    %15 = vector.load %arg2[%c2_14, %c0_15, %c0_16] : memref<9x3x8xf32, #tpu.memory_space<vmem>>, vector<1x3x8xf32>
    %16 = vector.shape_cast %15 : vector<1x3x8xf32> to vector<3x8xf32>
    %cst_17 = arith.constant dense<0.000000e+00> : vector<3x384xf32>
    %17 = tpu.matmul %16, %14, %cst_17 {dimension_numbers = #tpu.dot_dimension_numbers<[1], [0], [0], [1], [0, 0, 1, 1], [], []>} : vector<3x8xf32>, vector<8x384xf32>, vector<3x384xf32> -> vector<3x384xf32>
    %18 = arith.addf %12, %17 : vector<3x384xf32>
    %c0_18 = arith.constant 0 : index
    %c0_19 = arith.constant 0 : index
    %c18 = arith.constant 18 : index
    %19 = vector.load %arg1[%c0_18, %c0_19, %c18] : memref<1x8x512xf32, #tpu.memory_space<vmem>>, vector<1x8x384xf32>
    %20 = vector.shape_cast %19 : vector<1x8x384xf32> to vector<8x384xf32>
    %c3 = arith.constant 3 : index
    %c0_20 = arith.constant 0 : index
    %c0_21 = arith.constant 0 : index
    %21 = vector.load %arg2[%c3, %c0_20, %c0_21] : memref<9x3x8xf32, #tpu.memory_space<vmem>>, vector<1x3x8xf32>
    %22 = vector.shape_cast %21 : vector<1x3x8xf32> to vector<3x8xf32>
    %cst_22 = arith.constant dense<0.000000e+00> : vector<3x384xf32>
    %23 = tpu.matmul %22, %20, %cst_22 {dimension_numbers = #tpu.dot_dimension_numbers<[1], [0], [0], [1], [0, 0, 1, 1], [], []>} : vector<3x8xf32>, vector<8x384xf32>, vector<3x384xf32> -> vector<3x384xf32>
    %24 = arith.addf %18, %23 : vector<3x384xf32>
    %c0_23 = arith.constant 0 : index
    %c0_24 = arith.constant 0 : index
    %c19 = arith.constant 19 : index
    %25 = vector.load %arg1[%c0_23, %c0_24, %c19] : memref<1x8x512xf32, #tpu.memory_space<vmem>>, vector<1x8x384xf32>
    %26 = vector.shape_cast %25 : vector<1x8x384xf32> to vector<8x384xf32>
    %c4 = arith.constant 4 : index
    %c0_25 = arith.constant 0 : index
    %c0_26 = arith.constant 0 : index
    %27 = vector.load %arg2[%c4, %c0_25, %c0_26] : memref<9x3x8xf32, #tpu.memory_space<vmem>>, vector<1x3x8xf32>
    %28 = vector.shape_cast %27 : vector<1x3x8xf32> to vector<3x8xf32>
    %cst_27 = arith.constant dense<0.000000e+00> : vector<3x384xf32>
    %29 = tpu.matmul %28, %26, %cst_27 {dimension_numbers = #tpu.dot_dimension_numbers<[1], [0], [0], [1], [0, 0, 1, 1], [], []>} : vector<3x8xf32>, vector<8x384xf32>, vector<3x384xf32> -> vector<3x384xf32>
    %30 = arith.addf %24, %29 : vector<3x384xf32>
    %c0_28 = arith.constant 0 : index
    %c0_29 = arith.constant 0 : index
    %c20 = arith.constant 20 : index
    %31 = vector.load %arg1[%c0_28, %c0_29, %c20] : memref<1x8x512xf32, #tpu.memory_space<vmem>>, vector<1x8x384xf32>
    %32 = vector.shape_cast %31 : vector<1x8x384xf32> to vector<8x384xf32>
    %c5 = arith.constant 5 : index
    %c0_30 = arith.constant 0 : index
    %c0_31 = arith.constant 0 : index
    %33 = vector.load %arg2[%c5, %c0_30, %c0_31] : memref<9x3x8xf32, #tpu.memory_space<vmem>>, vector<1x3x8xf32>
    %34 = vector.shape_cast %33 : vector<1x3x8xf32> to vector<3x8xf32>
    %cst_32 = arith.constant dense<0.000000e+00> : vector<3x384xf32>
    %35 = tpu.matmul %34, %32, %cst_32 {dimension_numbers = #tpu.dot_dimension_numbers<[1], [0], [0], [1], [0, 0, 1, 1], [], []>} : vector<3x8xf32>, vector<8x384xf32>, vector<3x384xf32> -> vector<3x384xf32>
    %36 = arith.addf %30, %35 : vector<3x384xf32>
    %c0_33 = arith.constant 0 : index
    %c0_34 = arith.constant 0 : index
    %c36 = arith.constant 36 : index
    %37 = vector.load %arg1[%c0_33, %c0_34, %c36] : memref<1x8x512xf32, #tpu.memory_space<vmem>>, vector<1x8x384xf32>
    %38 = vector.shape_cast %37 : vector<1x8x384xf32> to vector<8x384xf32>
    %c6 = arith.constant 6 : index
    %c0_35 = arith.constant 0 : index
    %c0_36 = arith.constant 0 : index
    %39 = vector.load %arg2[%c6, %c0_35, %c0_36] : memref<9x3x8xf32, #tpu.memory_space<vmem>>, vector<1x3x8xf32>
    %40 = vector.shape_cast %39 : vector<1x3x8xf32> to vector<3x8xf32>
    %cst_37 = arith.constant dense<0.000000e+00> : vector<3x384xf32>
    %41 = tpu.matmul %40, %38, %cst_37 {dimension_numbers = #tpu.dot_dimension_numbers<[1], [0], [0], [1], [0, 0, 1, 1], [], []>} : vector<3x8xf32>, vector<8x384xf32>, vector<3x384xf32> -> vector<3x384xf32>
    %42 = arith.addf %36, %41 : vector<3x384xf32>
    %c0_38 = arith.constant 0 : index
    %c0_39 = arith.constant 0 : index
    %c37 = arith.constant 37 : index
    %43 = vector.load %arg1[%c0_38, %c0_39, %c37] : memref<1x8x512xf32, #tpu.memory_space<vmem>>, vector<1x8x384xf32>
    %44 = vector.shape_cast %43 : vector<1x8x384xf32> to vector<8x384xf32>
    %c7 = arith.constant 7 : index
    %c0_40 = arith.constant 0 : index
    %c0_41 = arith.constant 0 : index
    %45 = vector.load %arg2[%c7, %c0_40, %c0_41] : memref<9x3x8xf32, #tpu.memory_space<vmem>>, vector<1x3x8xf32>
    %46 = vector.shape_cast %45 : vector<1x3x8xf32> to vector<3x8xf32>
    %cst_42 = arith.constant dense<0.000000e+00> : vector<3x384xf32>
    %47 = tpu.matmul %46, %44, %cst_42 {dimension_numbers = #tpu.dot_dimension_numbers<[1], [0], [0], [1], [0, 0, 1, 1], [], []>} : vector<3x8xf32>, vector<8x384xf32>, vector<3x384xf32> -> vector<3x384xf32>
    %48 = arith.addf %42, %47 : vector<3x384xf32>
    %c0_43 = arith.constant 0 : index
    %c0_44 = arith.constant 0 : index
    %c38 = arith.constant 38 : index
    %49 = vector.load %arg1[%c0_43, %c0_44, %c38] : memref<1x8x512xf32, #tpu.memory_space<vmem>>, vector<1x8x384xf32>
    %50 = vector.shape_cast %49 : vector<1x8x384xf32> to vector<8x384xf32>
    %c8 = arith.constant 8 : index
    %c0_45 = arith.constant 0 : index
    %c0_46 = arith.constant 0 : index
    %51 = vector.load %arg2[%c8, %c0_45, %c0_46] : memref<9x3x8xf32, #tpu.memory_space<vmem>>, vector<1x3x8xf32>
    %52 = vector.shape_cast %51 : vector<1x3x8xf32> to vector<3x8xf32>
    %cst_47 = arith.constant dense<0.000000e+00> : vector<3x384xf32>
    %53 = tpu.matmul %52, %50, %cst_47 {dimension_numbers = #tpu.dot_dimension_numbers<[1], [0], [0], [1], [0, 0, 1, 1], [], []>} : vector<3x8xf32>, vector<8x384xf32>, vector<3x384xf32> -> vector<3x384xf32>
    %54 = arith.addf %48, %53 : vector<3x384xf32>
    %c0_48 = arith.constant 0 : index
    %c0_49 = arith.constant 0 : index
    %55 = vector.load %arg3[%c0_48, %c0_49] : memref<3x1xf32, #tpu.memory_space<vmem>>, vector<3x1xf32>
    %56 = vector.broadcast %55 : vector<3x1xf32> to vector<3x384xf32>
    %57 = arith.addf %54, %56 : vector<3x384xf32>
    %c0_50 = arith.constant 0 : index
    %c0_51 = arith.constant 0 : index
    %c0_52 = arith.constant 0 : index
    %58 = vector.load %arg4[%c0_50, %c0_51, %c0_52] : memref<1x3x384xf32, #tpu.memory_space<vmem>>, vector<1x3x384xf32>
    %59 = vector.shape_cast %58 : vector<1x3x384xf32> to vector<3x384xf32>
    %60 = vector.shape_cast %57 : vector<3x384xf32> to vector<1x3x384xf32>
    tpu.vector_store %arg4[%c0_50, %c0_51, %c0_52], %60 {strides = array<i32>} : memref<1x3x384xf32, #tpu.memory_space<vmem>>, vector<1x3x384xf32>,
    return
  }
  func.func @transform_0(%arg0: i32) -> (i32, i32, i32) {
    %c0_i32 = arith.constant 0 : i32
    %c0_i32_0 = arith.constant 0 : i32
    %c0_i32_1 = arith.constant 0 : i32
    return %arg0, %c0_i32, %c0_i32_0 : i32, i32, i32
  }
  func.func @transform_1(%arg0: i32) -> (i32, i32, i32) {
    %c0_i32 = arith.constant 0 : i32
    %c0_i32_0 = arith.constant 0 : i32
    %c0_i32_1 = arith.constant 0 : i32
    %c0_i32_2 = arith.constant 0 : i32
    return %c0_i32, %c0_i32_0, %c0_i32_1 : i32, i32, i32
  }
  func.func @transform_2(%arg0: i32) -> (i32, i32) {
    %c0_i32 = arith.constant 0 : i32
    %c0_i32_0 = arith.constant 0 : i32
    %c0_i32_1 = arith.constant 0 : i32
    return %c0_i32, %c0_i32_0 : i32, i32
  }
  func.func @transform_3(%arg0: i32) -> (i32, i32, i32) {
    %c0_i32 = arith.constant 0 : i32
    %c0_i32_0 = arith.constant 0 : i32
    %c0_i32_1 = arith.constant 0 : i32
    return %arg0, %c0_i32, %c0_i32_0 : i32, i32, i32
  }
}

module attributes {stable_mosaic.version = 11 : i64} {
  func.func @_conv3x3_kernel(%arg0: i32, %arg1: memref<1x24x256xf32, #tpu.memory_space<vmem>>, %arg2: memref<9x8x6xf32, #tpu.memory_space<vmem>>, %arg3: memref<8x1xf32, #tpu.memory_space<vmem>>, %arg4: memref<1x8x128xf32, #tpu.memory_space<vmem>>) attributes {dimension_semantics = [#tpu.dimension_semantics<parallel>], iteration_bounds = array<i64: 2>, scalar_prefetch = 0 : i64, scratch_operands = 0 : i64, tpu.core_type = #tpu.core_type<tc>, window_params = [{transform_indices = @transform_0, window_bounds = array<i64: 1, 24, 256>}, {pipeline_mode = #tpu.pipeline_mode<synchronous>, transform_indices = @transform_1, window_bounds = array<i64: 9, 8, 6>}, {pipeline_mode = #tpu.pipeline_mode<synchronous>, transform_indices = @transform_2, window_bounds = array<i64: 8, 1>}, {transform_indices = @transform_3, window_bounds = array<i64: 1, 8, 128>}]} {
    %cst = arith.constant 0.000000e+00 : f32
    %0 = vector.broadcast %cst : f32 to vector<8x128xf32>
    %c0 = arith.constant 0 : index
    %c0_0 = arith.constant 0 : index
    %c0_1 = arith.constant 0 : index
    %1 = vector.load %arg1[%c0, %c0_0, %c0_1] : memref<1x24x256xf32, #tpu.memory_space<vmem>>, vector<1x6x128xf32>
    %2 = vector.shape_cast %1 : vector<1x6x128xf32> to vector<6x128xf32>
    %c0_2 = arith.constant 0 : index
    %c0_3 = arith.constant 0 : index
    %c0_4 = arith.constant 0 : index
    %3 = vector.load %arg2[%c0_2, %c0_3, %c0_4] : memref<9x8x6xf32, #tpu.memory_space<vmem>>, vector<1x8x6xf32>
    %4 = vector.shape_cast %3 : vector<1x8x6xf32> to vector<8x6xf32>
    %cst_5 = arith.constant dense<0.000000e+00> : vector<8x128xf32>
    %5 = tpu.matmul %4, %2, %cst_5 {dimension_numbers = #tpu.dot_dimension_numbers<[1], [0], [0], [1], [0, 0, 1, 1], [], []>} : vector<8x6xf32>, vector<6x128xf32>, vector<8x128xf32> -> vector<8x128xf32>
    %6 = arith.addf %0, %5 : vector<8x128xf32>
    %c0_6 = arith.constant 0 : index
    %c6 = arith.constant 6 : index
    %c0_7 = arith.constant 0 : index
    %7 = vector.load %arg1[%c0_6, %c6, %c0_7] : memref<1x24x256xf32, #tpu.memory_space<vmem>>, vector<1x6x128xf32>
    %8 = vector.shape_cast %7 : vector<1x6x128xf32> to vector<6x128xf32>
    %c1 = arith.constant 1 : index
    %c0_8 = arith.constant 0 : index
    %c0_9 = arith.constant 0 : index
    %9 = vector.load %arg2[%c1, %c0_8, %c0_9] : memref<9x8x6xf32, #tpu.memory_space<vmem>>, vector<1x8x6xf32>
    %10 = vector.shape_cast %9 : vector<1x8x6xf32> to vector<8x6xf32>
    %cst_10 = arith.constant dense<0.000000e+00> : vector<8x128xf32>
    %11 = tpu.matmul %10, %8, %cst_10 {dimension_numbers = #tpu.dot_dimension_numbers<[1], [0], [0], [1], [0, 0, 1, 1], [], []>} : vector<8x6xf32>, vector<6x128xf32>, vector<8x128xf32> -> vector<8x128xf32>
    %12 = arith.addf %6, %11 : vector<8x128xf32>
    %c0_11 = arith.constant 0 : index
    %c0_12 = arith.constant 0 : index
    %c1_13 = arith.constant 1 : index
    %13 = vector.load %arg1[%c0_11, %c0_12, %c1_13] : memref<1x24x256xf32, #tpu.memory_space<vmem>>, vector<1x6x128xf32>
    %14 = vector.shape_cast %13 : vector<1x6x128xf32> to vector<6x128xf32>
    %c2 = arith.constant 2 : index
    %c0_14 = arith.constant 0 : index
    %c0_15 = arith.constant 0 : index
    %15 = vector.load %arg2[%c2, %c0_14, %c0_15] : memref<9x8x6xf32, #tpu.memory_space<vmem>>, vector<1x8x6xf32>
    %16 = vector.shape_cast %15 : vector<1x8x6xf32> to vector<8x6xf32>
    %cst_16 = arith.constant dense<0.000000e+00> : vector<8x128xf32>
    %17 = tpu.matmul %16, %14, %cst_16 {dimension_numbers = #tpu.dot_dimension_numbers<[1], [0], [0], [1], [0, 0, 1, 1], [], []>} : vector<8x6xf32>, vector<6x128xf32>, vector<8x128xf32> -> vector<8x128xf32>
    %18 = arith.addf %12, %17 : vector<8x128xf32>
    %c0_17 = arith.constant 0 : index
    %c12 = arith.constant 12 : index
    %c0_18 = arith.constant 0 : index
    %19 = vector.load %arg1[%c0_17, %c12, %c0_18] : memref<1x24x256xf32, #tpu.memory_space<vmem>>, vector<1x6x128xf32>
    %20 = vector.shape_cast %19 : vector<1x6x128xf32> to vector<6x128xf32>
    %c3 = arith.constant 3 : index
    %c0_19 = arith.constant 0 : index
    %c0_20 = arith.constant 0 : index
    %21 = vector.load %arg2[%c3, %c0_19, %c0_20] : memref<9x8x6xf32, #tpu.memory_space<vmem>>, vector<1x8x6xf32>
    %22 = vector.shape_cast %21 : vector<1x8x6xf32> to vector<8x6xf32>
    %cst_21 = arith.constant dense<0.000000e+00> : vector<8x128xf32>
    %23 = tpu.matmul %22, %20, %cst_21 {dimension_numbers = #tpu.dot_dimension_numbers<[1], [0], [0], [1], [0, 0, 1, 1], [], []>} : vector<8x6xf32>, vector<6x128xf32>, vector<8x128xf32> -> vector<8x128xf32>
    %24 = arith.addf %18, %23 : vector<8x128xf32>
    %c0_22 = arith.constant 0 : index
    %c18 = arith.constant 18 : index
    %c0_23 = arith.constant 0 : index
    %25 = vector.load %arg1[%c0_22, %c18, %c0_23] : memref<1x24x256xf32, #tpu.memory_space<vmem>>, vector<1x6x128xf32>
    %26 = vector.shape_cast %25 : vector<1x6x128xf32> to vector<6x128xf32>
    %c4 = arith.constant 4 : index
    %c0_24 = arith.constant 0 : index
    %c0_25 = arith.constant 0 : index
    %27 = vector.load %arg2[%c4, %c0_24, %c0_25] : memref<9x8x6xf32, #tpu.memory_space<vmem>>, vector<1x8x6xf32>
    %28 = vector.shape_cast %27 : vector<1x8x6xf32> to vector<8x6xf32>
    %cst_26 = arith.constant dense<0.000000e+00> : vector<8x128xf32>
    %29 = tpu.matmul %28, %26, %cst_26 {dimension_numbers = #tpu.dot_dimension_numbers<[1], [0], [0], [1], [0, 0, 1, 1], [], []>} : vector<8x6xf32>, vector<6x128xf32>, vector<8x128xf32> -> vector<8x128xf32>
    %30 = arith.addf %24, %29 : vector<8x128xf32>
    %c0_27 = arith.constant 0 : index
    %c12_28 = arith.constant 12 : index
    %c1_29 = arith.constant 1 : index
    %31 = vector.load %arg1[%c0_27, %c12_28, %c1_29] : memref<1x24x256xf32, #tpu.memory_space<vmem>>, vector<1x6x128xf32>
    %32 = vector.shape_cast %31 : vector<1x6x128xf32> to vector<6x128xf32>
    %c5 = arith.constant 5 : index
    %c0_30 = arith.constant 0 : index
    %c0_31 = arith.constant 0 : index
    %33 = vector.load %arg2[%c5, %c0_30, %c0_31] : memref<9x8x6xf32, #tpu.memory_space<vmem>>, vector<1x8x6xf32>
    %34 = vector.shape_cast %33 : vector<1x8x6xf32> to vector<8x6xf32>
    %cst_32 = arith.constant dense<0.000000e+00> : vector<8x128xf32>
    %35 = tpu.matmul %34, %32, %cst_32 {dimension_numbers = #tpu.dot_dimension_numbers<[1], [0], [0], [1], [0, 0, 1, 1], [], []>} : vector<8x6xf32>, vector<6x128xf32>, vector<8x128xf32> -> vector<8x128xf32>
    %36 = arith.addf %30, %35 : vector<8x128xf32>
    %c0_33 = arith.constant 0 : index
    %c0_34 = arith.constant 0 : index
    %c9 = arith.constant 9 : index
    %37 = vector.load %arg1[%c0_33, %c0_34, %c9] : memref<1x24x256xf32, #tpu.memory_space<vmem>>, vector<1x6x128xf32>
    %38 = vector.shape_cast %37 : vector<1x6x128xf32> to vector<6x128xf32>
    %c6_35 = arith.constant 6 : index
    %c0_36 = arith.constant 0 : index
    %c0_37 = arith.constant 0 : index
    %39 = vector.load %arg2[%c6_35, %c0_36, %c0_37] : memref<9x8x6xf32, #tpu.memory_space<vmem>>, vector<1x8x6xf32>
    %40 = vector.shape_cast %39 : vector<1x8x6xf32> to vector<8x6xf32>
    %cst_38 = arith.constant dense<0.000000e+00> : vector<8x128xf32>
    %41 = tpu.matmul %40, %38, %cst_38 {dimension_numbers = #tpu.dot_dimension_numbers<[1], [0], [0], [1], [0, 0, 1, 1], [], []>} : vector<8x6xf32>, vector<6x128xf32>, vector<8x128xf32> -> vector<8x128xf32>
    %42 = arith.addf %36, %41 : vector<8x128xf32>
    %c0_39 = arith.constant 0 : index
    %c6_40 = arith.constant 6 : index
    %c9_41 = arith.constant 9 : index
    %43 = vector.load %arg1[%c0_39, %c6_40, %c9_41] : memref<1x24x256xf32, #tpu.memory_space<vmem>>, vector<1x6x128xf32>
    %44 = vector.shape_cast %43 : vector<1x6x128xf32> to vector<6x128xf32>
    %c7 = arith.constant 7 : index
    %c0_42 = arith.constant 0 : index
    %c0_43 = arith.constant 0 : index
    %45 = vector.load %arg2[%c7, %c0_42, %c0_43] : memref<9x8x6xf32, #tpu.memory_space<vmem>>, vector<1x8x6xf32>
    %46 = vector.shape_cast %45 : vector<1x8x6xf32> to vector<8x6xf32>
    %cst_44 = arith.constant dense<0.000000e+00> : vector<8x128xf32>
    %47 = tpu.matmul %46, %44, %cst_44 {dimension_numbers = #tpu.dot_dimension_numbers<[1], [0], [0], [1], [0, 0, 1, 1], [], []>} : vector<8x6xf32>, vector<6x128xf32>, vector<8x128xf32> -> vector<8x128xf32>
    %48 = arith.addf %42, %47 : vector<8x128xf32>
    %c0_45 = arith.constant 0 : index
    %c0_46 = arith.constant 0 : index
    %c10 = arith.constant 10 : index
    %49 = vector.load %arg1[%c0_45, %c0_46, %c10] : memref<1x24x256xf32, #tpu.memory_space<vmem>>, vector<1x6x128xf32>
    %50 = vector.shape_cast %49 : vector<1x6x128xf32> to vector<6x128xf32>
    %c8 = arith.constant 8 : index
    %c0_47 = arith.constant 0 : index
    %c0_48 = arith.constant 0 : index
    %51 = vector.load %arg2[%c8, %c0_47, %c0_48] : memref<9x8x6xf32, #tpu.memory_space<vmem>>, vector<1x8x6xf32>
    %52 = vector.shape_cast %51 : vector<1x8x6xf32> to vector<8x6xf32>
    %cst_49 = arith.constant dense<0.000000e+00> : vector<8x128xf32>
    %53 = tpu.matmul %52, %50, %cst_49 {dimension_numbers = #tpu.dot_dimension_numbers<[1], [0], [0], [1], [0, 0, 1, 1], [], []>} : vector<8x6xf32>, vector<6x128xf32>, vector<8x128xf32> -> vector<8x128xf32>
    %54 = arith.addf %48, %53 : vector<8x128xf32>
    %c0_50 = arith.constant 0 : index
    %c0_51 = arith.constant 0 : index
    %55 = vector.load %arg3[%c0_50, %c0_51] : memref<8x1xf32, #tpu.memory_space<vmem>>, vector<8x1xf32>
    %56 = vector.broadcast %55 : vector<8x1xf32> to vector<8x128xf32>
    %57 = arith.addf %54, %56 : vector<8x128xf32>
    %cst_52 = arith.constant 0.000000e+00 : f32
    %58 = vector.broadcast %cst_52 : f32 to vector<8x128xf32>
    %59 = arith.maximumf %57, %58 : vector<8x128xf32>
    %c0_53 = arith.constant 0 : index
    %c0_54 = arith.constant 0 : index
    %c0_55 = arith.constant 0 : index
    %60 = vector.load %arg4[%c0_53, %c0_54, %c0_55] : memref<1x8x128xf32, #tpu.memory_space<vmem>>, vector<1x8x128xf32>
    %61 = vector.shape_cast %60 : vector<1x8x128xf32> to vector<8x128xf32>
    %62 = vector.shape_cast %59 : vector<8x128xf32> to vector<1x8x128xf32>
    tpu.vector_store %arg4[%c0_53, %c0_54, %c0_55], %62 {strides = array<i32>} : memref<1x8x128xf32, #tpu.memory_space<vmem>>, vector<1x8x128xf32>,
    return
  }
  func.func @transform_0(%arg0: i32) -> (i32, i32, i32) {
    %c0_i32 = arith.constant 0 : i32
    %c0_i32_0 = arith.constant 0 : i32
    %c0_i32_1 = arith.constant 0 : i32
    return %arg0, %c0_i32, %c0_i32_0 : i32, i32, i32
  }
  func.func @transform_1(%arg0: i32) -> (i32, i32, i32) {
    %c0_i32 = arith.constant 0 : i32
    %c0_i32_0 = arith.constant 0 : i32
    %c0_i32_1 = arith.constant 0 : i32
    %c0_i32_2 = arith.constant 0 : i32
    return %c0_i32, %c0_i32_0, %c0_i32_1 : i32, i32, i32
  }
  func.func @transform_2(%arg0: i32) -> (i32, i32) {
    %c0_i32 = arith.constant 0 : i32
    %c0_i32_0 = arith.constant 0 : i32
    %c0_i32_1 = arith.constant 0 : i32
    return %c0_i32, %c0_i32_0 : i32, i32
  }
  func.func @transform_3(%arg0: i32) -> (i32, i32, i32) {
    %c0_i32 = arith.constant 0 : i32
    %c0_i32_0 = arith.constant 0 : i32
    %c0_i32_1 = arith.constant 0 : i32
    return %arg0, %c0_i32, %c0_i32_0 : i32, i32, i32
  }
}

</mosaic_0001>

<bundles_post_ra>
// kernel: tile.22
= control target key start
LH: loop header
LB: loop body
LE: loop exit
PB: predicated region body
PF: predicated region fallthrough
CT: control target
= control target key end

     0   :  { %s22_s0 = inlined_call_operand.vmem [shape: f32[8], index: 0, kind: input, shape index: {}]   ;;  %s23_s1 = inlined_call_operand.vmem [shape: f32[2,8], index: 1, kind: output, shape index: {}]  }
   0x1   :  { %v4_v0 = vld [vmem:[%s22_s0] ss:$0 sm:$0xff] }
   0x2   :  { %5 = vst [vmem:[%s23_s1] sm:$0x3] %v4_v0 }

// kernel: tile.0
= control target key start
LH: loop header
LB: loop body
LE: loop exit
PB: predicated region body
PF: predicated region fallthrough
CT: control target
= control target key end

     0   :  { %s135_s0 = inlined_call_operand.vmem [shape: f32[2,8], index: 0, kind: input, shape index: {}]   ;;  %s136_s1 = inlined_call_operand.hbm [shape: f32[16,1], index: 1, kind: output, shape index: {}]  }
   0x1   :  { %v5_v0 = vld [vmem:[%s135_s0] sm:$0x3] }
   0x2   :  { %6 = vst [vmem:[#allocation2] sm:$0x3] %v5_v0 }
   0x3   :  { %2 = vsyncpa [#allocation1], 0  ;;  %s94_s0 = smov 127   ;;  %s95_s8 = smov 125   ;;  %vm8_vm0 = vcmask 7168  }
   0x4   :  { %s96_s9 = smov 126   ;;  %s97_s10 = smov 124  }
   0x5   :  { %s98_s11 = smov 123   ;;  %s99_s12 = smov 122  }
   0x6   :  { %s100_s13 = smov 121   ;;  %s101_s14 = smov [#allocation0]  }
   0x7   :  { %s56_s15 = sshll.u32 %s101_s14, 4  ;;  %s57_s15 = int_to_ptr.vmem [resolvable:$true] %s56_s15 }
   0x8   :  { %s70_s16 = scalar_lea.vmem %s57_s15, 256  ;;  %p75_p1 = scmp.lt.s32.totalorder %s57_s15, %s57_s15 }
   0x9   :  { %v10_v1 = vld [vmem:[#allocation2] sm:$0x3]   ;;  %p71_p0 = scmp.ne.s32.totalorder %s57_s15, %s70_s16  ;;  %p76_p2 = scmp.lt.s32.totalorder %s70_s16, %s70_s16 }
   0xa   :  { %v22_v2 = vld [vmem:[#allocation2] sm:$0x3]   ;;  %11 = vrot.lane.b32.xlu0 %v10_v1, %s94_s0 }
   0xb   :  { %23 = vrot.lane.b32.xlu1 %v22_v2, %s95_s8  ;;  %v16_v3 = vld [vmem:[#allocation2] sm:$0x3]   ;;  %p77_p3 = por %p76_p2, %p75_p1 }
   0xc   :  { %v28_v4 = vld [vmem:[#allocation2] sm:$0x3]  }
   0xd   :  { %v7_v5 = vld [vmem:[#allocation2] sm:$0x3]   ;;  %p78_p4 = pnand %p77_p3, %p71_p0 }
   0xe   :  { %9 = vst.msk [vmem:[#allocation0] ss:$8 sm:$0x3] %vm8_vm0, %v7_v5   ;;  %17 = vrot.lane.b32.xlu0 %v16_v3, %s96_s9  ;;  %v34_v6 = vld [vmem:[#allocation2] sm:$0x3]  }
   0xf   :  { %29 = vrot.lane.b32.xlu1 %v28_v4, %s97_s10  ;;  %v40_v7 = vld [vmem:[#allocation2] sm:$0x3]  }
  0x10   :  { %v46_v8 = vld [vmem:[#allocation2] sm:$0x3]  }
  0x12   :  { %35 = vrot.lane.b32.xlu0 %v34_v6, %s98_s11 }
  0x13   :  { %41 = vrot.lane.b32.xlu1 %v40_v7, %s99_s12 }
  0x16   :  { %47 = vrot.lane.b32.xlu0 %v46_v8, %s100_s13 }
  0x7c   :  { %v12_v9 = vpop.permute.xlu0 %11  }
  0x7d   :  { %v24_v10 = vpop.permute.xlu1 %23   ;;  %15 = vst.msk [vmem:[#allocation0 + $0x1] ss:$8 sm:$0x3] %vm8_vm0, %v12_v9  }
  0x7e   :  { %27 = vst.msk [vmem:[#allocation0 + $0x3] ss:$8 sm:$0x3] %vm8_vm0, %v24_v10  }
  0x80   :  { %v18_v11 = vpop.permute.xlu0 %17  }
  0x81   :  { %v30_v12 = vpop.permute.xlu1 %29   ;;  %21 = vst.msk [vmem:[#allocation0 + $0x2] ss:$8 sm:$0x3] %vm8_vm0, %v18_v11  }
  0x82   :  { %33 = vst.msk [vmem:[#allocation0 + $0x4] ss:$8 sm:$0x3] %vm8_vm0, %v30_v12  }
  0x84   :  { %v36_v13 = vpop.permute.xlu0 %35  }
  0x85   :  { %v42_v14 = vpop.permute.xlu1 %41   ;;  %39 = vst.msk [vmem:[#allocation0 + $0x5] ss:$8 sm:$0x3] %vm8_vm0, %v36_v13  }
  0x86   :  { %45 = vst.msk [vmem:[#allocation0 + $0x6] ss:$8 sm:$0x3] %vm8_vm0, %v42_v14  }
  0x88   :  { %v48_v15 = vpop.permute.xlu0 %47  }
  0x89   :  { %51 = vst.msk [vmem:[#allocation0 + $0x7] ss:$8 sm:$0x3] %vm8_vm0, %v48_v15  }
  0x8a   :  { %81 = shalt.err (!%p78_p4)
}
  0x8b   :  { %s82_s19 = scalar_lea.hbm %s136_s1, 256 }
  0x8c   :  { %p83_p5 = scmp.ne.s32.totalorder %s136_s1, %s82_s19  ;;  %p86_p6 = scmp.lt.u32.totalorder %s82_s19, %s136_s1 }
  0x8e   :  { %p88_p7 = pnand %p86_p6, %p83_p5 }
  0x90   :  { %91 = shalt.err (!%p88_p7)
}
  0x91   :  { %59 = dma.vmem_to_hbm [thread:$0]  %s57_s15, 256, %s136_s1, [#allocation1]  }
  0x92   :  { %92 = dma.done.wait [#allocation1], 256  }
  0x93   :  { %93 = vsyncadd [#allocation1], 4294967040 }
  0x94   :  { %61 = vsyncpa [#allocation1], 1 }

// kernel: a_call__.26
= control target key start
LH: loop header
LB: loop body
LE: loop exit
PB: predicated region body
PF: predicated region fallthrough
CT: control target
= control target key end

     0   :  { %8 = vsyncpa [#allocation3], 0  ;;  %s1698_s0 = inlined_call_operand.hbm [shape: f32[2,32,256], index: 0, kind: input, shape index: {}]   ;;  %s1699_s1 = inlined_call_operand.hbm [shape: f32[9,8,8], index: 1, kind: input, shape index: {}]   ;;  %s1700_s2 = inlined_call_operand.hbm [shape: f32[8,1], index: 2, kind: input, shape index: {}]   ;;  %s1701_s3 = inlined_call_operand.hbm [shape: f32[2,8,128], index: 3, kind: output, shape index: {}]  }
   0x1   :  { %10 = vsyncpa [#allocation3 + $0x1], 0 }
   0x2   :  { %11 = vsyncpa [#allocation6], 0 }
   0x3   :  { %12 = vsyncpa [#allocation4], 0 }
   0x4   :  { %14 = vsyncpa [#allocation4 + $0x1], 0  ;;  %s1418_s12 = smov 0   ;;  %s1420_s13 = smov 0  }
   0x5   :  { %s1422_s14 = smov 0   ;;  %s1424_s15 = smov 0  }
   0x6 LB: > { %s1439_s16 = sadd.s32 4294967295, %s1382_s15   ;;  %s1058_s17 = sadd.s32 4294967294, %s1382_s15   ;;  %s1382_s15 = sphi %s1424_s15, %s1721_s15   ;;  %s1378_s14 = sphi %s1422_s14, %s1720_s14   ;;  %s1374_s13 = sphi %s1420_s13, %s1719_s13   ;;  %s1370_s12 = sphi %s1418_s12, %s1718_s12  }
   0x7   : > { %p40_p0 = scmp.ne.s32.totalorder %s1374_s13, %s1370_s12  ;;  %p1702_p1 = scmp.eq.s32.totalorder %s1439_s16, 0 }
   0x8   : > { %p112_p3 = scmp.eq.s32.totalorder %s1058_s17, 1  ;;  %p1059_p5 = scmp.ge.s32.totalorder %s1382_s15, 1 }
   0x9   : > { %p1448_p4 = por %p1702_p1, %p40_p0  ;;  %p119_p7 = scmp.lt.s32.totalorder %s1382_s15, 3 }
   0xa   : > { %p1453_p6 = por %p112_p3, %p40_p0  ;;  %s1384_s21 = smov [#allocation5]  }
   0xb   : > { %s1705_s18 = scalar_select %p1448_p4, 1, 0 }
   0xc   : > { %s1706_s19 = scalar_select %p1453_p6, 1, 0 }
   0xd   : > { %p1458_p8 = pnand %p1059_p5, %p119_p7  ;;  %s131_s22 = sshll.u32 %s1384_s21, 4  ;;  %s1462_s22 = int_to_ptr.vmem [resolvable:$true] %s131_s22 }
   0xe   : > { %s1385_s24 = smov [#allocation7]   ;;  %s1226_s28 = scalar_lea.hbm %s1699_s1, 1152 }
   0xf   : > { %p1160_p9 = pneg %p1458_p8  ;;  %s145_s25 = sshll.u32 %s1385_s24, 4  ;;  %s1473_s25 = int_to_ptr.vmem [resolvable:$true] %s145_s25 }
  0x10   : > { %p1227_p12 = scmp.ne.s32.totalorder %s1699_s1, %s1226_s28  ;;  %p1233_p5 = scmp.lt.u32.totalorder %s1226_s28, %s1699_s1 }
  0x11   : > { %p1469_p11 = pnand %p1160_p9, %p1702_p1 }
  0x13   : > { %p1228_p13 = pneg %p1469_p11 }
  0x15   : > { %p1229_p0 = pnand %p1228_p13, %p1227_p12 }
  0x17   : > { %p1230_p3 = pneg %p1229_p0 }
  0x19   : > { %p1235_p7 = pnand %p1233_p5, %p1230_p3 }
  0x1b   : > { %1238 = shalt.err (!%p1235_p7)
}
  0x1c   : > { %s1239_s6 = scalar_lea.vmem %s1462_s22, 1152  ;;  %p1247_p2 = scmp.lt.s32.totalorder %s1462_s22, %s1462_s22 }
  0x1d   : > { %p1240_p9 = scmp.ne.s32.totalorder %s1462_s22, %s1239_s6  ;;  %p1248_p12 = scmp.lt.s32.totalorder %s1239_s6, %s1239_s6 }
  0x1f   : > { %p1242_p10 = pnand %p1240_p9, %p1228_p13  ;;  %p1249_p0 = por %p1248_p12, %p1247_p2 }
  0x21   : > { %p1243_p1 = pneg %p1242_p10 }
  0x23   : > { %p1250_p6 = pnand %p1249_p0, %p1243_p1 }
  0x25   : > { %1253 = shalt.err (!%p1250_p6)
}
  0x26   : > { %s1386_s7 = smov 128   ;;  %s1387_s8 = smov 8  }
  0x27   : > { %1163 = dma.hbm_to_vmem [thread:$0]  (!%p1469_p11), %s1699_s1, 1152, %s1462_s22, [#allocation6], %s1386_s7, %s1386_s7, %s1387_s8  }
  0x28   : > { %s1254_s21 = scalar_lea.hbm %s1700_s2, 128 }
  0x29   : > { %p1255_p2 = scmp.ne.s32.totalorder %s1700_s2, %s1254_s21  ;;  %p1261_p10 = scmp.lt.u32.totalorder %s1254_s21, %s1700_s2 }
  0x2b   : > { %p1257_p1 = pnand %p1255_p2, %p1228_p13 }
  0x2d   : > { %p1258_p6 = pneg %p1257_p1 }
  0x2f   : > { %p1263_p3 = pnand %p1261_p10, %p1258_p6 }
  0x31   : > { %1266 = shalt.err (!%p1263_p3)
}
  0x32   : > { %s1267_s22 = scalar_lea.vmem %s1473_s25, 128  ;;  %p1275_p12 = scmp.lt.s32.totalorder %s1473_s25, %s1473_s25 }
  0x33   : > { %p1268_p5 = scmp.ne.s32.totalorder %s1473_s25, %s1267_s22  ;;  %p1276_p0 = scmp.lt.s32.totalorder %s1267_s22, %s1267_s22 }
  0x35   : > { %p1270_p7 = pnand %p1268_p5, %p1228_p13  ;;  %p1277_p2 = por %p1276_p0, %p1275_p12 }
  0x37   : > { %p1271_p9 = pneg %p1270_p7 }
  0x39   : > { %p1278_p1 = pnand %p1277_p2, %p1271_p9 }
  0x3b   : > { %1281 = shalt.err (!%p1278_p1)
}
  0x3c   : > { %1166 = dma.hbm_to_vmem [thread:$0]  (!%p1469_p11), %s1700_s2, 128, %s1473_s25, [#allocation6]  }
  0x3d   : > { %s1528_s4 = sadd.s32 1, %s1382_s15   ;;  %s27_s23 = sadd.s32 1, %s1378_s14 }
  0x3e   : > { %s24_s5 = ssub.s32 %s1382_s15, %s1528_s4  ;;  %p34_p13 = scmp.ne.s32.totalorder %s1378_s14, %s1374_s13 }
  0x3f   : > { %p25_p6 = scmp.eq.s32.totalorder %s24_s5, 0  ;;  %p35_p10 = scmp.eq.s32.totalorder %s1382_s15, 0 }
  0x40   : > { %p1709_p3 = scmp.eq.s32.totalorder %s1439_s16, 1  ;;  %p1177_p7 = scmp.lt.s32.totalorder %s1382_s15, 2 }
  0x41   : > { %s1544_s7 = scalar_select %p25_p6, %s1378_s14, %s27_s23  }
  0x42   : > { %p1538_p5 = por %p1709_p3, %p34_p13  ;;  %p36_p9 = por %p35_p10, %p34_p13 }
  0x43   : > { %s156_s8 = sand.u32 1, %s1378_s14   ;;  %s1084_s25 = sshll.u32 %s1382_s15, 10 }
  0x44   : > { %s1710_s6 = scalar_select %p1538_p5, 1, 0 }
  0x45   : > { %s1063_s9 = sshll.u32 %s156_s8, 6  ;;  %s1551_s17 = scalar_lea.hbm %s1698_s0, %s1084_s25 }
  0x46   : > { %s160_s21 = scalar_lea.vmem [#allocation2], %s1063_s9  ;;  %p1555_p11 = pnand %p1177_p7, %p36_p9 }
  0x47   : > { %s167_s24 = sshll.u32 %s160_s21, 4  ;;  %s1559_s27 = scalar_lea.sflag [#allocation3], %s156_s8  ;;  %s1553_s24 = int_to_ptr.vmem [resolvable:$true] %s167_s24 }
  0x48   : > { %s1282_s28 = scalar_lea.hbm %s1551_s17, 1024  ;;  %p1284_p0 = pneg %p1555_p11 }
  0x49   : > { %p1283_p12 = scmp.ne.s32.totalorder %s1551_s17, %s1282_s28  ;;  %s1287_s30 = scalar_lea.hbm %s1698_s0, 2048 }
  0x4a   : > { %p1288_p13 = scmp.lt.u32.totalorder %s1551_s17, %s1698_s0  ;;  %p1289_p6 = scmp.lt.u32.totalorder %s1287_s30, %s1282_s28 }
  0x4b   : > { %p1285_p2 = pnand %p1284_p0, %p1283_p12  ;;  %p1291_p3 = scmp.lt.u32.totalorder %s1282_s28, %s1551_s17 }
  0x4c   : > { %p1290_p10 = por %p1289_p6, %p1288_p13 }
  0x4d   : > { %p1286_p1 = pneg %p1285_p2 }
  0x4e   : > { %p1292_p7 = por %p1291_p3, %p1290_p10 }
  0x50   : > { %p1293_p9 = pnand %p1292_p7, %p1286_p1 }
  0x52   : > { %1296 = shalt.err (!%p1293_p9)
}
  0x53   : > { %s1297_s8 = scalar_lea.vmem %s1553_s24, 1024  ;;  %s1388_s9 = smov [#allocation2]  }
  0x54   : > { %p1298_p12 = scmp.ne.s32.totalorder %s1553_s24, %s1297_s8  ;;  %s1302_s25 = sshll.u32 %s1388_s9, 4  ;;  %s1303_s25 = int_to_ptr.vmem [resolvable:$false] %s1302_s25 }
  0x55   : > { %s1304_s10 = scalar_lea.vmem %s1303_s25, 2048  ;;  %p1305_p4 = scmp.lt.s32.totalorder %s1553_s24, %s1303_s25 }
  0x56   : > { %p1300_p2 = pnand %p1298_p12, %p1284_p0  ;;  %p1306_p13 = scmp.lt.s32.totalorder %s1304_s10, %s1297_s8 }
  0x58   : > { %p1301_p5 = pneg %p1300_p2  ;;  %p1307_p6 = por %p1306_p13, %p1305_p4 }
  0x5a   : > { %p1308_p10 = pnand %p1307_p6, %p1301_p5 }
  0x5c   : > { %1311 = shalt.err (!%p1308_p10)
}
  0x5d   : > { %s1389_s11 = smov 256   ;;  %s1390_s21 = smov 16  }
  0x5e   : > { %1170 = dma.hbm_to_vmem [thread:$0]  (!%p1555_p11), %s1551_s17, 1024, %s1553_s24, %s1559_s27, %s1389_s11, %s1389_s11, %s1390_s21  }
  0x5f   : > { %179 = sbr.rel (%p1458_p8) target bundleno = 472 (0x1d8), region = 32  ;;  %s1590_s28 = sand.u32 (!%p1458_p8), 1, %s1374_s13  }
  0x60   : > { %s1067_s22 = sshll.u32 (!%p1458_p8), %s1590_s28, 6  ;;  %s182_s29 = scalar_lea.sflag (!%p1458_p8), [#allocation3], %s1590_s28 }
  0x61   : > { %s1594_s30 = scalar_lea.vmem (!%p1458_p8), [#allocation2], %s1067_s22  ;;  %p1712_p4 = scmp.ne.s32.totalorder (!%p1458_p8), %s1705_s18, 0 }
  0x66   : > { %1357 = dma.done.wait (%p1712_p4), %s182_s29, 1024  }
  0x67   : > { %1359 = vsyncadd (%p1712_p4), %s182_s29, 4294966272  ;;  %p1713_p5 = scmp.eq.s32.totalorder %s1439_s16, 0 }
  0x69   : > { %1361 = dma.done.wait (%p1713_p5), [#allocation6], 1280   ;;  %p1714_p8 = pmov %p1713_p5 }
  0x6a   : > { %v1391_v0 = vmov 0.0   ;;  %vm1392_vm0 = vmmov 0   ;;  %v609_v1 = vld [vmem:[%s1594_s30 + $0x20] sm:$0xff]  ;;  %vm221_vm1 = vcmask 64512   ;;  %s1393_s18 = smov 127   ;;  %v610_v3 = vld [vmem:[%s1594_s30 + $0x28] sm:$0xff] }
  0x6b   : > { %1363 = vsyncadd (%p1714_p8), [#allocation6], 4294966016  ;;  %1108 = vmatprep.subr.mxu1 %v1391_v0  ;;  %1103 = vmatprep.subr.mxu0 %v1391_v0  ;;  %v368_v2 = vld [vmem:[%s1594_s30] sm:$0xff]  ;;  %v369_v5 = vld [vmem:[%s1594_s30 + $0x8] sm:$0xff]  ;;  %s1394_s20 = smov 123   ;;  %v1395_v10 = vmov 0  }
  0x6c   : > { %1110 = vmatprep.mubr.msk.f32.mxu1 %vm1392_vm0, %v1391_v0  ;;  %1105 = vmatprep.mubr.msk.f32.mxu0 %vm1392_vm0, %v1391_v0  ;;  %v217_v4 = vld [vmem:[#allocation5] sm:$0xff]  ;;  %v778_v6 = vld [vmem:[%s1594_s30 + $0x10] sm:$0xff]  ;;  %v220_v7 = vld [vmem:[#allocation5 + $0x8] sm:$0xff]  ;;  %s1396_s17 = smov 122   ;;  %vm378_vm2 = vcmask 1039360   ;;  %vm701_vm3 = vcmask 1006592  }
  0x6d   : > { %615 = vrot.lane.b32.xlu1 %v609_v1, %s1393_s18  ;;  %374 = vrot.lane.b32.xlu0 %v368_v2, %s1393_s18  ;;  %v457_v8 = vld [vmem:[#allocation5 + $0x18] sm:$0xff]  ;;  %v947_v11 = vld [vmem:[#allocation7] sm:$0xff]  ;;  %v371_v16 = vld [vmem:[#allocation5 + $0x10] sm:$0xff]  ;;  %vm870_vm4 = vcmask 998400   ;;  %s1070_s24 = sshll.u32 %s1590_s28, 3  ;;  %s1081_s26 = sshll.u32 %s1439_s16, 7 }
  0x6e   : > { %1109 = vmatpush3.msra.mxu1 %v368_v2  ;;  %1104 = vmatpush3.msra.mxu0 %v778_v6  ;;  %v779_v9 = vld [vmem:[%s1594_s30 + $0x18] sm:$0xff]  ;;  %v532_v19 = vld [vmem:[%s1594_s30 + $0x30] sm:$0xff]  ;;  %v612_v20 = vld [vmem:[#allocation5 + $0x28] sm:$0xff]  ;;  %s215_s27 = scalar_lea.vmem [#allocation8], %s1070_s24  ;;  %s1654_s9 = scalar_lea.hbm %s1701_s3, %s1081_s26 }
  0x6f   : > { %1111 = vmatmul.mubr.msk.f32.vlgmr.msra.gmra.mrb[0].mxu1 %vm221_vm1, %v217_v4  ;;  %1106 = vmatmul.mubr.msk.f32.vlgmr.msra.gmra.mrb[0].mxu0 %vm221_vm1, %v220_v7  ;;  %v534_v23 = vld [vmem:[#allocation5 + $0x20] sm:$0xff]  ;;  %v696_v27 = vld [vmem:[#allocation5 + $0x30] sm:$0xff]  ;;  %v781_v28 = vld [vmem:[#allocation5 + $0x38] sm:$0xff]  ;;  %s969_s23 = sshll.u32 %s215_s27, 4  ;;  %s956_s25 = scalar_lea.sflag [#allocation4], %s1590_s28  ;;  %s1656_s23 = int_to_ptr.vmem [resolvable:$true] %s969_s23 }
  0x70   : > { %1118 = vmatprep.subr.mxu1 %v1391_v0  ;;  %1113 = vmatprep.subr.mxu0 %v1391_v0  ;;  %v865_v32 = vld [vmem:[#allocation5 + $0x40] sm:$0xff]  ;;  %s1312_s10 = scalar_lea.vmem %s1656_s23, 128  ;;  %p1715_p0 = scmp.ne.s32.totalorder %s1710_s6, 0 }
  0x71   : > { %617 = vrot.lane.b32.xlu1 %v610_v3, %s1393_s18  ;;  %376 = vrot.lane.b32.xlu0 %v369_v5, %s1393_s18  ;;  %p1313_p11 = scmp.ne.s32.totalorder %s1656_s23, %s1312_s10  ;;  %s1397_s16 = smov [#allocation8]  }
  0x72   : > { %1119 = vmatpush3.msra.mxu1 %v609_v1  ;;  %1120 = vmatprep.mubr.msk.f32.mxu1 %vm1392_vm0, %v1391_v0  ;;  %s1316_s11 = sshll.u32 %s1397_s16, 4  ;;  %s1317_s11 = int_to_ptr.vmem [resolvable:$false] %s1316_s11 }
  0x73   : > { %1128 = vmatprep.subr.mxu1 %v1391_v0  ;;  %1115 = vmatprep.mubr.msk.f32.mxu0 %vm1392_vm0, %v1391_v0  ;;  %p1314_p1 = pnand %p1313_p11, %p1715_p0  ;;  %s1318_s21 = scalar_lea.vmem %s1317_s11, 256 }
  0x74   : > { %1121 = vmatmul.mubr.msk.f32.vlgmr.msra.gmra.mrb[2].mxu1 %vm221_vm1, %v457_v8  ;;  %1225 = vset.pattern.permute.xlu0 %v1395_v10  ;;  %p1319_p7 = scmp.lt.s32.totalorder %s1656_s23, %s1317_s11  ;;  %p1320_p9 = scmp.lt.s32.totalorder %s1318_s21, %s1312_s10 }
  0x75   : > { %699 = vrot.lane.b32.xlu1 %v369_v5, %s1394_s20  ;;  %697 = vrot.lane.b32.xlu0 %v368_v2, %s1394_s20  ;;  %p1315_p3 = pneg %p1314_p1 }
  0x76   : > { %1130 = vmatprep.mubr.msk.f32.mxu1 %vm1392_vm0, %v1391_v0  ;;  %p1321_p12 = por %p1320_p9, %p1319_p7 }
  0x78   : > { %p1322_p2 = pnand %p1321_p12, %p1315_p3 }
  0x79   : > { %786 = vrot.lane.b32.xlu1 %v779_v9, %s1394_s20  ;;  %784 = vrot.lane.b32.xlu0 %v778_v6, %s1394_s20 }
  0x7d   : > { %868 = vrot.lane.b32.xlu1 %v369_v5, %s1396_s17  ;;  %866 = vrot.lane.b32.xlu0 %v368_v2, %s1396_s17 }
  0x81   : > { %950 = vperm.xlu0 %1225, %v947_v11  }
  0xdf   : > { %v616_v12 = vpop.permute.xlu1 %615  ;;  %v375_v13 = vpop.permute.xlu0 %374 }
  0xe3   : > { %v618_v14 = vpop.permute.xlu1 %617  ;;  %v377_v15 = vpop.permute.xlu0 %376 }
  0xe4   : > { %v619_v17 = vsel %vm378_vm2, %v616_v12, %v618_v14  ;;  %v379_v18 = vsel %vm378_vm2, %v375_v13, %v377_v15 }
  0xe5   : > { %1114 = vmatpush3.msra.mxu0 %v379_v18  ;;  %1129 = vmatpush3.msra.mxu1 %v619_v17 }
  0xe6   : > { %1116 = vmatmul.mubr.msk.f32.vlgmr.msra.gmra.mrb[2].mxu0 %vm221_vm1, %v371_v16  ;;  %1123 = vmatprep.subr.mxu0 %v1391_v0 }
  0xe7   : > { %v700_v21 = vpop.permute.xlu1 %699  ;;  %v698_v22 = vpop.permute.xlu0 %697  ;;  %1124 = vmatpush3.msra.mxu0 %v532_v19  ;;  %1125 = vmatprep.mubr.msk.f32.mxu0 %vm1392_vm0, %v1391_v0 }
  0xe8   : > { %v702_v24 = vsel %vm701_vm3, %v698_v22, %v700_v21  ;;  %1133 = vmatprep.subr.mxu0 %v1391_v0  ;;  %1138 = vmatprep.subr.mxu1 %v1391_v0 }
  0xe9   : > { %1131 = vmatmul.mubr.msk.f32.vlgmr.msra.gmra.mrb[4].mxu1 %vm221_vm1, %v612_v20 }
  0xea   : > { %1126 = vmatmul.mubr.msk.f32.vlgmr.msra.gmra.mrb[4].mxu0 %vm221_vm1, %v534_v23  ;;  %1140 = vmatprep.mubr.msk.f32.mxu1 %vm1392_vm0, %v1391_v0 }
  0xeb   : > { %1134 = vmatpush3.msra.mxu0 %v702_v24  ;;  %v787_v25 = vpop.permute.xlu1 %786  ;;  %v785_v26 = vpop.permute.xlu0 %784  ;;  %1135 = vmatprep.mubr.msk.f32.mxu0 %vm1392_vm0, %v1391_v0 }
  0xec   : > { %v788_v29 = vsel %vm701_vm3, %v785_v26, %v787_v25  ;;  %1143 = vmatprep.subr.mxu0 %v1391_v0 }
  0xed   : > { %1139 = vmatpush3.msra.mxu1 %v788_v29 }
  0xee   : > { %1136 = vmatmul.mubr.msk.f32.vlgmr.msra.gmra.mrb[6].mxu0 %vm221_vm1, %v696_v27  ;;  %1141 = vmatmul.mubr.msk.f32.vlgmr.msra.gmra.mrb[6].mxu1 %vm221_vm1, %v781_v28 }
  0xef   : > { %v869_v30 = vpop.permute.xlu1 %868  ;;  %v867_v31 = vpop.permute.xlu0 %866  ;;  %1145 = vmatprep.mubr.msk.f32.mxu0 %vm1392_vm0, %v1391_v0 }
  0xf0   : > { %v871_v33 = vsel %vm870_vm4, %v867_v31, %v869_v30 }
  0xf1   : > { %1144 = vmatpush3.msra.mxu0 %v871_v33 }
  0xf2   : > { %1146 = vmatmul.mubr.msk.f32.vlgmr.msra.gmra.mrb[8].mxu0 %vm221_vm1, %v865_v32 }
 0x100   : > { %v951_v58 = vpop.permute.xlu0 %950 }
 0x142   : > { %v364_v34 = vpop.f32.mrb[0].mxu1  ;;  %v291_v35 = vpop.f32.mrb[0].mxu0 }
 0x143   : > { %v1112_v36 = vpop.f32.mrb[1].mxu1  ;;  %v1107_v37 = vpop.f32.mrb[1].mxu0  ;;  %v365_v38 = vadd.f32 %v364_v34, %v291_v35 }
 0x147   : > { %v527_v39 = vpop.f32.mrb[2].mxu1 }
 0x148   : > { %v1122_v40 = vpop.f32.mrb[3].mxu1 }
 0x1b9   : > { %v450_v41 = vpop.f32.mrb[2].mxu0 }
 0x1ba   : > { %v454_v42 = vadd.f32 %v450_v41, %v365_v38  ;;  %v1117_v43 = vpop.f32.mrb[3].mxu0 }
 0x1bc   : > { %v531_v44 = vadd.f32 %v527_v39, %v454_v42  ;;  %v690_v45 = vpop.f32.mrb[4].mxu1 }
 0x1bd   : > { %v604_v46 = vpop.f32.mrb[4].mxu0  ;;  %v1132_v47 = vpop.f32.mrb[5].mxu1 }
 0x1be   : > { %v608_v48 = vadd.f32 %v604_v46, %v531_v44  ;;  %v1127_v49 = vpop.f32.mrb[5].mxu0 }
 0x1c0   : > { %v694_v50 = vadd.f32 %v690_v45, %v608_v48 }
 0x1c1   : > { %v773_v51 = vpop.f32.mrb[6].mxu0  ;;  %v859_v52 = vpop.f32.mrb[6].mxu1 }
 0x1c2   : > { %v777_v53 = vadd.f32 %v773_v51, %v694_v50  ;;  %v1137_v54 = vpop.f32.mrb[7].mxu0  ;;  %v1142_v55 = vpop.f32.mrb[7].mxu1 }
 0x1c4   : > { %v863_v56 = vadd.f32 %v859_v52, %v777_v53 }
 0x1c5   : > { %v942_v57 = vpop.f32.mrb[8].mxu0 }
 0x1c6   : > { %v946_v59 = vadd.f32 %v942_v57, %v863_v56  ;;  %v1147_v60 = vpop.f32.mrb[9].mxu0 }
 0x1c8   : > { %v953_v61 = vadd.f32 %v951_v58, %v946_v59 }
 0x1ca   : > { %954 = vst [vmem:[%s215_s27] sm:$0xff] %v953_v61 }
 0x1cb   : > { %1325 = shalt.err (!%p1322_p2)
}
 0x1cc   : > { %s1326_s28 = scalar_lea.hbm %s1654_s9, 128  ;;  %s1330_s30 = scalar_lea.hbm %s1701_s3, 256 }
 0x1cd   : > { %p1327_p13 = scmp.ne.s32.totalorder %s1654_s9, %s1326_s28  ;;  %p1331_p4 = scmp.lt.u32.totalorder %s1654_s9, %s1701_s3 }
 0x1ce   : > { %p1332_p5 = scmp.lt.u32.totalorder %s1330_s30, %s1326_s28  ;;  %p1334_p11 = scmp.lt.u32.totalorder %s1326_s28, %s1654_s9 }
 0x1cf   : > { %p1328_p6 = pnand %p1327_p13, %p1715_p0 }
 0x1d0   : > { %p1333_p8 = por %p1332_p5, %p1331_p4 }
 0x1d1   : > { %p1329_p10 = pneg %p1328_p6 }
 0x1d2   : > { %p1335_p1 = por %p1334_p11, %p1333_p8 }
 0x1d4   : > { %p1336_p3 = pnand %p1335_p1, %p1329_p10 }
 0x1d6   : > { %1339 = shalt.err (!%p1336_p3)
}
 0x1d7   : > { %1158 = dma.vmem_to_hbm [thread:$0]  (%p1715_p0), %s1656_s23, 128, %s1654_s9, %s956_s25  }
 0x1d8 PF: > { %s981_s17 = sand.u32 1, %s1370_s12   ;;  %p1716_p7 = scmp.ne.s32.totalorder %s1706_s19, 0 }
 0x1d9   : > { %p1717_p9 = scmp.ge.s32.totalorder %s1382_s15, 2  ;;  %s982_s24 = scalar_lea.sflag [#allocation4], %s981_s17 }
 0x1db   : > { %p1172_p12 = pnand %p1717_p9, %p1716_p7 }
 0x1dd   : > { %1365 = dma.done.wait (!%p1172_p12), %s982_s24, 128  }
 0x1de   : > { %1367 = vsyncadd (!%p1172_p12), %s982_s24, 4294967168  ;;  %p17_p2 = scmp.ge.s32.totalorder %s1528_s4, 4   ;;  %s1718_s12 = smov %s1374_s13 }
 0x1df   : > { %s1719_s13 = smov %s1378_s14  ;;  %s1720_s14 = smov %s1544_s7 }
 0x1e0   : > { %s1721_s15 = smov %s1528_s4  ;;  %19 = sbr.rel (!%p17_p2) target bundleno = 6 (0x6), region = 93 }
 0x1e7   :  { %987 = vsyncpa [#allocation3], 1 }
 0x1e8   :  { %989 = vsyncpa [#allocation3 + $0x1], 1 }
 0x1e9   :  { %990 = vsyncpa [#allocation6], 1 }
 0x1ea   :  { %991 = vsyncpa [#allocation4], 1 }
 0x1eb   :  { %993 = vsyncpa [#allocation4 + $0x1], 1 }

// kernel: a_call__.25
= control target key start
LH: loop header
LB: loop body
LE: loop exit
PB: predicated region body
PF: predicated region fallthrough
CT: control target
= control target key end

     0   :  { %8 = vsyncpa [#allocation3], 0  ;;  %s1772_s0 = inlined_call_operand.hbm [shape: f32[2,12,256], index: 0, kind: input, shape index: {}]   ;;  %s1773_s1 = inlined_call_operand.hbm [shape: f32[9,8,3], index: 1, kind: input, shape index: {}]   ;;  %s1774_s2 = inlined_call_operand.hbm [shape: f32[8,1], index: 2, kind: input, shape index: {}]   ;;  %s1775_s3 = inlined_call_operand.hbm [shape: f32[2,8,128], index: 3, kind: output, shape index: {}]  }
   0x1   :  { %10 = vsyncpa [#allocation3 + $0x1], 0 }
   0x2   :  { %11 = vsyncpa [#allocation6], 0 }
   0x3   :  { %12 = vsyncpa [#allocation4], 0 }
   0x4   :  { %14 = vsyncpa [#allocation4 + $0x1], 0  ;;  %s1466_s12 = smov 0   ;;  %s1468_s13 = smov 0  }
   0x5   :  { %s1470_s14 = smov 0   ;;  %s1472_s15 = smov 0  }
   0x6 LB: > { %s1487_s16 = sadd.s32 4294967295, %s1430_s15   ;;  %s1097_s17 = sadd.s32 4294967294, %s1430_s15   ;;  %s1430_s15 = sphi %s1472_s15, %s1795_s15   ;;  %s1426_s14 = sphi %s1470_s14, %s1794_s14   ;;  %s1422_s13 = sphi %s1468_s13, %s1793_s13   ;;  %s1418_s12 = sphi %s1466_s12, %s1792_s12  }
   0x7   : > { %p40_p0 = scmp.ne.s32.totalorder %s1422_s13, %s1418_s12  ;;  %p1776_p1 = scmp.eq.s32.totalorder %s1487_s16, 0 }
   0x8   : > { %p112_p3 = scmp.eq.s32.totalorder %s1097_s17, 1  ;;  %p1098_p5 = scmp.ge.s32.totalorder %s1430_s15, 1 }
   0x9   : > { %p1496_p4 = por %p1776_p1, %p40_p0  ;;  %p119_p7 = scmp.lt.s32.totalorder %s1430_s15, 3 }
   0xa   : > { %p1501_p6 = por %p112_p3, %p40_p0  ;;  %s1432_s21 = smov [#allocation5]  }
   0xb   : > { %s1779_s18 = scalar_select %p1496_p4, 1, 0 }
   0xc   : > { %s1780_s19 = scalar_select %p1501_p6, 1, 0 }
   0xd   : > { %p1506_p8 = pnand %p1098_p5, %p119_p7  ;;  %s131_s22 = sshll.u32 %s1432_s21, 4  ;;  %s1510_s22 = int_to_ptr.vmem [resolvable:$true] %s131_s22 }
   0xe   : > { %s1433_s24 = smov [#allocation7]   ;;  %s1274_s28 = scalar_lea.hbm %s1773_s1, 1152 }
   0xf   : > { %p1208_p9 = pneg %p1506_p8  ;;  %s145_s25 = sshll.u32 %s1433_s24, 4  ;;  %s1521_s25 = int_to_ptr.vmem [resolvable:$true] %s145_s25 }
  0x10   : > { %p1275_p12 = scmp.ne.s32.totalorder %s1773_s1, %s1274_s28  ;;  %p1281_p5 = scmp.lt.u32.totalorder %s1274_s28, %s1773_s1 }
  0x11   : > { %p1517_p11 = pnand %p1208_p9, %p1776_p1 }
  0x13   : > { %p1276_p13 = pneg %p1517_p11 }
  0x15   : > { %p1277_p0 = pnand %p1276_p13, %p1275_p12 }
  0x17   : > { %p1278_p3 = pneg %p1277_p0 }
  0x19   : > { %p1283_p7 = pnand %p1281_p5, %p1278_p3 }
  0x1b   : > { %1286 = shalt.err (!%p1283_p7)
}
  0x1c   : > { %s1287_s6 = scalar_lea.vmem %s1510_s22, 1152  ;;  %p1295_p2 = scmp.lt.s32.totalorder %s1510_s22, %s1510_s22 }
  0x1d   : > { %p1288_p9 = scmp.ne.s32.totalorder %s1510_s22, %s1287_s6  ;;  %p1296_p12 = scmp.lt.s32.totalorder %s1287_s6, %s1287_s6 }
  0x1f   : > { %p1290_p10 = pnand %p1288_p9, %p1276_p13  ;;  %p1297_p0 = por %p1296_p12, %p1295_p2 }
  0x21   : > { %p1291_p1 = pneg %p1290_p10 }
  0x23   : > { %p1298_p6 = pnand %p1297_p0, %p1291_p1 }
  0x25   : > { %1301 = shalt.err (!%p1298_p6)
}
  0x26   : > { %s1434_s7 = smov 128   ;;  %s1435_s8 = smov 8  }
  0x27   : > { %1211 = dma.hbm_to_vmem [thread:$0]  (!%p1517_p11), %s1773_s1, 1152, %s1510_s22, [#allocation6], %s1434_s7, %s1434_s7, %s1435_s8  }
  0x28   : > { %s1302_s21 = scalar_lea.hbm %s1774_s2, 128 }
  0x29   : > { %p1303_p2 = scmp.ne.s32.totalorder %s1774_s2, %s1302_s21  ;;  %p1309_p10 = scmp.lt.u32.totalorder %s1302_s21, %s1774_s2 }
  0x2b   : > { %p1305_p1 = pnand %p1303_p2, %p1276_p13 }
  0x2d   : > { %p1306_p6 = pneg %p1305_p1 }
  0x2f   : > { %p1311_p3 = pnand %p1309_p10, %p1306_p6 }
  0x31   : > { %1314 = shalt.err (!%p1311_p3)
}
  0x32   : > { %s1315_s22 = scalar_lea.vmem %s1521_s25, 128  ;;  %p1323_p12 = scmp.lt.s32.totalorder %s1521_s25, %s1521_s25 }
  0x33   : > { %p1316_p5 = scmp.ne.s32.totalorder %s1521_s25, %s1315_s22  ;;  %p1324_p0 = scmp.lt.s32.totalorder %s1315_s22, %s1315_s22 }
  0x35   : > { %p1318_p7 = pnand %p1316_p5, %p1276_p13  ;;  %p1325_p2 = por %p1324_p0, %p1323_p12 }
  0x37   : > { %p1319_p9 = pneg %p1318_p7 }
  0x39   : > { %p1326_p1 = pnand %p1325_p2, %p1319_p9 }
  0x3b   : > { %1329 = shalt.err (!%p1326_p1)
}
  0x3c   : > { %1214 = dma.hbm_to_vmem [thread:$0]  (!%p1517_p11), %s1774_s2, 128, %s1521_s25, [#allocation6]  }
  0x3d   : > { %s1576_s4 = sadd.s32 1, %s1430_s15   ;;  %s27_s23 = sadd.s32 1, %s1426_s14 }
  0x3e   : > { %s24_s5 = ssub.s32 %s1430_s15, %s1576_s4  ;;  %p34_p13 = scmp.ne.s32.totalorder %s1426_s14, %s1422_s13 }
  0x3f   : > { %p25_p6 = scmp.eq.s32.totalorder %s24_s5, 0  ;;  %p35_p10 = scmp.eq.s32.totalorder %s1430_s15, 0 }
  0x40   : > { %p1783_p3 = scmp.eq.s32.totalorder %s1487_s16, 1  ;;  %p1225_p7 = scmp.lt.s32.totalorder %s1430_s15, 2 }
  0x41   : > { %s1592_s7 = scalar_select %p25_p6, %s1426_s14, %s27_s23  }
  0x42   : > { %p1586_p5 = por %p1783_p3, %p34_p13  ;;  %p36_p9 = por %p35_p10, %p34_p13 }
  0x43   : > { %s156_s8 = sand.u32 1, %s1426_s14   ;;  %s1132_s25 = sshll.u32 %s1430_s15, 9 }
  0x44   : > { %s1784_s6 = scalar_select %p1586_p5, 1, 0 }
  0x45   : > { %s1102_s9 = sshll.u32 %s156_s8, 5  ;;  %s1599_s17 = scalar_lea.hbm %s1772_s0, %s1132_s25 }
  0x46   : > { %s160_s21 = scalar_lea.vmem [#allocation2], %s1102_s9  ;;  %p1603_p11 = pnand %p1225_p7, %p36_p9 }
  0x47   : > { %s167_s24 = sshll.u32 %s160_s21, 4  ;;  %s1607_s27 = scalar_lea.sflag [#allocation3], %s156_s8  ;;  %s1601_s24 = int_to_ptr.vmem [resolvable:$true] %s167_s24 }
  0x48   : > { %s1330_s28 = scalar_lea.hbm %s1599_s17, 512  ;;  %p1332_p0 = pneg %p1603_p11 }
  0x49   : > { %p1331_p12 = scmp.ne.s32.totalorder %s1599_s17, %s1330_s28  ;;  %s1335_s30 = scalar_lea.hbm %s1772_s0, 1024 }
  0x4a   : > { %p1336_p13 = scmp.lt.u32.totalorder %s1599_s17, %s1772_s0  ;;  %p1337_p6 = scmp.lt.u32.totalorder %s1335_s30, %s1330_s28 }
  0x4b   : > { %p1333_p2 = pnand %p1332_p0, %p1331_p12  ;;  %p1339_p3 = scmp.lt.u32.totalorder %s1330_s28, %s1599_s17 }
  0x4c   : > { %p1338_p10 = por %p1337_p6, %p1336_p13 }
  0x4d   : > { %p1334_p1 = pneg %p1333_p2 }
  0x4e   : > { %p1340_p7 = por %p1339_p3, %p1338_p10 }
  0x50   : > { %p1341_p9 = pnand %p1340_p7, %p1334_p1 }
  0x52   : > { %1344 = shalt.err (!%p1341_p9)
}
  0x53   : > { %s1345_s8 = scalar_lea.vmem %s1601_s24, 512  ;;  %s1436_s9 = smov [#allocation2]  }
  0x54   : > { %p1346_p12 = scmp.ne.s32.totalorder %s1601_s24, %s1345_s8  ;;  %s1350_s25 = sshll.u32 %s1436_s9, 4  ;;  %s1351_s25 = int_to_ptr.vmem [resolvable:$false] %s1350_s25 }
  0x55   : > { %s1352_s10 = scalar_lea.vmem %s1351_s25, 1024  ;;  %p1353_p4 = scmp.lt.s32.totalorder %s1601_s24, %s1351_s25 }
  0x56   : > { %p1348_p2 = pnand %p1346_p12, %p1332_p0  ;;  %p1354_p13 = scmp.lt.s32.totalorder %s1352_s10, %s1345_s8 }
  0x58   : > { %p1349_p5 = pneg %p1348_p2  ;;  %p1355_p6 = por %p1354_p13, %p1353_p4 }
  0x5a   : > { %p1356_p10 = pnand %p1355_p6, %p1349_p5 }
  0x5c   : > { %1359 = shalt.err (!%p1356_p10)
}
  0x5d   : > { %s1437_s11 = smov 256   ;;  %s1438_s21 = smov 16  }
  0x5e   : > { %1218 = dma.hbm_to_vmem [thread:$0]  (!%p1603_p11), %s1599_s17, 512, %s1601_s24, %s1607_s27, %s1437_s11, %s1437_s11, %s1438_s21  }
  0x5f   : > { %179 = sbr.rel (%p1506_p8) target bundleno = 474 (0x1da), region = 32  ;;  %s1638_s28 = sand.u32 (!%p1506_p8), 1, %s1422_s13  }
  0x60   : > { %s1106_s22 = sshll.u32 (!%p1506_p8), %s1638_s28, 5  ;;  %s182_s29 = scalar_lea.sflag (!%p1506_p8), [#allocation3], %s1638_s28 }
  0x61   : > { %s1642_s30 = scalar_lea.vmem (!%p1506_p8), [#allocation2], %s1106_s22  ;;  %p1786_p4 = scmp.ne.s32.totalorder (!%p1506_p8), %s1779_s18, 0 }
  0x66   : > { %1405 = dma.done.wait (%p1786_p4), %s182_s29, 512  }
  0x67   : > { %1407 = vsyncadd (%p1786_p4), %s182_s29, 4294966784  ;;  %p1787_p5 = scmp.eq.s32.totalorder %s1487_s16, 0 }
  0x69   : > { %1409 = dma.done.wait (%p1787_p5), [#allocation6], 1280   ;;  %p1788_p8 = pmov %p1787_p5 }
  0x6a   : > { %v1439_v0 = vmov 0.0   ;;  %vm1440_vm0 = vmmov 0   ;;  %v377_v1 = vld [vmem:[%s1642_s30 + $0x8] sm:$0x7]  ;;  %v376_v2 = vld [vmem:[%s1642_s30] sm:$0x7] }
  0x6b   : > { %1411 = vsyncadd (%p1788_p8), [#allocation6], 4294966016  ;;  %1151 = vmatprep.subr.mxu0 %v1439_v0  ;;  %1156 = vmatprep.subr.mxu1 %v1439_v0  ;;  %v631_v3 = vld [vmem:[%s1642_s30] sm:$0xc0]  ;;  %s1441_s18 = smov 119   ;;  %s1442_s20 = smov 127  }
  0x6c   : > { %1153 = vmatprep.mubr.msk.f32.mxu0 %vm1440_vm0, %v1439_v0  ;;  %1158 = vmatprep.mubr.msk.f32.mxu1 %vm1440_vm0, %v1439_v0  ;;  %vm470_vm1 = vcmask 1041408   ;;  %v633_v4 = vld [vmem:[%s1642_s30 + $0x10] sm:$0x1]  ;;  %v641_v5 = vrot.slane %v631_v3, 6  ;;  %v632_v6 = vld [vmem:[%s1642_s30 + $0x8] sm:$0xc0] }
  0x6d   : > { %732 = vrot.lane.b32.xlu1 %v377_v1, %s1441_s18  ;;  %382 = vrot.lane.b32.xlu0 %v376_v2, %s1442_s20  ;;  %v642_v7 = vrot.slane %v633_v4, 6  ;;  %v634_v8 = vld [vmem:[%s1642_s30 + $0x18] sm:$0x1]  ;;  %v644_v9 = vrot.slane %v632_v6, 6  ;;  %v218_v11 = vld [vmem:[%s1642_s30] sm:$0x38] }
  0x6e   : > { %v645_v10 = vrot.slane %v634_v8, 6  ;;  %vm227_vm2 = vcmask 1042432   ;;  %v222_v13 = vrot.slane %v218_v11, 3  ;;  %v220_v14 = vld [vmem:[#allocation5 + $0x8] sm:$0xff]  ;;  %vm223_vm3 = vcmask 23552   ;;  %v217_v16 = vld [vmem:[#allocation5] sm:$0xff] }
  0x6f   : > { %v643_v12 = vsel %vm470_vm1, %v641_v5, %v642_v7  ;;  %v216_v15 = vld [vmem:[%s1642_s30] sm:$0x7]  ;;  %v464_v17 = vld [vmem:[%s1642_s30] sm:$0xc0]  ;;  %v465_v18 = vld [vmem:[%s1642_s30 + $0x10] sm:$0x1] }
  0x70   : > { %v646_v19 = vsel %vm470_vm1, %v644_v9, %v645_v10  ;;  %v813_v20 = vld [vmem:[%s1642_s30 + $0x8] sm:$0x38]  ;;  %v812_v21 = vld [vmem:[%s1642_s30] sm:$0x38]  ;;  %1152 = vmatpush3.msk.msra.mxu0 %vm227_vm2, %v222_v13  ;;  %1157 = vmatpush3.msk.msra.mxu1 %vm227_vm2, %v216_v15  ;;  %v471_v22 = vrot.slane %v464_v17, 6  ;;  %v472_v23 = vrot.slane %v465_v18, 6 }
  0x71   : > { %647 = vrot.lane.b32.xlu1 %v643_v12, %s1442_s20  ;;  %384 = vrot.lane.b32.xlu0 %v377_v1, %s1442_s20  ;;  %v819_v25 = vrot.slane %v813_v20, 3  ;;  %v818_v26 = vrot.slane %v812_v21, 3  ;;  %v467_v27 = vld [vmem:[#allocation5 + $0x18] sm:$0xff]  ;;  %v1443_v28 = vmov 0   ;;  %s1444_s17 = smov 118   ;;  %v985_v29 = vld [vmem:[#allocation7] sm:$0xff] }
  0x72   : > { %1154 = vmatmul.mubr.msk.f32.vlgmr.msra.gmra.mrb[0].mxu0 %vm223_vm3, %v220_v14  ;;  %1161 = vmatprep.subr.mxu0 %v1439_v0  ;;  %v473_v24 = vsel %vm470_vm1, %v471_v22, %v472_v23  ;;  %v550_v32 = vld [vmem:[%s1642_s30 + $0x10] sm:$0xe]  ;;  %vm386_vm4 = vcmask 1039360   ;;  %vm734_vm5 = vcmask 973824   ;;  %v552_v40 = vld [vmem:[#allocation5 + $0x20] sm:$0xff]  ;;  %v636_v43 = vld [vmem:[#allocation5 + $0x28] sm:$0xff] }
  0x73   : > { %1159 = vmatmul.mubr.msk.f32.vlgmr.msra.gmra.mrb[0].mxu1 %vm223_vm3, %v217_v16  ;;  %1163 = vmatprep.mubr.msk.f32.mxu0 %vm1440_vm0, %v1439_v0  ;;  %v379_v35 = vld [vmem:[#allocation5 + $0x10] sm:$0xff]  ;;  %v554_v36 = vrot.slane %v550_v32, 1  ;;  %v815_v48 = vld [vmem:[#allocation5 + $0x38] sm:$0xff]  ;;  %vm907_vm6 = vcmask 965632   ;;  %v902_v51 = vld [vmem:[#allocation5 + $0x40] sm:$0xff]  ;;  %s1109_s24 = sshll.u32 %s1638_s28, 3 }
  0x74   : > { %1166 = vmatprep.subr.mxu1 %v1439_v0  ;;  %1168 = vmatprep.mubr.msk.f32.mxu1 %vm1440_vm0, %v1439_v0  ;;  %v729_v46 = vld [vmem:[#allocation5 + $0x30] sm:$0xff]  ;;  %s1129_s26 = sshll.u32 %s1487_s16, 7  ;;  %s215_s27 = scalar_lea.vmem [#allocation8], %s1109_s24 }
  0x75   : > { %649 = vrot.lane.b32.xlu1 %v646_v19, %s1442_s20  ;;  %730 = vrot.lane.b32.xlu0 %v376_v2, %s1441_s18  ;;  %s1008_s23 = sshll.u32 %s215_s27, 4  ;;  %s1728_s9 = scalar_lea.hbm %s1775_s3, %s1129_s26  ;;  %s1730_s23 = int_to_ptr.vmem [resolvable:$true] %s1008_s23 }
  0x76   : > { %1167 = vmatpush3.msk.msra.mxu1 %vm227_vm2, %v473_v24  ;;  %1273 = vset.pattern.permute.xlu0 %v1443_v28  ;;  %s995_s25 = scalar_lea.sflag [#allocation4], %s1638_s28  ;;  %s1360_s10 = scalar_lea.vmem %s1730_s23, 128 }
  0x77   : > { %1176 = vmatprep.subr.mxu1 %v1439_v0  ;;  %1169 = vmatmul.mubr.msk.f32.vlgmr.msra.gmra.mrb[2].mxu1 %vm223_vm3, %v467_v27  ;;  %p1361_p11 = scmp.ne.s32.totalorder %s1730_s23, %s1360_s10  ;;  %p1789_p0 = scmp.ne.s32.totalorder %s1784_s6, 0 }
  0x78   : > { %1178 = vmatprep.mubr.msk.f32.mxu1 %vm1440_vm0, %v1439_v0  ;;  %s1445_s16 = smov [#allocation8]  }
  0x79   : > { %822 = vrot.lane.b32.xlu1 %v819_v25, %s1441_s18  ;;  %820 = vrot.lane.b32.xlu0 %v818_v26, %s1441_s18  ;;  %p1362_p1 = pnand %p1361_p11, %p1789_p0  ;;  %s1364_s11 = sshll.u32 %s1445_s16, 4  ;;  %s1365_s11 = int_to_ptr.vmem [resolvable:$false] %s1364_s11 }
  0x7a   : > { %s1366_s21 = scalar_lea.vmem %s1365_s11, 256  ;;  %p1367_p7 = scmp.lt.s32.totalorder %s1730_s23, %s1365_s11 }
  0x7b   : > { %p1363_p3 = pneg %p1362_p1  ;;  %p1368_p9 = scmp.lt.s32.totalorder %s1366_s21, %s1360_s10 }
  0x7d   : > { %905 = vrot.lane.b32.xlu1 %v377_v1, %s1444_s17  ;;  %903 = vrot.lane.b32.xlu0 %v376_v2, %s1444_s17  ;;  %p1369_p12 = por %p1368_p9, %p1367_p7 }
  0x7f   : > { %p1370_p2 = pnand %p1369_p12, %p1363_p3 }
  0x81   : > { %988 = vperm.xlu0 %1273, %v985_v29  }
  0xdf   : > { %v733_v30 = vpop.permute.xlu1 %732  ;;  %v383_v31 = vpop.permute.xlu0 %382 }
  0xe3   : > { %v648_v33 = vpop.permute.xlu1 %647  ;;  %v385_v34 = vpop.permute.xlu0 %384 }
  0xe4   : > { %v387_v37 = vsel %vm386_vm4, %v383_v31, %v385_v34 }
  0xe5   : > { %1162 = vmatpush3.msk.msra.mxu0 %vm227_vm2, %v387_v37 }
  0xe6   : > { %1164 = vmatmul.mubr.msk.f32.vlgmr.msra.gmra.mrb[2].mxu0 %vm223_vm3, %v379_v35  ;;  %1171 = vmatprep.subr.mxu0 %v1439_v0 }
  0xe7   : > { %v650_v38 = vpop.permute.xlu1 %649  ;;  %v731_v39 = vpop.permute.xlu0 %730  ;;  %1172 = vmatpush3.msk.msra.mxu0 %vm227_vm2, %v554_v36  ;;  %1173 = vmatprep.mubr.msk.f32.mxu0 %vm1440_vm0, %v1439_v0 }
  0xe8   : > { %v651_v41 = vsel %vm386_vm4, %v648_v33, %v650_v38  ;;  %v735_v42 = vsel %vm734_vm5, %v731_v39, %v733_v30  ;;  %1181 = vmatprep.subr.mxu0 %v1439_v0 }
  0xe9   : > { %1177 = vmatpush3.msk.msra.mxu1 %vm227_vm2, %v651_v41 }
  0xea   : > { %1174 = vmatmul.mubr.msk.f32.vlgmr.msra.gmra.mrb[4].mxu0 %vm223_vm3, %v552_v40  ;;  %1186 = vmatprep.subr.mxu1 %v1439_v0 }
  0xeb   : > { %1182 = vmatpush3.msk.msra.mxu0 %vm227_vm2, %v735_v42  ;;  %v823_v44 = vpop.permute.xlu1 %822  ;;  %v821_v45 = vpop.permute.xlu0 %820  ;;  %1179 = vmatmul.mubr.msk.f32.vlgmr.msra.gmra.mrb[4].mxu1 %vm223_vm3, %v636_v43 }
  0xec   : > { %v824_v47 = vsel %vm734_vm5, %v821_v45, %v823_v44  ;;  %1183 = vmatprep.mubr.msk.f32.mxu0 %vm1440_vm0, %v1439_v0  ;;  %1188 = vmatprep.mubr.msk.f32.mxu1 %vm1440_vm0, %v1439_v0 }
  0xed   : > { %1187 = vmatpush3.msk.msra.mxu1 %vm227_vm2, %v824_v47  ;;  %1191 = vmatprep.subr.mxu0 %v1439_v0 }
  0xee   : > { %1184 = vmatmul.mubr.msk.f32.vlgmr.msra.gmra.mrb[6].mxu0 %vm223_vm3, %v729_v46 }
  0xef   : > { %v906_v49 = vpop.permute.xlu1 %905  ;;  %v904_v50 = vpop.permute.xlu0 %903  ;;  %1189 = vmatmul.mubr.msk.f32.vlgmr.msra.gmra.mrb[6].mxu1 %vm223_vm3, %v815_v48  ;;  %1193 = vmatprep.mubr.msk.f32.mxu0 %vm1440_vm0, %v1439_v0 }
  0xf0   : > { %v908_v52 = vsel %vm907_vm6, %v904_v50, %v906_v49 }
  0xf1   : > { %1192 = vmatpush3.msk.msra.mxu0 %vm227_vm2, %v908_v52 }
  0xf2   : > { %1194 = vmatmul.mubr.msk.f32.vlgmr.msra.gmra.mrb[8].mxu0 %vm223_vm3, %v902_v51 }
 0x100   : > { %v989_v13 = vpop.permute.xlu0 %988 }
 0x145   : > { %v296_v53 = vpop.f32.mrb[0].mxu0 }
 0x146   : > { %v1155_v54 = vpop.f32.mrb[1].mxu0  ;;  %v372_v55 = vpop.f32.mrb[0].mxu1 }
 0x147   : > { %v373_v56 = vadd.f32 %v372_v55, %v296_v53  ;;  %v1160_v57 = vpop.f32.mrb[1].mxu1 }
 0x14a   : > { %v545_v58 = vpop.f32.mrb[2].mxu1 }
 0x14b   : > { %v1170_v59 = vpop.f32.mrb[3].mxu1 }
 0x1b9   : > { %v459_v60 = vpop.f32.mrb[2].mxu0 }
 0x1ba   : > { %v463_v61 = vadd.f32 %v459_v60, %v373_v56  ;;  %v1165_v62 = vpop.f32.mrb[3].mxu0 }
 0x1bc   : > { %v549_v63 = vadd.f32 %v545_v58, %v463_v61 }
 0x1bd   : > { %v626_v1 = vpop.f32.mrb[4].mxu0 }
 0x1be   : > { %v630_v0 = vadd.f32 %v626_v1, %v549_v63  ;;  %v1175_v2 = vpop.f32.mrb[5].mxu0  ;;  %v723_v3 = vpop.f32.mrb[4].mxu1 }
 0x1bf   : > { %v1180_v4 = vpop.f32.mrb[5].mxu1 }
 0x1c0   : > { %v727_v5 = vadd.f32 %v723_v3, %v630_v0 }
 0x1c1   : > { %v807_v6 = vpop.f32.mrb[6].mxu0 }
 0x1c2   : > { %v811_v7 = vadd.f32 %v807_v6, %v727_v5  ;;  %v1185_v8 = vpop.f32.mrb[7].mxu0  ;;  %v896_v9 = vpop.f32.mrb[6].mxu1 }
 0x1c3   : > { %v1190_v10 = vpop.f32.mrb[7].mxu1 }
 0x1c4   : > { %v900_v11 = vadd.f32 %v896_v9, %v811_v7 }
 0x1c5   : > { %v980_v12 = vpop.f32.mrb[8].mxu0 }
 0x1c6   : > { %v984_v14 = vadd.f32 %v980_v12, %v900_v11  ;;  %v1195_v15 = vpop.f32.mrb[9].mxu0 }
 0x1c8   : > { %v991_v16 = vadd.f32 %v989_v13, %v984_v14 }
 0x1ca   : > { %v992_v17 = vmax.f32 %v991_v16, 0.0 }
 0x1cc   : > { %993 = vst [vmem:[%s215_s27] sm:$0xff] %v992_v17 }
 0x1cd   : > { %1373 = shalt.err (!%p1370_p2)
}
 0x1ce   : > { %s1374_s28 = scalar_lea.hbm %s1728_s9, 128  ;;  %s1378_s30 = scalar_lea.hbm %s1775_s3, 256 }
 0x1cf   : > { %p1375_p13 = scmp.ne.s32.totalorder %s1728_s9, %s1374_s28  ;;  %p1379_p4 = scmp.lt.u32.totalorder %s1728_s9, %s1775_s3 }
 0x1d0   : > { %p1380_p5 = scmp.lt.u32.totalorder %s1378_s30, %s1374_s28  ;;  %p1382_p11 = scmp.lt.u32.totalorder %s1374_s28, %s1728_s9 }
 0x1d1   : > { %p1376_p6 = pnand %p1375_p13, %p1789_p0 }
 0x1d2   : > { %p1381_p8 = por %p1380_p5, %p1379_p4 }
 0x1d3   : > { %p1377_p10 = pneg %p1376_p6 }
 0x1d4   : > { %p1383_p1 = por %p1382_p11, %p1381_p8 }
 0x1d6   : > { %p1384_p3 = pnand %p1383_p1, %p1377_p10 }
 0x1d8   : > { %1387 = shalt.err (!%p1384_p3)
}
 0x1d9   : > { %1206 = dma.vmem_to_hbm [thread:$0]  (%p1789_p0), %s1730_s23, 128, %s1728_s9, %s995_s25  }
 0x1da PF: > { %s1020_s17 = sand.u32 1, %s1418_s12   ;;  %p1790_p7 = scmp.ne.s32.totalorder %s1780_s19, 0 }
 0x1db   : > { %p1791_p9 = scmp.ge.s32.totalorder %s1430_s15, 2  ;;  %s1021_s24 = scalar_lea.sflag [#allocation4], %s1020_s17 }
 0x1dd   : > { %p1220_p12 = pnand %p1791_p9, %p1790_p7 }
 0x1df   : > { %1413 = dma.done.wait (!%p1220_p12), %s1021_s24, 128  }
 0x1e0   : > { %1415 = vsyncadd (!%p1220_p12), %s1021_s24, 4294967168  ;;  %p17_p2 = scmp.ge.s32.totalorder %s1576_s4, 4   ;;  %s1792_s12 = smov %s1422_s13 }
 0x1e1   : > { %s1793_s13 = smov %s1426_s14  ;;  %s1794_s14 = smov %s1592_s7 }
 0x1e2   : > { %s1795_s15 = smov %s1576_s4  ;;  %19 = sbr.rel (!%p17_p2) target bundleno = 6 (0x6), region = 93 }
 0x1e9   :  { %1026 = vsyncpa [#allocation3], 1 }
 0x1ea   :  { %1028 = vsyncpa [#allocation3 + $0x1], 1 }
 0x1eb   :  { %1029 = vsyncpa [#allocation6], 1 }
 0x1ec   :  { %1030 = vsyncpa [#allocation4], 1 }
 0x1ed   :  { %1032 = vsyncpa [#allocation4 + $0x1], 1 }

// kernel: a_call__.27
= control target key start
LH: loop header
LB: loop body
LE: loop exit
PB: predicated region body
PF: predicated region fallthrough
CT: control target
= control target key end

     0   :  { %9 = vsyncpa [#allocation3], 0  ;;  %s336_s0 = inlined_call_operand.hbm [shape: f32[16,128], index: 0, kind: input, shape index: {}]   ;;  %s337_s1 = inlined_call_operand.hbm [shape: f32[16,1], index: 1, kind: input, shape index: {}]   ;;  %s338_s2 = inlined_call_operand.hbm [shape: f32[16,128], index: 2, kind: output, shape index: {0}]   ;;  %s339_s3 = inlined_call_operand.hbm [shape: f32[16,128], index: 3, kind: output, shape index: {1}]  }
   0x1   :  { %10 = vsyncpa [#allocation6], 0 }
   0x2   :  { %11 = vsyncpa [#allocation4], 0 }
   0x3   :  { %12 = vsyncpa [#allocation9], 0  ;;  %s249_s12 = smov [#allocation2]   ;;  %s153_s16 = scalar_lea.hbm %s336_s0, 256 }
   0x4   :  { %s18_s13 = sshll.u32 %s249_s12, 4  ;;  %p154_p0 = scmp.ne.s32.totalorder %s336_s0, %s153_s16  ;;  %s19_s13 = int_to_ptr.vmem [resolvable:$true] %s18_s13 }
   0x5   :  { %p157_p1 = scmp.lt.u32.totalorder %s153_s16, %s336_s0 }
   0x7   :  { %p159_p2 = pnand %p157_p1, %p154_p0 }
   0x9   :  { %162 = shalt.err (!%p159_p2)
}
   0xa   :  { %s163_s21 = scalar_lea.vmem %s19_s13, 256  ;;  %p168_p4 = scmp.lt.s32.totalorder %s19_s13, %s19_s13 }
   0xb   :  { %p164_p3 = scmp.ne.s32.totalorder %s19_s13, %s163_s21  ;;  %p169_p5 = scmp.lt.s32.totalorder %s163_s21, %s163_s21 }
   0xd   :  { %p170_p6 = por %p169_p5, %p168_p4 }
   0xf   :  { %p171_p7 = pnand %p170_p6, %p164_p3 }
  0x11   :  { %174 = shalt.err (!%p171_p7)
}
  0x12   :  { %s250_s22 = smov 128   ;;  %s251_s23 = smov 8  }
  0x13   :  { %24 = dma.hbm_to_vmem [thread:$0]  %s336_s0, 256, %s19_s13, [#allocation3], %s250_s22, %s250_s22, %s251_s23  }
  0x14   :  { %s252_s26 = smov [#allocation5]   ;;  %s175_s30 = scalar_lea.hbm %s337_s1, 256 }
  0x15   :  { %s30_s27 = sshll.u32 %s252_s26, 4  ;;  %p176_p8 = scmp.ne.s32.totalorder %s337_s1, %s175_s30  ;;  %s31_s27 = int_to_ptr.vmem [resolvable:$true] %s30_s27 }
  0x16   :  { %p179_p9 = scmp.lt.u32.totalorder %s175_s30, %s337_s1 }
  0x18   :  { %p181_p10 = pnand %p179_p9, %p176_p8 }
  0x1a   :  { %184 = shalt.err (!%p181_p10)
}
  0x1b   :  { %s185_s8 = scalar_lea.vmem %s31_s27, 256  ;;  %p190_p12 = scmp.lt.s32.totalorder %s31_s27, %s31_s27 }
  0x1c   :  { %p186_p11 = scmp.ne.s32.totalorder %s31_s27, %s185_s8  ;;  %p191_p13 = scmp.lt.s32.totalorder %s185_s8, %s185_s8 }
  0x1e   :  { %p192_p0 = por %p191_p13, %p190_p12 }
  0x20   :  { %p193_p1 = pnand %p192_p0, %p186_p11 }
  0x22   :  { %196 = shalt.err (!%p193_p1)
}
  0x23   :  { %36 = dma.hbm_to_vmem [thread:$0]  %s337_s1, 256, %s31_s27, [#allocation6], %s250_s22, %s250_s22, %s251_s23  }
  0x24   :  { %241 = dma.done.wait [#allocation3], 256  }
  0x25   :  { %242 = vsyncadd [#allocation3], 4294967040 }
  0x26   :  { %243 = dma.done.wait [#allocation6], 256  }
  0x27   :  { %244 = vsyncadd [#allocation6], 4294967040  ;;  %v253_v0 = vmov 0   ;;  %v45_v1 = vld [vmem:[#allocation5] sm:$0xff]  ;;  %v46_v2 = vld [vmem:[#allocation5 + $0x8] sm:$0xff]  ;;  %s254_s1 = smov [#allocation7]  }
  0x28   :  { %140 = vset.pattern.permute.xlu0 %v253_v0  ;;  %v43_v3 = vld [vmem:[#allocation2] sm:$0xff]  ;;  %v44_v6 = vld [vmem:[#allocation2 + $0x8] sm:$0xff]  ;;  %s102_s10 = sshll.u32 %s254_s1, 4  ;;  %s103_s10 = int_to_ptr.vmem [resolvable:$true] %s102_s10 }
  0x29   :  { %49 = vperm.xlu0 %140, %v45_v1   ;;  %s197_s11 = scalar_lea.vmem %s103_s10, 256  ;;  %p202_p3 = scmp.lt.s32.totalorder %s103_s10, %s103_s10 }
  0x2a   :  { %p198_p2 = scmp.ne.s32.totalorder %s103_s10, %s197_s11  ;;  %p203_p4 = scmp.lt.s32.totalorder %s197_s11, %s197_s11 }
  0x2c   :  { %p204_p5 = por %p203_p4, %p202_p3 }
  0x2d   :  { %54 = vperm.xlu0 %140, %v46_v2  }
  0x2e   :  { %p205_p6 = pnand %p204_p5, %p198_p2 }
  0xa8   :  { %v50_v4 = vpop.permute.xlu0 %49 }
  0xa9   :  { %v57_v5 = vsub.f32 %v43_v3, %v50_v4 }
  0xab   :  { %v59_v7 = vadd.f32 0.5, %v57_v5 }
  0xac   :  { %v55_v8 = vpop.permute.xlu0 %54 }
  0xad   :  { %v61_v9 = vfloor.f32 %v59_v7  ;;  %v58_v10 = vsub.f32 %v44_v6, %v55_v8 }
  0xaf   :  { %v63_v11 = vadd.f32 %v61_v9, %v50_v4  ;;  %v60_v12 = vadd.f32 0.5, %v58_v10 }
  0xb1   :  { %v67_v13 = vadd.f32 0.5, %v63_v11  ;;  %v131_v14 = vadd.f32 -0.5, %v63_v11  ;;  %65 = vst [vmem:[#allocation7] sm:$0xff] %v63_v11  ;;  %v62_v15 = vfloor.f32 %v60_v12 }
  0xb3   :  { %v69_v16 = vsub.f32 %v67_v13, %v50_v4  ;;  %v77_v17 = vsub.f32 %v131_v14, %v50_v4  ;;  %v64_v18 = vadd.f32 %v62_v15, %v55_v8 }
  0xb5   :  { %v71_v19 = vmul.f32 0.5, %v69_v16  ;;  %v79_v20 = vmul.f32 0.5, %v77_v17  ;;  %v68_v21 = vadd.f32 0.5, %v64_v18  ;;  %v132_v22 = vadd.f32 -0.5, %v64_v18  ;;  %66 = vst [vmem:[#allocation7 + $0x8] sm:$0xff] %v64_v18 }
  0xb6   :  { %208 = shalt.err (!%p205_p6)
}
  0xb7   :  { %s209_s14 = scalar_lea.hbm %s338_s2, 256 }
  0xb8   :  { %p210_p7 = scmp.ne.s32.totalorder %s338_s2, %s209_s14  ;;  %p213_p8 = scmp.lt.u32.totalorder %s209_s14, %s338_s2 }
  0xba   :  { %p215_p9 = pnand %p213_p8, %p210_p7 }
  0xbc   :  { %218 = shalt.err (!%p215_p9)
}
  0xbd   :  { %108 = dma.vmem_to_hbm [thread:$0]  %s103_s10, 256, %s338_s2, [#allocation4], %s250_s22, %s250_s22, %s251_s23   ;;  %141 = vtanh.f32 %v71_v19  ;;  %v70_v23 = vsub.f32 %v68_v21, %v55_v8  ;;  %v78_v24 = vsub.f32 %v132_v22, %v55_v8 }
  0xbe   :  { %143 = vtanh.f32 %v79_v20  ;;  %s255_s2 = smov [#allocation8]  }
  0xbf   :  { %v72_v25 = vmul.f32 0.5, %v70_v23  ;;  %v80_v26 = vmul.f32 0.5, %v78_v24  ;;  %s114_s21 = sshll.u32 %s255_s2, 4  ;;  %s115_s21 = int_to_ptr.vmem [resolvable:$true] %s114_s21 }
  0xc0   :  { %s219_s24 = scalar_lea.vmem %s115_s21, 256  ;;  %p224_p11 = scmp.lt.s32.totalorder %s115_s21, %s115_s21 }
  0xc1   :  { %145 = vtanh.f32 %v72_v25  ;;  %p220_p10 = scmp.ne.s32.totalorder %s115_s21, %s219_s24  ;;  %p225_p12 = scmp.lt.s32.totalorder %s219_s24, %s219_s24 }
  0xc2   :  { %147 = vtanh.f32 %v80_v26 }
  0xc3   :  { %p226_p13 = por %p225_p12, %p224_p11 }
  0xc5   :  { %p227_p0 = pnand %p226_p13, %p220_p10 }
  0xc7   :  { %v142_v27 = vpop.eup %141 }
  0xc8   :  { %v144_v28 = vpop.eup %143 }
  0xc9   :  { %v83_v29 = vsub.f32 %v142_v27, %v144_v28 }
  0xcb   :  { %v146_v30 = vpop.eup %145  ;;  %v85_v31 = vmul.f32 0.5, %v83_v29 }
  0xcc   :  { %v148_v32 = vpop.eup %147 }
  0xcd   :  { %v84_v33 = vsub.f32 %v146_v30, %v148_v32  ;;  %v87_v34 = vmax.f32 %v85_v31, 1e-09 }
  0xcf   :  { %v86_v35 = vmul.f32 0.5, %v84_v33  ;;  %149 = vlog2.f32 %v87_v34 }
  0xd1   :  { %v88_v36 = vmax.f32 %v86_v35, 1e-09 }
  0xd3   :  { %151 = vlog2.f32 %v88_v36 }
  0xd9   :  { %v150_v37 = vpop.eup %149 }
  0xda   :  { %v90_v38 = vmul.f32 0.6931472, %v150_v37 }
  0xdc   :  { %v93_v39 = vmul.f32 -1.442695, %v90_v38 }
  0xdd   :  { %v152_v40 = vpop.eup %151 }
  0xde   :  { %v92_v41 = vmul.f32 0.6931472, %v152_v40  ;;  %95 = vst [vmem:[#allocation8] sm:$0xff] %v93_v39 }
  0xe0   :  { %v94_v42 = vmul.f32 -1.442695, %v92_v41 }
  0xe2   :  { %96 = vst [vmem:[#allocation8 + $0x8] sm:$0xff] %v94_v42 }
  0xe3   :  { %230 = shalt.err (!%p227_p0)
}
  0xe4   :  { %s231_s27 = scalar_lea.hbm %s339_s3, 256 }
  0xe5   :  { %p232_p1 = scmp.ne.s32.totalorder %s339_s3, %s231_s27  ;;  %p235_p2 = scmp.lt.u32.totalorder %s231_s27, %s339_s3 }
  0xe7   :  { %p237_p3 = pnand %p235_p2, %p232_p1 }
  0xe9   :  { %240 = shalt.err (!%p237_p3)
}
  0xea   :  { %120 = dma.vmem_to_hbm [thread:$0]  %s115_s21, 256, %s339_s3, [#allocation9], %s250_s22, %s250_s22, %s251_s23  }
  0xeb   :  { %245 = dma.done.wait [#allocation4], 256  }
  0xec   :  { %246 = vsyncadd [#allocation4], 4294967040 }
  0xed   :  { %247 = dma.done.wait [#allocation9], 256  }
  0xee   :  { %248 = vsyncadd [#allocation9], 4294967040 }
  0xef   :  { %127 = vsyncpa [#allocation3], 1 }
  0xf0   :  { %128 = vsyncpa [#allocation6], 1 }
  0xf1   :  { %129 = vsyncpa [#allocation4], 1 }
  0xf2   :  { %130 = vsyncpa [#allocation9], 1 }

// kernel: a_call__.28
= control target key start
LH: loop header
LB: loop body
LE: loop exit
PB: predicated region body
PF: predicated region fallthrough
CT: control target
= control target key end

     0   :  { %8 = vsyncpa [#allocation3], 0  ;;  %s1701_s0 = inlined_call_operand.hbm [shape: f32[2,8,256], index: 0, kind: input, shape index: {}]   ;;  %s1702_s1 = inlined_call_operand.hbm [shape: f32[9,8,8], index: 1, kind: input, shape index: {}]   ;;  %s1703_s2 = inlined_call_operand.hbm [shape: f32[8,1], index: 2, kind: input, shape index: {}]   ;;  %s1704_s3 = inlined_call_operand.hbm [shape: f32[2,8,128], index: 3, kind: output, shape index: {}]  }
   0x1   :  { %10 = vsyncpa [#allocation3 + $0x1], 0 }
   0x2   :  { %11 = vsyncpa [#allocation6], 0 }
   0x3   :  { %12 = vsyncpa [#allocation4], 0 }
   0x4   :  { %14 = vsyncpa [#allocation4 + $0x1], 0  ;;  %s1435_s12 = smov 0   ;;  %s1437_s13 = smov 0  }
   0x5   :  { %s1439_s14 = smov 0   ;;  %s1441_s15 = smov 0  }
   0x6 LB: > { %s1456_s16 = sadd.s32 4294967295, %s1396_s15   ;;  %s1069_s17 = sadd.s32 4294967294, %s1396_s15   ;;  %s1396_s15 = sphi %s1441_s15, %s1724_s15   ;;  %s1392_s14 = sphi %s1439_s14, %s1723_s14   ;;  %s1388_s13 = sphi %s1437_s13, %s1722_s13   ;;  %s1384_s12 = sphi %s1435_s12, %s1721_s12  }
   0x7   : > { %p40_p0 = scmp.ne.s32.totalorder %s1388_s13, %s1384_s12  ;;  %p1705_p1 = scmp.eq.s32.totalorder %s1456_s16, 0 }
   0x8   : > { %p112_p3 = scmp.eq.s32.totalorder %s1069_s17, 1  ;;  %p1070_p5 = scmp.ge.s32.totalorder %s1396_s15, 1 }
   0x9   : > { %p1465_p4 = por %p1705_p1, %p40_p0  ;;  %p119_p7 = scmp.lt.s32.totalorder %s1396_s15, 3 }
   0xa   : > { %p1470_p6 = por %p112_p3, %p40_p0  ;;  %s1398_s21 = smov [#allocation5]  }
   0xb   : > { %s1708_s18 = scalar_select %p1465_p4, 1, 0 }
   0xc   : > { %s1709_s19 = scalar_select %p1470_p6, 1, 0 }
   0xd   : > { %p1475_p8 = pnand %p1070_p5, %p119_p7  ;;  %s131_s22 = sshll.u32 %s1398_s21, 4  ;;  %s1479_s22 = int_to_ptr.vmem [resolvable:$true] %s131_s22 }
   0xe   : > { %s1399_s24 = smov [#allocation7]   ;;  %s1240_s28 = scalar_lea.hbm %s1702_s1, 1152 }
   0xf   : > { %p1171_p9 = pneg %p1475_p8  ;;  %s145_s25 = sshll.u32 %s1399_s24, 4  ;;  %s1490_s25 = int_to_ptr.vmem [resolvable:$true] %s145_s25 }
  0x10   : > { %p1241_p12 = scmp.ne.s32.totalorder %s1702_s1, %s1240_s28  ;;  %p1247_p5 = scmp.lt.u32.totalorder %s1240_s28, %s1702_s1 }
  0x11   : > { %p1486_p11 = pnand %p1171_p9, %p1705_p1 }
  0x13   : > { %p1242_p13 = pneg %p1486_p11 }
  0x15   : > { %p1243_p0 = pnand %p1242_p13, %p1241_p12 }
  0x17   : > { %p1244_p3 = pneg %p1243_p0 }
  0x19   : > { %p1249_p7 = pnand %p1247_p5, %p1244_p3 }
  0x1b   : > { %1252 = shalt.err (!%p1249_p7)
}
  0x1c   : > { %s1253_s6 = scalar_lea.vmem %s1479_s22, 1152  ;;  %p1261_p2 = scmp.lt.s32.totalorder %s1479_s22, %s1479_s22 }
  0x1d   : > { %p1254_p9 = scmp.ne.s32.totalorder %s1479_s22, %s1253_s6  ;;  %p1262_p12 = scmp.lt.s32.totalorder %s1253_s6, %s1253_s6 }
  0x1f   : > { %p1256_p10 = pnand %p1254_p9, %p1242_p13  ;;  %p1263_p0 = por %p1262_p12, %p1261_p2 }
  0x21   : > { %p1257_p1 = pneg %p1256_p10 }
  0x23   : > { %p1264_p6 = pnand %p1263_p0, %p1257_p1 }
  0x25   : > { %1267 = shalt.err (!%p1264_p6)
}
  0x26   : > { %s1400_s7 = smov 128   ;;  %s1401_s8 = smov 8  }
  0x27   : > { %1174 = dma.hbm_to_vmem [thread:$0]  (!%p1486_p11), %s1702_s1, 1152, %s1479_s22, [#allocation6], %s1400_s7, %s1400_s7, %s1401_s8  }
  0x28   : > { %s1268_s21 = scalar_lea.hbm %s1703_s2, 128 }
  0x29   : > { %p1269_p2 = scmp.ne.s32.totalorder %s1703_s2, %s1268_s21  ;;  %p1275_p10 = scmp.lt.u32.totalorder %s1268_s21, %s1703_s2 }
  0x2b   : > { %p1271_p1 = pnand %p1269_p2, %p1242_p13 }
  0x2d   : > { %p1272_p6 = pneg %p1271_p1 }
  0x2f   : > { %p1277_p3 = pnand %p1275_p10, %p1272_p6 }
  0x31   : > { %1280 = shalt.err (!%p1277_p3)
}
  0x32   : > { %s1281_s22 = scalar_lea.vmem %s1490_s25, 128  ;;  %p1289_p12 = scmp.lt.s32.totalorder %s1490_s25, %s1490_s25 }
  0x33   : > { %p1282_p5 = scmp.ne.s32.totalorder %s1490_s25, %s1281_s22  ;;  %p1290_p0 = scmp.lt.s32.totalorder %s1281_s22, %s1281_s22 }
  0x35   : > { %p1284_p7 = pnand %p1282_p5, %p1242_p13  ;;  %p1291_p2 = por %p1290_p0, %p1289_p12 }
  0x37   : > { %p1285_p9 = pneg %p1284_p7 }
  0x39   : > { %p1292_p1 = pnand %p1291_p2, %p1285_p9 }
  0x3b   : > { %1295 = shalt.err (!%p1292_p1)
}
  0x3c   : > { %1177 = dma.hbm_to_vmem [thread:$0]  (!%p1486_p11), %s1703_s2, 128, %s1490_s25, [#allocation6]  }
  0x3d   : > { %s1545_s4 = sadd.s32 1, %s1396_s15   ;;  %s27_s23 = sadd.s32 1, %s1392_s14 }
  0x3e   : > { %s24_s5 = ssub.s32 %s1396_s15, %s1545_s4  ;;  %p34_p13 = scmp.ne.s32.totalorder %s1392_s14, %s1388_s13 }
  0x3f   : > { %p25_p6 = scmp.eq.s32.totalorder %s24_s5, 0  ;;  %p35_p10 = scmp.eq.s32.totalorder %s1396_s15, 0 }
  0x40   : > { %p1712_p3 = scmp.eq.s32.totalorder %s1456_s16, 1  ;;  %p1188_p7 = scmp.lt.s32.totalorder %s1396_s15, 2 }
  0x41   : > { %s1561_s7 = scalar_select %p25_p6, %s1392_s14, %s27_s23  }
  0x42   : > { %p1555_p5 = por %p1712_p3, %p34_p13  ;;  %p36_p9 = por %p35_p10, %p34_p13 }
  0x43   : > { %s156_s8 = sand.u32 1, %s1392_s14   ;;  %s1095_s25 = sshll.u32 %s1396_s15, 8 }
  0x44   : > { %s1713_s6 = scalar_select %p1555_p5, 1, 0 }
  0x45   : > { %s1074_s9 = sshll.u32 %s156_s8, 4  ;;  %s1568_s17 = scalar_lea.hbm %s1701_s0, %s1095_s25 }
  0x46   : > { %s160_s21 = scalar_lea.vmem [#allocation2], %s1074_s9  ;;  %p1572_p11 = pnand %p1188_p7, %p36_p9 }
  0x47   : > { %s168_s24 = sshll.u32 %s160_s21, 4  ;;  %s157_s27 = scalar_lea.sflag [#allocation3], %s156_s8  ;;  %s1570_s24 = int_to_ptr.vmem [resolvable:$true] %s168_s24 }
  0x48   : > { %s1296_s28 = scalar_lea.hbm %s1568_s17, 256  ;;  %p1298_p0 = pneg %p1572_p11 }
  0x49   : > { %p1297_p12 = scmp.ne.s32.totalorder %s1568_s17, %s1296_s28  ;;  %s1301_s30 = scalar_lea.hbm %s1701_s0, 512 }
  0x4a   : > { %p1302_p13 = scmp.lt.u32.totalorder %s1568_s17, %s1701_s0  ;;  %p1303_p6 = scmp.lt.u32.totalorder %s1301_s30, %s1296_s28 }
  0x4b   : > { %p1299_p2 = pnand %p1298_p0, %p1297_p12  ;;  %p1305_p3 = scmp.lt.u32.totalorder %s1296_s28, %s1568_s17 }
  0x4c   : > { %p1304_p10 = por %p1303_p6, %p1302_p13 }
  0x4d   : > { %p1300_p1 = pneg %p1299_p2 }
  0x4e   : > { %p1306_p7 = por %p1305_p3, %p1304_p10 }
  0x50   : > { %p1307_p9 = pnand %p1306_p7, %p1300_p1 }
  0x52   : > { %1310 = shalt.err (!%p1307_p9)
}
  0x53   : > { %s1311_s8 = scalar_lea.vmem %s1570_s24, 256  ;;  %s1402_s9 = smov [#allocation2]  }
  0x54   : > { %p1312_p12 = scmp.ne.s32.totalorder %s1570_s24, %s1311_s8  ;;  %s1316_s25 = sshll.u32 %s1402_s9, 4  ;;  %s1317_s25 = int_to_ptr.vmem [resolvable:$false] %s1316_s25 }
  0x55   : > { %s1318_s10 = scalar_lea.vmem %s1317_s25, 512  ;;  %p1319_p4 = scmp.lt.s32.totalorder %s1570_s24, %s1317_s25 }
  0x56   : > { %p1314_p2 = pnand %p1312_p12, %p1298_p0  ;;  %p1320_p13 = scmp.lt.s32.totalorder %s1318_s10, %s1311_s8 }
  0x58   : > { %p1315_p5 = pneg %p1314_p2  ;;  %p1321_p6 = por %p1320_p13, %p1319_p4 }
  0x5a   : > { %p1322_p10 = pnand %p1321_p6, %p1315_p5 }
  0x5c   : > { %1325 = shalt.err (!%p1322_p10)
}
  0x5d   : > { %1181 = dma.hbm_to_vmem [thread:$0]  (!%p1572_p11), %s1568_s17, 256, %s1570_s24, %s157_s27  }
  0x5e   : > { %177 = sbr.rel (%p1475_p8) target bundleno = 485 (0x1e5), region = 32  ;;  %s1604_s11 = sand.u32 (!%p1475_p8), 1, %s1388_s13  }
  0x5f   : > { %s1078_s21 = sshll.u32 (!%p1475_p8), %s1604_s11, 4  ;;  %s180_s28 = scalar_lea.sflag (!%p1475_p8), [#allocation3], %s1604_s11 }
  0x60   : > { %s183_s22 = scalar_lea.vmem (!%p1475_p8), [#allocation2], %s1078_s21  ;;  %p1715_p4 = scmp.ne.s32.totalorder (!%p1475_p8), %s1708_s18, 0 }
  0x65   : > { %1371 = dma.done.wait (%p1715_p4), %s180_s28, 256  }
  0x66   : > { %1373 = vsyncadd (%p1715_p4), %s180_s28, 4294967040  ;;  %p1716_p5 = scmp.eq.s32.totalorder %s1456_s16, 0 }
  0x68   : > { %1375 = dma.done.wait (%p1716_p5), [#allocation6], 1280   ;;  %p1717_p11 = pmov %p1716_p5 }
  0x69   : > { %v1403_v0 = vmov 0.0   ;;  %vm1404_vm0 = vmmov 0   ;;  %v216_v1 = vld [vmem:[%s183_s22] sm:$0xff]  ;;  %s1405_s18 = smov 126   ;;  %s1406_s20 = smov 127   ;;  %v217_v3 = vld [vmem:[%s183_s22 + $0x8] sm:$0xff] }
  0x6a   : > { %1377 = vsyncadd (%p1717_p11), [#allocation6], 4294966016  ;;  %1114 = vmatprep.subr.mxu0 %v1403_v0  ;;  %1119 = vmatprep.subr.mxu1 %v1403_v0  ;;  %v215_v2 = vld [vmem:[#allocation5] sm:$0xff]  ;;  %vm229_vm1 = vcmask 64512   ;;  %s1407_s17 = smov 118   ;;  %s1408_s24 = smov 117  }
  0x6b   : > { %1116 = vmatprep.mubr.msk.f32.mxu0 %vm1404_vm0, %v1403_v0  ;;  %1121 = vmatprep.mubr.msk.f32.mxu1 %vm1404_vm0, %v1403_v0  ;;  %s1409_s26 = smov 116   ;;  %v1410_v4 = vmov 0   ;;  %s1411_s27 = smov 108   ;;  %v957_v5 = vld [vmem:[#allocation7] sm:$0xff]  ;;  %vm226_vm2 = vcmask 1039360   ;;  %vm382_vm3 = vcmask 1031168  }
  0x6c   : > { %378 = vrot.lane.b32.xlu1 %v216_v1, %s1405_s18  ;;  %222 = vrot.lane.b32.xlu0 %v216_v1, %s1406_s20  ;;  %s1412_s29 = smov 107   ;;  %s1413_s30 = smov 106   ;;  %v219_v10 = vld [vmem:[#allocation5 + $0x8] sm:$0xff]  ;;  %vm465_vm4 = vcmask 965632   ;;  %v377_v15 = vld [vmem:[#allocation5 + $0x10] sm:$0xff]  ;;  %v460_v17 = vld [vmem:[#allocation5 + $0x18] sm:$0xff] }
  0x6d   : > { %1120 = vmatpush3.msra.mxu1 %v216_v1  ;;  %1239 = vset.pattern.permute.xlu0 %v1410_v4  ;;  %vm548_vm5 = vcmask 957440   ;;  %v543_v20 = vld [vmem:[#allocation5 + $0x20] sm:$0xff]  ;;  %vm631_vm6 = vcmask 949248   ;;  %v626_v24 = vld [vmem:[#allocation5 + $0x28] sm:$0xff]  ;;  %vm714_vm7 = vcmask 883712   ;;  %v709_v28 = vld [vmem:[#allocation5 + $0x30] sm:$0xff] }
  0x6e   : > { %1129 = vmatprep.subr.mxu1 %v1403_v0  ;;  %1122 = vmatmul.mubr.msk.f32.vlgmr.msra.gmra.mrb[0].mxu1 %vm229_vm1, %v215_v2  ;;  %vm797_vm8 = vcmask 875520   ;;  %v792_v32 = vld [vmem:[#allocation5 + $0x38] sm:$0xff]  ;;  %vm880_vm9 = vcmask 867328   ;;  %v875_v36 = vld [vmem:[#allocation5 + $0x40] sm:$0xff]  ;;  %s1081_s23 = sshll.u32 %s1604_s11, 3  ;;  %s1092_s5 = sshll.u32 %s1456_s16, 7 }
  0x6f   : > { %1131 = vmatprep.mubr.msk.f32.mxu1 %vm1404_vm0, %v1403_v0  ;;  %s213_s8 = scalar_lea.vmem [#allocation8], %s1081_s23  ;;  %s1657_s21 = scalar_lea.hbm %s1704_s3, %s1092_s5 }
  0x70   : > { %380 = vrot.lane.b32.xlu1 %v217_v3, %s1405_s18  ;;  %224 = vrot.lane.b32.xlu0 %v217_v3, %s1406_s20  ;;  %s980_s9 = sshll.u32 %s213_s8, 4  ;;  %s967_s28 = scalar_lea.sflag [#allocation4], %s1604_s11  ;;  %s1659_s9 = int_to_ptr.vmem [resolvable:$true] %s980_s9 }
  0x71   : > { %s1326_s22 = scalar_lea.vmem %s1659_s9, 128  ;;  %p1718_p0 = scmp.ne.s32.totalorder %s1713_s6, 0 }
  0x72   : > { %p1327_p8 = scmp.ne.s32.totalorder %s1659_s9, %s1326_s22  ;;  %s1414_s16 = smov [#allocation8]  }
  0x73   : > { %s1330_s18 = sshll.u32 %s1414_s16, 4  ;;  %s1331_s18 = int_to_ptr.vmem [resolvable:$false] %s1330_s18 }
  0x74   : > { %463 = vrot.lane.b32.xlu1 %v217_v3, %s1407_s17  ;;  %461 = vrot.lane.b32.xlu0 %v216_v1, %s1407_s17  ;;  %p1328_p1 = pnand %p1327_p8, %p1718_p0  ;;  %s1332_s20 = scalar_lea.vmem %s1331_s18, 256 }
  0x75   : > { %p1333_p7 = scmp.lt.s32.totalorder %s1659_s9, %s1331_s18  ;;  %p1334_p9 = scmp.lt.s32.totalorder %s1332_s20, %s1326_s22 }
  0x76   : > { %p1329_p3 = pneg %p1328_p1 }
  0x77   : > { %p1335_p12 = por %p1334_p9, %p1333_p7 }
  0x78   : > { %546 = vrot.lane.b32.xlu1 %v217_v3, %s1408_s24  ;;  %544 = vrot.lane.b32.xlu0 %v216_v1, %s1408_s24 }
  0x79   : > { %p1336_p2 = pnand %p1335_p12, %p1329_p3 }
  0x7c   : > { %629 = vrot.lane.b32.xlu1 %v217_v3, %s1409_s26  ;;  %627 = vrot.lane.b32.xlu0 %v216_v1, %s1409_s26 }
  0x80   : > { %712 = vrot.lane.b32.xlu1 %v217_v3, %s1411_s27  ;;  %710 = vrot.lane.b32.xlu0 %v216_v1, %s1411_s27 }
  0x84   : > { %795 = vrot.lane.b32.xlu1 %v217_v3, %s1412_s29  ;;  %793 = vrot.lane.b32.xlu0 %v216_v1, %s1412_s29 }
  0x88   : > { %878 = vrot.lane.b32.xlu1 %v217_v3, %s1413_s30  ;;  %876 = vrot.lane.b32.xlu0 %v216_v1, %s1413_s30 }
  0x8c   : > { %960 = vperm.xlu0 %1239, %v957_v5  }
  0xde   : > { %v379_v6 = vpop.permute.xlu1 %378  ;;  %v223_v7 = vpop.permute.xlu0 %222 }
  0xe2   : > { %v381_v8 = vpop.permute.xlu1 %380  ;;  %v225_v9 = vpop.permute.xlu0 %224 }
  0xe3   : > { %v227_v11 = vsel %vm226_vm2, %v223_v7, %v225_v9  ;;  %v383_v12 = vsel %vm382_vm3, %v379_v6, %v381_v8 }
  0xe4   : > { %1115 = vmatpush3.msra.mxu0 %v227_v11 }
  0xe5   : > { %1124 = vmatprep.subr.mxu0 %v1403_v0  ;;  %1117 = vmatmul.mubr.msk.f32.vlgmr.msra.gmra.mrb[0].mxu0 %vm229_vm1, %v219_v10 }
  0xe6   : > { %v464_v13 = vpop.permute.xlu1 %463  ;;  %1125 = vmatpush3.msra.mxu0 %v383_v12  ;;  %v462_v14 = vpop.permute.xlu0 %461  ;;  %1126 = vmatprep.mubr.msk.f32.mxu0 %vm1404_vm0, %v1403_v0 }
  0xe7   : > { %v466_v16 = vsel %vm465_vm4, %v462_v14, %v464_v13  ;;  %1134 = vmatprep.subr.mxu0 %v1403_v0 }
  0xe8   : > { %1130 = vmatpush3.msra.mxu1 %v466_v16 }
  0xe9   : > { %1127 = vmatmul.mubr.msk.f32.vlgmr.msra.gmra.mrb[2].mxu0 %vm229_vm1, %v377_v15  ;;  %1139 = vmatprep.subr.mxu1 %v1403_v0 }
  0xea   : > { %v547_v18 = vpop.permute.xlu1 %546  ;;  %v545_v19 = vpop.permute.xlu0 %544  ;;  %1132 = vmatmul.mubr.msk.f32.vlgmr.msra.gmra.mrb[2].mxu1 %vm229_vm1, %v460_v17  ;;  %1136 = vmatprep.mubr.msk.f32.mxu0 %vm1404_vm0, %v1403_v0 }
  0xeb   : > { %v549_v21 = vsel %vm548_vm5, %v545_v19, %v547_v18  ;;  %1141 = vmatprep.mubr.msk.f32.mxu1 %vm1404_vm0, %v1403_v0 }
  0xec   : > { %1135 = vmatpush3.msra.mxu0 %v549_v21 }
  0xed   : > { %1144 = vmatprep.subr.mxu0 %v1403_v0  ;;  %1137 = vmatmul.mubr.msk.f32.vlgmr.msra.gmra.mrb[4].mxu0 %vm229_vm1, %v543_v20 }
  0xee   : > { %v630_v22 = vpop.permute.xlu1 %629  ;;  %v628_v23 = vpop.permute.xlu0 %627  ;;  %1146 = vmatprep.mubr.msk.f32.mxu0 %vm1404_vm0, %v1403_v0 }
  0xef   : > { %v632_v25 = vsel %vm631_vm6, %v628_v23, %v630_v22 }
  0xf0   : > { %1140 = vmatpush3.msra.mxu1 %v632_v25 }
  0xf1   : > { %1149 = vmatprep.subr.mxu1 %v1403_v0  ;;  %1142 = vmatmul.mubr.msk.f32.vlgmr.msra.gmra.mrb[4].mxu1 %vm229_vm1, %v626_v24 }
  0xf2   : > { %v713_v26 = vpop.permute.xlu1 %712  ;;  %v711_v27 = vpop.permute.xlu0 %710  ;;  %1151 = vmatprep.mubr.msk.f32.mxu1 %vm1404_vm0, %v1403_v0 }
  0xf3   : > { %v715_v29 = vsel %vm714_vm7, %v711_v27, %v713_v26 }
  0xf4   : > { %1145 = vmatpush3.msra.mxu0 %v715_v29 }
  0xf5   : > { %1147 = vmatmul.mubr.msk.f32.vlgmr.msra.gmra.mrb[6].mxu0 %vm229_vm1, %v709_v28  ;;  %1154 = vmatprep.subr.mxu0 %v1403_v0 }
  0xf6   : > { %v796_v30 = vpop.permute.xlu1 %795  ;;  %v794_v31 = vpop.permute.xlu0 %793  ;;  %1156 = vmatprep.mubr.msk.f32.mxu0 %vm1404_vm0, %v1403_v0 }
  0xf7   : > { %v798_v33 = vsel %vm797_vm8, %v794_v31, %v796_v30 }
  0xf8   : > { %1150 = vmatpush3.msra.mxu1 %v798_v33 }
  0xf9   : > { %1152 = vmatmul.mubr.msk.f32.vlgmr.msra.gmra.mrb[6].mxu1 %vm229_vm1, %v792_v32 }
  0xfa   : > { %v879_v34 = vpop.permute.xlu1 %878  ;;  %v877_v35 = vpop.permute.xlu0 %876 }
  0xfb   : > { %v881_v37 = vsel %vm880_vm9, %v877_v35, %v879_v34 }
  0xfc   : > { %1155 = vmatpush3.msra.mxu0 %v881_v37 }
  0xfd   : > { %1157 = vmatmul.mubr.msk.f32.vlgmr.msra.gmra.mrb[8].mxu0 %vm229_vm1, %v875_v36 }
 0x10b   : > { %v961_v62 = vpop.permute.xlu0 %960 }
 0x141   : > { %v372_v38 = vpop.f32.mrb[0].mxu1 }
 0x142   : > { %v1123_v39 = vpop.f32.mrb[1].mxu1 }
 0x1b8   : > { %v299_v40 = vpop.f32.mrb[0].mxu0 }
 0x1b9   : > { %v1118_v41 = vpop.f32.mrb[1].mxu0  ;;  %v373_v42 = vadd.f32 %v372_v38, %v299_v40 }
 0x1bc   : > { %v454_v43 = vpop.f32.mrb[2].mxu0 }
 0x1bd   : > { %v458_v44 = vadd.f32 %v454_v43, %v373_v42  ;;  %v1128_v45 = vpop.f32.mrb[3].mxu0  ;;  %v537_v46 = vpop.f32.mrb[2].mxu1 }
 0x1be   : > { %v1133_v47 = vpop.f32.mrb[3].mxu1 }
 0x1bf   : > { %v541_v48 = vadd.f32 %v537_v46, %v458_v44 }
 0x1c0   : > { %v620_v49 = vpop.f32.mrb[4].mxu0 }
 0x1c1   : > { %v624_v50 = vadd.f32 %v620_v49, %v541_v48  ;;  %v1138_v51 = vpop.f32.mrb[5].mxu0 }
 0x1c4   : > { %v703_v52 = vpop.f32.mrb[4].mxu1 }
 0x1c5   : > { %v707_v53 = vadd.f32 %v703_v52, %v624_v50  ;;  %v1143_v54 = vpop.f32.mrb[5].mxu1 }
 0x1c8   : > { %v786_v55 = vpop.f32.mrb[6].mxu0 }
 0x1c9   : > { %v790_v56 = vadd.f32 %v786_v55, %v707_v53  ;;  %v1148_v57 = vpop.f32.mrb[7].mxu0 }
 0x1cc   : > { %v869_v58 = vpop.f32.mrb[6].mxu1 }
 0x1cd   : > { %v873_v59 = vadd.f32 %v869_v58, %v790_v56  ;;  %v1153_v60 = vpop.f32.mrb[7].mxu1 }
 0x1d0   : > { %v952_v61 = vpop.f32.mrb[8].mxu0 }
 0x1d1   : > { %v956_v63 = vadd.f32 %v952_v61, %v873_v59  ;;  %v1158_v0 = vpop.f32.mrb[9].mxu0 }
 0x1d3   : > { %v963_v1 = vadd.f32 %v961_v62, %v956_v63 }
 0x1d5   : > { %v964_v2 = vmax.f32 %v963_v1, 0.0 }
 0x1d7   : > { %965 = vst [vmem:[%s213_s8] sm:$0xff] %v964_v2 }
 0x1d8   : > { %1339 = shalt.err (!%p1336_p2)
}
 0x1d9   : > { %s1340_s11 = scalar_lea.hbm %s1657_s21, 128  ;;  %s1344_s26 = scalar_lea.hbm %s1704_s3, 256 }
 0x1da   : > { %p1341_p13 = scmp.ne.s32.totalorder %s1657_s21, %s1340_s11  ;;  %p1345_p4 = scmp.lt.u32.totalorder %s1657_s21, %s1704_s3 }
 0x1db   : > { %p1346_p5 = scmp.lt.u32.totalorder %s1344_s26, %s1340_s11  ;;  %p1348_p8 = scmp.lt.u32.totalorder %s1340_s11, %s1657_s21 }
 0x1dc   : > { %p1342_p6 = pnand %p1341_p13, %p1718_p0 }
 0x1dd   : > { %p1347_p11 = por %p1346_p5, %p1345_p4 }
 0x1de   : > { %p1343_p10 = pneg %p1342_p6 }
 0x1df   : > { %p1349_p1 = por %p1348_p8, %p1347_p11 }
 0x1e1   : > { %p1350_p3 = pnand %p1349_p1, %p1343_p10 }
 0x1e3   : > { %1353 = shalt.err (!%p1350_p3)
}
 0x1e4   : > { %1169 = dma.vmem_to_hbm [thread:$0]  (%p1718_p0), %s1659_s9, 128, %s1657_s21, %s967_s28  }
 0x1e5 PF: > { %s992_s30 = sand.u32 1, %s1384_s12   ;;  %p1719_p7 = scmp.ne.s32.totalorder %s1709_s19, 0 }
 0x1e6   : > { %p1720_p9 = scmp.ge.s32.totalorder %s1396_s15, 2  ;;  %s993_s23 = scalar_lea.sflag [#allocation4], %s992_s30 }
 0x1e8   : > { %p1183_p12 = pnand %p1720_p9, %p1719_p7 }
 0x1ea   : > { %1379 = dma.done.wait (!%p1183_p12), %s993_s23, 128  }
 0x1eb   : > { %1381 = vsyncadd (!%p1183_p12), %s993_s23, 4294967168  ;;  %p17_p2 = scmp.ge.s32.totalorder %s1545_s4, 4   ;;  %s1721_s12 = smov %s1388_s13 }
 0x1ec   : > { %s1722_s13 = smov %s1392_s14  ;;  %s1723_s14 = smov %s1561_s7 }
 0x1ed   : > { %s1724_s15 = smov %s1545_s4  ;;  %19 = sbr.rel (!%p17_p2) target bundleno = 6 (0x6), region = 93 }
 0x1f4   :  { %998 = vsyncpa [#allocation3], 1 }
 0x1f5   :  { %1000 = vsyncpa [#allocation3 + $0x1], 1 }
 0x1f6   :  { %1001 = vsyncpa [#allocation6], 1 }
 0x1f7   :  { %1002 = vsyncpa [#allocation4], 1 }
 0x1f8   :  { %1004 = vsyncpa [#allocation4 + $0x1], 1 }

// kernel: a_call__.29
= control target key start
LH: loop header
LB: loop body
LE: loop exit
PB: predicated region body
PF: predicated region fallthrough
CT: control target
= control target key end

     0   :  { %8 = vsyncpa [#allocation3], 0  ;;  %s2528_s0 = inlined_call_operand.hbm [shape: f32[2,8,512], index: 0, kind: input, shape index: {}]   ;;  %s2529_s1 = inlined_call_operand.hbm [shape: f32[9,3,8], index: 1, kind: input, shape index: {}]   ;;  %s2530_s2 = inlined_call_operand.hbm [shape: f32[3,1], index: 2, kind: input, shape index: {}]   ;;  %s2531_s3 = inlined_call_operand.hbm [shape: f32[2,3,384], index: 3, kind: output, shape index: {}]  }
   0x1   :  { %10 = vsyncpa [#allocation3 + $0x1], 0 }
   0x2   :  { %11 = vsyncpa [#allocation6], 0 }
   0x3   :  { %12 = vsyncpa [#allocation4], 0 }
   0x4   :  { %14 = vsyncpa [#allocation4 + $0x1], 0  ;;  %s2190_s12 = smov 0   ;;  %s2192_s13 = smov 0  }
   0x5   :  { %s2194_s14 = smov 0   ;;  %s2196_s15 = smov 0  }
   0x6 LB: > { %s2211_s16 = sadd.s32 4294967295, %s2151_s15   ;;  %s1799_s17 = sadd.s32 4294967294, %s2151_s15   ;;  %s2151_s15 = sphi %s2196_s15, %s2551_s15   ;;  %s2147_s14 = sphi %s2194_s14, %s2550_s14   ;;  %s2143_s13 = sphi %s2192_s13, %s2549_s13   ;;  %s2139_s12 = sphi %s2190_s12, %s2548_s12  }
   0x7   : > { %p40_p0 = scmp.ne.s32.totalorder %s2143_s13, %s2139_s12  ;;  %p2532_p1 = scmp.eq.s32.totalorder %s2211_s16, 0 }
   0x8   : > { %p112_p3 = scmp.eq.s32.totalorder %s1799_s17, 1  ;;  %p1800_p5 = scmp.ge.s32.totalorder %s2151_s15, 1 }
   0x9   : > { %p2220_p4 = por %p2532_p1, %p40_p0  ;;  %p119_p7 = scmp.lt.s32.totalorder %s2151_s15, 3 }
   0xa   : > { %p2225_p6 = por %p112_p3, %p40_p0  ;;  %s2153_s21 = smov [#allocation5]  }
   0xb   : > { %s2535_s18 = scalar_select %p2220_p4, 1, 0 }
   0xc   : > { %s2536_s19 = scalar_select %p2225_p6, 1, 0 }
   0xd   : > { %p2230_p8 = pnand %p1800_p5, %p119_p7  ;;  %s131_s22 = sshll.u32 %s2153_s21, 4  ;;  %s2234_s22 = int_to_ptr.vmem [resolvable:$true] %s131_s22 }
   0xe   : > { %s2154_s24 = smov [#allocation7]   ;;  %s1995_s28 = scalar_lea.hbm %s2529_s1, 576 }
   0xf   : > { %p1926_p9 = pneg %p2230_p8  ;;  %s145_s25 = sshll.u32 %s2154_s24, 4  ;;  %s2245_s25 = int_to_ptr.vmem [resolvable:$true] %s145_s25 }
  0x10   : > { %p1996_p12 = scmp.ne.s32.totalorder %s2529_s1, %s1995_s28  ;;  %p2002_p5 = scmp.lt.u32.totalorder %s1995_s28, %s2529_s1 }
  0x11   : > { %p2241_p11 = pnand %p1926_p9, %p2532_p1 }
  0x13   : > { %p1997_p13 = pneg %p2241_p11 }
  0x15   : > { %p1998_p0 = pnand %p1997_p13, %p1996_p12 }
  0x17   : > { %p1999_p3 = pneg %p1998_p0 }
  0x19   : > { %p2004_p7 = pnand %p2002_p5, %p1999_p3 }
  0x1b   : > { %2007 = shalt.err (!%p2004_p7)
}
  0x1c   : > { %s2008_s6 = scalar_lea.vmem %s2234_s22, 576  ;;  %p2016_p2 = scmp.lt.s32.totalorder %s2234_s22, %s2234_s22 }
  0x1d   : > { %p2009_p9 = scmp.ne.s32.totalorder %s2234_s22, %s2008_s6  ;;  %p2017_p12 = scmp.lt.s32.totalorder %s2008_s6, %s2008_s6 }
  0x1f   : > { %p2011_p10 = pnand %p2009_p9, %p1997_p13  ;;  %p2018_p0 = por %p2017_p12, %p2016_p2 }
  0x21   : > { %p2012_p1 = pneg %p2011_p10 }
  0x23   : > { %p2019_p6 = pnand %p2018_p0, %p2012_p1 }
  0x25   : > { %2022 = shalt.err (!%p2019_p6)
}
  0x26   : > { %s2155_s7 = smov 64   ;;  %s2156_s8 = smov 4  }
  0x27   : > { %1929 = dma.hbm_to_vmem [thread:$0]  (!%p2241_p11), %s2529_s1, 576, %s2234_s22, [#allocation6], %s2155_s7, %s2155_s7, %s2156_s8  }
  0x28   : > { %s2023_s21 = scalar_lea.hbm %s2530_s2, 64 }
  0x29   : > { %p2024_p2 = scmp.ne.s32.totalorder %s2530_s2, %s2023_s21  ;;  %p2030_p10 = scmp.lt.u32.totalorder %s2023_s21, %s2530_s2 }
  0x2b   : > { %p2026_p1 = pnand %p2024_p2, %p1997_p13 }
  0x2d   : > { %p2027_p6 = pneg %p2026_p1 }
  0x2f   : > { %p2032_p3 = pnand %p2030_p10, %p2027_p6 }
  0x31   : > { %2035 = shalt.err (!%p2032_p3)
}
  0x32   : > { %s2036_s22 = scalar_lea.vmem %s2245_s25, 64  ;;  %p2044_p12 = scmp.lt.s32.totalorder %s2245_s25, %s2245_s25 }
  0x33   : > { %p2037_p5 = scmp.ne.s32.totalorder %s2245_s25, %s2036_s22  ;;  %p2045_p0 = scmp.lt.s32.totalorder %s2036_s22, %s2036_s22 }
  0x35   : > { %p2039_p7 = pnand %p2037_p5, %p1997_p13  ;;  %p2046_p2 = por %p2045_p0, %p2044_p12 }
  0x37   : > { %p2040_p9 = pneg %p2039_p7 }
  0x39   : > { %p2047_p1 = pnand %p2046_p2, %p2040_p9 }
  0x3b   : > { %2050 = shalt.err (!%p2047_p1)
}
  0x3c   : > { %1932 = dma.hbm_to_vmem [thread:$0]  (!%p2241_p11), %s2530_s2, 64, %s2245_s25, [#allocation6]  }
  0x3d   : > { %s2300_s4 = sadd.s32 1, %s2151_s15   ;;  %s27_s23 = sadd.s32 1, %s2147_s14 }
  0x3e   : > { %s24_s5 = ssub.s32 %s2151_s15, %s2300_s4  ;;  %p34_p13 = scmp.ne.s32.totalorder %s2147_s14, %s2143_s13 }
  0x3f   : > { %p25_p6 = scmp.eq.s32.totalorder %s24_s5, 0  ;;  %p35_p10 = scmp.eq.s32.totalorder %s2151_s15, 0 }
  0x40   : > { %p2539_p3 = scmp.eq.s32.totalorder %s2211_s16, 1  ;;  %p1943_p7 = scmp.lt.s32.totalorder %s2151_s15, 2 }
  0x41   : > { %s2316_s7 = scalar_select %p25_p6, %s2147_s14, %s27_s23  }
  0x42   : > { %p2310_p5 = por %p2539_p3, %p34_p13  ;;  %p36_p9 = por %p35_p10, %p34_p13 }
  0x43   : > { %s156_s8 = sand.u32 1, %s2147_s14   ;;  %s1832_s25 = sshll.u32 %s2151_s15, 9 }
  0x44   : > { %s2540_s6 = scalar_select %p2310_p5, 1, 0 }
  0x45   : > { %s1804_s9 = sshll.u32 %s156_s8, 5  ;;  %s2323_s17 = scalar_lea.hbm %s2528_s0, %s1832_s25 }
  0x46   : > { %s160_s21 = scalar_lea.vmem [#allocation2], %s1804_s9  ;;  %p2327_p11 = pnand %p1943_p7, %p36_p9 }
  0x47   : > { %s168_s24 = sshll.u32 %s160_s21, 4  ;;  %s157_s27 = scalar_lea.sflag [#allocation3], %s156_s8  ;;  %s2325_s24 = int_to_ptr.vmem [resolvable:$true] %s168_s24 }
  0x48   : > { %s2051_s28 = scalar_lea.hbm %s2323_s17, 512  ;;  %p2053_p0 = pneg %p2327_p11 }
  0x49   : > { %p2052_p12 = scmp.ne.s32.totalorder %s2323_s17, %s2051_s28  ;;  %s2056_s30 = scalar_lea.hbm %s2528_s0, 1024 }
  0x4a   : > { %p2057_p13 = scmp.lt.u32.totalorder %s2323_s17, %s2528_s0  ;;  %p2058_p6 = scmp.lt.u32.totalorder %s2056_s30, %s2051_s28 }
  0x4b   : > { %p2054_p2 = pnand %p2053_p0, %p2052_p12  ;;  %p2060_p3 = scmp.lt.u32.totalorder %s2051_s28, %s2323_s17 }
  0x4c   : > { %p2059_p10 = por %p2058_p6, %p2057_p13 }
  0x4d   : > { %p2055_p1 = pneg %p2054_p2 }
  0x4e   : > { %p2061_p7 = por %p2060_p3, %p2059_p10 }
  0x50   : > { %p2062_p9 = pnand %p2061_p7, %p2055_p1 }
  0x52   : > { %2065 = shalt.err (!%p2062_p9)
}
  0x53   : > { %s2066_s8 = scalar_lea.vmem %s2325_s24, 512  ;;  %s2157_s9 = smov [#allocation2]  }
  0x54   : > { %p2067_p12 = scmp.ne.s32.totalorder %s2325_s24, %s2066_s8  ;;  %s2071_s25 = sshll.u32 %s2157_s9, 4  ;;  %s2072_s25 = int_to_ptr.vmem [resolvable:$false] %s2071_s25 }
  0x55   : > { %s2073_s10 = scalar_lea.vmem %s2072_s25, 1024  ;;  %p2074_p4 = scmp.lt.s32.totalorder %s2325_s24, %s2072_s25 }
  0x56   : > { %p2069_p2 = pnand %p2067_p12, %p2053_p0  ;;  %p2075_p13 = scmp.lt.s32.totalorder %s2073_s10, %s2066_s8 }
  0x58   : > { %p2070_p5 = pneg %p2069_p2  ;;  %p2076_p6 = por %p2075_p13, %p2074_p4 }
  0x5a   : > { %p2077_p10 = pnand %p2076_p6, %p2070_p5 }
  0x5c   : > { %2080 = shalt.err (!%p2077_p10)
}
  0x5d   : > { %1936 = dma.hbm_to_vmem [thread:$0]  (!%p2327_p11), %s2323_s17, 512, %s2325_s24, %s157_s27  }
  0x5e   : > { %177 = sbr.rel (%p2230_p8) target bundleno = 524 (0x20c), region = 32  ;;  %s2359_s11 = sand.u32 (!%p2230_p8), 1, %s2143_s13  }
  0x5f   : > { %s1808_s21 = sshll.u32 (!%p2230_p8), %s2359_s11, 5  ;;  %s180_s28 = scalar_lea.sflag (!%p2230_p8), [#allocation3], %s2359_s11 }
  0x60   : > { %s183_s22 = scalar_lea.vmem (!%p2230_p8), [#allocation2], %s1808_s21  ;;  %p2542_p4 = scmp.ne.s32.totalorder (!%p2230_p8), %s2535_s18, 0 }
  0x65   : > { %2126 = dma.done.wait (%p2542_p4), %s180_s28, 512  }
  0x66   : > { %2128 = vsyncadd (%p2542_p4), %s180_s28, 4294966784  ;;  %p2543_p5 = scmp.eq.s32.totalorder %s2211_s16, 0 }
  0x68   : > { %2130 = dma.done.wait (%p2543_p5), [#allocation6], 640   ;;  %p2544_p11 = pmov %p2543_p5 }
  0x69   : > { %v2158_v0 = vmov 0.0   ;;  %v2373_v1 = vld [vmem:[%s183_s22 + $0x8] sm:$0xff]  ;;  %v2375_v2 = vld [vmem:[%s183_s22] sm:$0xff]  ;;  %s2159_s20 = smov 127   ;;  %v2379_v3 = vld [vmem:[%s183_s22 + $0x10] sm:$0xff]  ;;  %s2160_s18 = smov 126  }
  0x6a   : > { %2132 = vsyncadd (%p2544_p11), [#allocation6], 4294966656  ;;  %311 = vmatprep.mubr.f32.mxu0 %v2158_v0  ;;  %1851 = vmatprep.subr.mxu1 %v2158_v0  ;;  %s2161_s17 = smov 110   ;;  %vm2162_vm0 = vmmov 0   ;;  %s2163_s24 = smov 109   ;;  %v221_v4 = vld [vmem:[%s183_s22 + $0x18] sm:$0xff] }
  0x6b   : > { %230 = vrot.lane.b32.xlu0 %v2373_v1, %s2159_s20  ;;  %228 = vrot.lane.b32.xlu1 %v2375_v2, %s2159_s20  ;;  %s2164_s26 = smov 108   ;;  %s2165_s27 = smov 92   ;;  %v2168_v5 = vmov 0   ;;  %v1680_v6 = vld [vmem:[#allocation7] sm:$0x7]  ;;  %vm236_vm1 = vcmask 1039360  }
  0x6c   : > { %1853 = vmatprep.mubr.msk.f32.mxu1 %vm2162_vm0, %v2158_v0  ;;  %s2166_s29 = smov 91   ;;  %s2167_s30 = smov 90   ;;  %1994 = vset.pattern.permute.xlu0 %v2168_v5  ;;  %v223_v12 = vld [vmem:[#allocation5 + $0x4] sm:$0x7]  ;;  %vm243_vm2 = vcmask 64512   ;;  %vm542_vm3 = vcmask 1031168  }
  0x6d   : > { %vm706_vm4 = vcmask 900096   ;;  %v217_v19 = vld [vmem:[#allocation5] sm:$0x7]  ;;  %vm870_vm5 = vcmask 891904   ;;  %v533_v26 = vld [vmem:[#allocation5 + $0x8] sm:$0x7] }
  0x6e   : > { %vm1034_vm6 = vcmask 883712   ;;  %v697_v34 = vld [vmem:[#allocation5 + $0xc] sm:$0x7]  ;;  %vm1198_vm7 = vcmask 752640   ;;  %v861_v43 = vld [vmem:[#allocation5 + $0x10] sm:$0x7] }
  0x6f   : > { %232 = vrot.lane.b32.xlu0 %v2379_v3, %s2159_s20  ;;  %536 = vrot.lane.b32.xlu1 %v2373_v1, %s2160_s18  ;;  %v1025_v51 = vld [vmem:[#allocation5 + $0x14] sm:$0x7]  ;;  %vm1362_vm8 = vcmask 744448   ;;  %v1189_v59 = vld [vmem:[#allocation5 + $0x18] sm:$0x7]  ;;  %vm1526_vm9 = vcmask 736256  }
  0x70   : > { %s1912_s23 = smul.u32 12, %s2359_s11  ;;  %s1696_s28 = scalar_lea.sflag [#allocation4], %s2359_s11 }
  0x71   : > { %s1913_s8 = smul.u32 192, %s2211_s16  ;;  %p2545_p0 = scmp.ne.s32.totalorder %s2540_s6, 0 }
  0x72   : > { %s213_s5 = scalar_lea.vmem [#allocation8], %s1912_s23  ;;  %s2169_s16 = smov [#allocation8]  }
  0x73   : > { %538 = vrot.lane.b32.xlu0 %v2379_v3, %s2160_s18  ;;  %534 = vrot.lane.b32.xlu1 %v2375_v2, %s2160_s18  ;;  %s1710_s9 = sshll.u32 %s213_s5, 4  ;;  %s2484_s21 = scalar_lea.hbm %s2531_s3, %s1913_s8  ;;  %s2486_s9 = int_to_ptr.vmem [resolvable:$true] %s1710_s9 }
  0x74   : > { %s2081_s22 = scalar_lea.vmem %s2486_s9, 192 }
  0x75   : > { %p2082_p8 = scmp.ne.s32.totalorder %s2486_s9, %s2081_s22 }
  0x77   : > { %700 = vrot.lane.b32.xlu0 %v2373_v1, %s2161_s17  ;;  %702 = vrot.lane.b32.xlu1 %v2379_v3, %s2161_s17  ;;  %p2083_p1 = pnand %p2082_p8, %p2545_p0 }
  0x79   : > { %p2084_p3 = pneg %p2083_p1 }
  0x7b   : > { %698 = vrot.lane.b32.xlu0 %v2375_v2, %s2161_s17  ;;  %864 = vrot.lane.b32.xlu1 %v2373_v1, %s2163_s24 }
  0x7f   : > { %866 = vrot.lane.b32.xlu0 %v2379_v3, %s2163_s24  ;;  %862 = vrot.lane.b32.xlu1 %v2375_v2, %s2163_s24 }
  0x83   : > { %234 = vrot.lane.b32.xlu0 %v221_v4, %s2159_s20  ;;  %1028 = vrot.lane.b32.xlu1 %v2373_v1, %s2164_s26  ;;  %s2085_s20 = sshll.u32 %s2169_s16, 4  ;;  %s2086_s20 = int_to_ptr.vmem [resolvable:$false] %s2085_s20 }
  0x84   : > { %p2088_p7 = scmp.lt.s32.totalorder %s2486_s9, %s2086_s20 }
  0x87   : > { %1030 = vrot.lane.b32.xlu0 %v2379_v3, %s2164_s26  ;;  %1026 = vrot.lane.b32.xlu1 %v2375_v2, %s2164_s26 }
  0x8b   : > { %540 = vrot.lane.b32.xlu0 %v221_v4, %s2160_s18  ;;  %704 = vrot.lane.b32.xlu1 %v221_v4, %s2161_s17  ;;  %s2087_s18 = scalar_lea.vmem %s2086_s20, 384 }
  0x8c   : > { %p2089_p9 = scmp.lt.s32.totalorder %s2087_s18, %s2081_s22 }
  0x8e   : > { %p2090_p12 = por %p2089_p9, %p2088_p7 }
  0x8f   : > { %1192 = vrot.lane.b32.xlu0 %v2373_v1, %s2165_s27  ;;  %1194 = vrot.lane.b32.xlu1 %v2379_v3, %s2165_s27 }
  0x90   : > { %p2091_p2 = pnand %p2090_p12, %p2084_p3 }
  0x93   : > { %1190 = vrot.lane.b32.xlu0 %v2375_v2, %s2165_s27  ;;  %868 = vrot.lane.b32.xlu1 %v221_v4, %s2163_s24 }
  0x97   : > { %1032 = vrot.lane.b32.xlu0 %v221_v4, %s2164_s26  ;;  %1356 = vrot.lane.b32.xlu1 %v2373_v1, %s2166_s29 }
  0x9b   : > { %1358 = vrot.lane.b32.xlu0 %v2379_v3, %s2166_s29  ;;  %1354 = vrot.lane.b32.xlu1 %v2375_v2, %s2166_s29 }
  0x9f   : > { %1196 = vrot.lane.b32.xlu0 %v221_v4, %s2165_s27  ;;  %1360 = vrot.lane.b32.xlu1 %v221_v4, %s2166_s29 }
  0xa3   : > { %1520 = vrot.lane.b32.xlu0 %v2373_v1, %s2167_s30  ;;  %1522 = vrot.lane.b32.xlu1 %v2379_v3, %s2167_s30 }
  0xa7   : > { %1518 = vrot.lane.b32.xlu0 %v2375_v2, %s2167_s30  ;;  %1524 = vrot.lane.b32.xlu1 %v221_v4, %s2167_s30 }
  0xab   : > { %1683 = vperm.xlu0 %1994, %v1680_v6   ;;  %v1517_v6 = vld [vmem:[#allocation5 + $0x20] sm:$0x7] }
  0xdd   : > { %v231_v7 = vpop.permute.xlu0 %230  ;;  %v229_v8 = vpop.permute.xlu1 %228 }
  0xde   : > { %v237_v13 = vsel %vm236_vm1, %v229_v8, %v231_v7 }
  0xe1   : > { %v233_v9 = vpop.permute.xlu0 %232  ;;  %v537_v10 = vpop.permute.xlu1 %536 }
  0xe2   : > { %v238_v11 = vsel %vm236_vm1, %v231_v7, %v233_v9 }
  0xe3   : > { %247 = vmatprep.subr.mxu0 %v238_v11 }
  0xe4   : > { %248 = vmatpush1.msra.mxu0 %v237_v13 }
  0xe5   : > { %v539_v14 = vpop.permute.xlu0 %538  ;;  %1811 = vmatmul.mubr.msk.f32.vlgmr.msra.gmra.mrb[0].mxu0 %vm243_vm2, %v223_v12  ;;  %v535_v15 = vpop.permute.xlu1 %534  ;;  %391 = vmatprep.subr.mxu0 %v2373_v1 }
  0xe6   : > { %392 = vmatpush1.msra.mxu0 %v2375_v2  ;;  %v544_v16 = vsel %vm542_vm3, %v537_v10, %v539_v14  ;;  %455 = vmatprep.mubr.f32.mxu0 %v2158_v0  ;;  %v543_v20 = vsel %vm542_vm3, %v535_v15, %v537_v10  ;;  %v1353_v2 = vld [vmem:[#allocation5 + $0x1c] sm:$0x7] }
  0xe7   : > { %552 = vmatprep.subr.mxu0 %v544_v16 }
  0xe9   : > { %v701_v17 = vpop.permute.xlu0 %700  ;;  %v703_v18 = vpop.permute.xlu1 %702 }
  0xea   : > { %v708_v21 = vsel %vm706_vm4, %v701_v17, %v703_v18 }
  0xed   : > { %v699_v22 = vpop.permute.xlu0 %698  ;;  %v865_v23 = vpop.permute.xlu1 %864  ;;  %1813 = vmatmul.mubr.msk.f32.vlgmr.msra.gmra.mrb[0].mxu0 %vm243_vm2, %v217_v19 }
  0xee   : > { %553 = vmatpush1.msra.mxu0 %v543_v20  ;;  %616 = vmatprep.mubr.f32.mxu0 %v2158_v0  ;;  %v707_v27 = vsel %vm706_vm4, %v699_v22, %v701_v17 }
  0xef   : > { %716 = vmatprep.subr.mxu0 %v708_v21 }
  0xf1   : > { %v867_v24 = vpop.permute.xlu0 %866  ;;  %v863_v25 = vpop.permute.xlu1 %862 }
  0xf2   : > { %v872_v28 = vsel %vm870_vm5, %v865_v23, %v867_v24  ;;  %v871_v36 = vsel %vm870_vm5, %v863_v25, %v865_v23 }
  0xf5   : > { %v235_v29 = vpop.permute.xlu0 %234  ;;  %v1029_v30 = vpop.permute.xlu1 %1028  ;;  %1815 = vmatmul.mubr.msk.f32.vlgmr.msra.gmra.mrb[0].mxu0 %vm243_vm2, %v533_v26 }
  0xf6   : > { %717 = vmatpush1.msra.mxu0 %v707_v27  ;;  %v239_v31 = vsel %vm236_vm1, %v233_v9, %v235_v29  ;;  %780 = vmatprep.mubr.f32.mxu0 %v2158_v0 }
  0xf7   : > { %880 = vmatprep.subr.mxu0 %v872_v28  ;;  %1852 = vmatpush3.msra.mxu1 %v239_v31 }
  0xf8   : > { %1854 = vmatmul.mubr.msk.f32.vlgmr.msra.gmra.mrb[0].mxu1 %vm243_vm2, %v223_v12  ;;  %1856 = vmatprep.subr.mxu1 %v2158_v0 }
  0xf9   : > { %v1031_v32 = vpop.permute.xlu0 %1030  ;;  %v1027_v33 = vpop.permute.xlu1 %1026  ;;  %1857 = vmatpush3.msra.mxu1 %v2379_v3  ;;  %1858 = vmatprep.mubr.msk.f32.mxu1 %vm2162_vm0, %v2158_v0 }
  0xfa   : > { %1861 = vmatprep.subr.mxu1 %v2158_v0  ;;  %v1036_v35 = vsel %vm1034_vm6, %v1029_v30, %v1031_v32  ;;  %v1035_v45 = vsel %vm1034_vm6, %v1027_v33, %v1029_v30 }
  0xfc   : > { %1859 = vmatmul.mubr.msk.f32.vlgmr.msra.gmra.mrb[2].mxu1 %vm243_vm2, %v217_v19 }
  0xfd   : > { %v541_v37 = vpop.permute.xlu0 %540  ;;  %v705_v38 = vpop.permute.xlu1 %704  ;;  %1817 = vmatmul.mubr.msk.f32.vlgmr.msra.gmra.mrb[0].mxu0 %vm243_vm2, %v697_v34  ;;  %1863 = vmatprep.mubr.msk.f32.mxu1 %vm2162_vm0, %v2158_v0 }
  0xfe   : > { %v545_v39 = vsel %vm542_vm3, %v539_v14, %v541_v37  ;;  %881 = vmatpush1.msra.mxu0 %v871_v36  ;;  %944 = vmatprep.mubr.f32.mxu0 %v2158_v0  ;;  %v709_v40 = vsel %vm706_vm4, %v703_v18, %v705_v38 }
  0xff   : > { %1044 = vmatprep.subr.mxu0 %v1036_v35  ;;  %1862 = vmatpush3.msra.mxu1 %v545_v39 }
 0x100   : > { %1866 = vmatprep.subr.mxu1 %v2158_v0  ;;  %1864 = vmatmul.mubr.msk.f32.vlgmr.msra.gmra.mrb[4].mxu1 %vm243_vm2, %v533_v26 }
 0x101   : > { %v1193_v41 = vpop.permute.xlu0 %1192  ;;  %v1195_v42 = vpop.permute.xlu1 %1194  ;;  %1867 = vmatpush3.msra.mxu1 %v709_v40  ;;  %1868 = vmatprep.mubr.msk.f32.mxu1 %vm2162_vm0, %v2158_v0 }
 0x102   : > { %1871 = vmatprep.subr.mxu1 %v2158_v0  ;;  %v1200_v44 = vsel %vm1198_vm7, %v1193_v41, %v1195_v42 }
 0x104   : > { %1869 = vmatmul.mubr.msk.f32.vlgmr.msra.gmra.mrb[6].mxu1 %vm243_vm2, %v697_v34 }
 0x105   : > { %v1191_v46 = vpop.permute.xlu0 %1190  ;;  %v869_v47 = vpop.permute.xlu1 %868  ;;  %1819 = vmatmul.mubr.msk.f32.vlgmr.msra.gmra.mrb[0].mxu0 %vm243_vm2, %v861_v43  ;;  %1873 = vmatprep.mubr.msk.f32.mxu1 %vm2162_vm0, %v2158_v0 }
 0x106   : > { %v873_v48 = vsel %vm870_vm5, %v867_v24, %v869_v47  ;;  %1045 = vmatpush1.msra.mxu0 %v1035_v45  ;;  %1108 = vmatprep.mubr.f32.mxu0 %v2158_v0  ;;  %v1199_v53 = vsel %vm1198_vm7, %v1191_v46, %v1193_v41 }
 0x107   : > { %1208 = vmatprep.subr.mxu0 %v1200_v44  ;;  %1872 = vmatpush3.msra.mxu1 %v873_v48 }
 0x108   : > { %1876 = vmatprep.subr.mxu1 %v2158_v0  ;;  %1874 = vmatmul.mubr.msk.f32.vlgmr.msra.gmra.mrb[8].mxu1 %vm243_vm2, %v861_v43 }
 0x109   : > { %v1033_v49 = vpop.permute.xlu0 %1032  ;;  %v1357_v50 = vpop.permute.xlu1 %1356  ;;  %1878 = vmatprep.mubr.msk.f32.mxu1 %vm2162_vm0, %v2158_v0 }
 0x10a   : > { %v1037_v52 = vsel %vm1034_vm6, %v1031_v32, %v1033_v49 }
 0x10b   : > { %1877 = vmatpush3.msra.mxu1 %v1037_v52 }
 0x10c   : > { %1879 = vmatmul.mubr.msk.f32.vlgmr.msra.gmra.mrb[10].mxu1 %vm243_vm2, %v1025_v51  ;;  %1881 = vmatprep.subr.mxu1 %v2158_v0 }
 0x10d   : > { %v1359_v54 = vpop.permute.xlu0 %1358  ;;  %v1355_v55 = vpop.permute.xlu1 %1354  ;;  %1821 = vmatmul.mubr.msk.f32.vlgmr.msra.gmra.mrb[0].mxu0 %vm243_vm2, %v1025_v51  ;;  %1883 = vmatprep.mubr.msk.f32.mxu1 %vm2162_vm0, %v2158_v0 }
 0x10e   : > { %1209 = vmatpush1.msra.mxu0 %v1199_v53  ;;  %v1364_v56 = vsel %vm1362_vm8, %v1357_v50, %v1359_v54  ;;  %1272 = vmatprep.mubr.f32.mxu0 %v2158_v0  ;;  %v1363_v62 = vsel %vm1362_vm8, %v1355_v55, %v1357_v50 }
 0x10f   : > { %1372 = vmatprep.subr.mxu0 %v1364_v56 }
 0x111   : > { %v1197_v57 = vpop.permute.xlu0 %1196  ;;  %v1361_v58 = vpop.permute.xlu1 %1360 }
 0x112   : > { %v1201_v60 = vsel %vm1198_vm7, %v1195_v42, %v1197_v57  ;;  %v1365_v61 = vsel %vm1362_vm8, %v1359_v54, %v1361_v58 }
 0x113   : > { %1882 = vmatpush3.msra.mxu1 %v1201_v60 }
 0x114   : > { %1884 = vmatmul.mubr.msk.f32.vlgmr.msra.gmra.mrb[12].mxu1 %vm243_vm2, %v1189_v59  ;;  %1886 = vmatprep.subr.mxu1 %v2158_v0 }
 0x115   : > { %v1521_v63 = vpop.permute.xlu0 %1520  ;;  %v1523_v1 = vpop.permute.xlu1 %1522  ;;  %1823 = vmatmul.mubr.msk.f32.vlgmr.msra.gmra.mrb[0].mxu0 %vm243_vm2, %v1189_v59  ;;  %1887 = vmatpush3.msra.mxu1 %v1365_v61 }
 0x116   : > { %1373 = vmatpush1.msra.mxu0 %v1363_v62  ;;  %1888 = vmatprep.mubr.msk.f32.mxu1 %vm2162_vm0, %v2158_v0  ;;  %v1528_v3 = vsel %vm1526_vm9, %v1521_v63, %v1523_v1 }
 0x117   : > { %1536 = vmatprep.subr.mxu0 %v1528_v3  ;;  %1891 = vmatprep.subr.mxu1 %v2158_v0 }
 0x118   : > { %1889 = vmatmul.mubr.msk.f32.vlgmr.msra.gmra.mrb[14].mxu1 %vm243_vm2, %v1353_v2  ;;  %1436 = vmatprep.mubr.f32.mxu0 %v2158_v0 }
 0x119   : > { %v1519_v4 = vpop.permute.xlu0 %1518  ;;  %v1525_v5 = vpop.permute.xlu1 %1524  ;;  %1893 = vmatprep.mubr.msk.f32.mxu1 %vm2162_vm0, %v2158_v0 }
 0x11a   : > { %v1529_v7 = vsel %vm1526_vm9, %v1523_v1, %v1525_v5  ;;  %v1527_v8 = vsel %vm1526_vm9, %v1519_v4, %v1521_v63 }
 0x11b   : > { %1892 = vmatpush3.msra.mxu1 %v1529_v7 }
 0x11c   : > { %1894 = vmatmul.mubr.msk.f32.vlgmr.msra.gmra.mrb[16].mxu1 %vm243_vm2, %v1517_v6 }
 0x11d   : > { %1825 = vmatmul.mubr.msk.f32.vlgmr.msra.gmra.mrb[0].mxu0 %vm243_vm2, %v1353_v2 }
 0x11e   : > { %1537 = vmatpush1.msra.mxu0 %v1527_v8  ;;  %1600 = vmatprep.mubr.f32.mxu0 %v2158_v0 }
 0x125   : > { %1827 = vmatmul.mubr.msk.f32.vlgmr.msra.gmra.mrb[0].mxu0 %vm243_vm2, %v1517_v6 }
 0x12a   : > { %v1684_v32 = vpop.permute.xlu0 %1683 }
 0x1cb   : > { %v384_v9 = vpop.f32.mrb[0].mxu1 }
 0x1cc   : > { %v1855_v10 = vpop.f32.mrb[1].mxu1 }
 0x1cf   : > { %v528_v11 = vpop.f32.mrb[2].mxu1 }
 0x1d0   : > { %v529_v12 = vadd.f32 %v528_v11, %v384_v9  ;;  %v1860_v13 = vpop.f32.mrb[3].mxu1 }
 0x1d3   : > { %v689_v14 = vpop.f32.mrb[4].mxu1 }
 0x1d4   : > { %v695_v15 = vadd.f32 %v689_v14, %v529_v12  ;;  %v1865_v16 = vpop.f32.mrb[5].mxu1 }
 0x1d7   : > { %v853_v17 = vpop.f32.mrb[6].mxu1 }
 0x1d8   : > { %v859_v18 = vadd.f32 %v853_v17, %v695_v15  ;;  %v1870_v19 = vpop.f32.mrb[7].mxu1 }
 0x1db   : > { %v1017_v20 = vpop.f32.mrb[8].mxu1 }
 0x1dc   : > { %v1023_v21 = vadd.f32 %v1017_v20, %v859_v18  ;;  %v1875_v22 = vpop.f32.mrb[9].mxu1 }
 0x1df   : > { %v1181_v23 = vpop.f32.mrb[10].mxu1 }
 0x1e0   : > { %v1187_v24 = vadd.f32 %v1181_v23, %v1023_v21  ;;  %v1880_v0 = vpop.f32.mrb[11].mxu1 }
 0x1e7   : > { %v1345_v25 = vpop.f32.mrb[12].mxu1 }
 0x1e8   : > { %v1351_v26 = vadd.f32 %v1345_v25, %v1187_v24  ;;  %v1885_v27 = vpop.f32.mrb[13].mxu1 }
 0x1eb   : > { %v1509_v28 = vpop.f32.mrb[14].mxu1 }
 0x1ec   : > { %v1515_v29 = vadd.f32 %v1509_v28, %v1351_v26  ;;  %v1890_v30 = vpop.f32.mrb[15].mxu1 }
 0x1ef   : > { %v1673_v31 = vpop.f32.mrb[16].mxu1 }
 0x1f0   : > { %v1679_v33 = vadd.f32 %v1673_v31, %v1515_v29  ;;  %v1895_v34 = vpop.f32.mrb[17].mxu1 }
 0x1f2   : > { %v1688_v35 = vadd.f32 %v1684_v32, %v1679_v33 }
 0x1f4   : > { %1694 = vst [vmem:[%s213_s5 + $0x8] sm:$0x7] %v1688_v35 }
 0x1f8   : > { %v1602_v36 = vpop.f32.mrb[0].mxu0 }
 0x1f9   : > { %v1686_v37 = vadd.f32 %v1684_v32, %v1602_v36  ;;  %v1604_v38 = vpop.f32.mrb[1].mxu0 }
 0x1fa   : > { %v1687_v39 = vadd.f32 %v1684_v32, %v1604_v38 }
 0x1fc   : > { %v1691_v40 = vcombine.low %v1686_v37, %v1687_v39 }
 0x1fe   : > { %1693 = vst [vmem:[%s213_s5] sm:$0x77] %v1691_v40 }
 0x1ff   : > { %2094 = shalt.err (!%p2091_p2)
}
 0x200   : > { %s2095_s11 = scalar_lea.hbm %s2484_s21, 192  ;;  %s2099_s26 = scalar_lea.hbm %s2531_s3, 384 }
 0x201   : > { %p2096_p13 = scmp.ne.s32.totalorder %s2484_s21, %s2095_s11  ;;  %p2100_p4 = scmp.lt.u32.totalorder %s2484_s21, %s2531_s3 }
 0x202   : > { %p2101_p5 = scmp.lt.u32.totalorder %s2099_s26, %s2095_s11  ;;  %p2103_p8 = scmp.lt.u32.totalorder %s2095_s11, %s2484_s21 }
 0x203   : > { %p2097_p6 = pnand %p2096_p13, %p2545_p0 }
 0x204   : > { %p2102_p11 = por %p2101_p5, %p2100_p4 }
 0x205   : > { %p2098_p10 = pneg %p2097_p6 }
 0x206   : > { %p2104_p1 = por %p2103_p8, %p2102_p11 }
 0x208   : > { %p2105_p3 = pnand %p2104_p1, %p2098_p10 }
 0x20a   : > { %2108 = shalt.err (!%p2105_p3)
}
 0x20b   : > { %1924 = dma.vmem_to_hbm [thread:$0]  (%p2545_p0), %s2486_s9, 192, %s2484_s21, %s1696_s28  }
 0x20c PF: > { %s1722_s30 = sand.u32 1, %s2139_s12   ;;  %p2546_p7 = scmp.ne.s32.totalorder %s2536_s19, 0 }
 0x20d   : > { %p2547_p9 = scmp.ge.s32.totalorder %s2151_s15, 2  ;;  %s1723_s23 = scalar_lea.sflag [#allocation4], %s1722_s30 }
 0x20f   : > { %p1938_p12 = pnand %p2547_p9, %p2546_p7 }
 0x211   : > { %2134 = dma.done.wait (!%p1938_p12), %s1723_s23, 192  }
 0x212   : > { %2136 = vsyncadd (!%p1938_p12), %s1723_s23, 4294967104  ;;  %p17_p2 = scmp.ge.s32.totalorder %s2300_s4, 4   ;;  %s2548_s12 = smov %s2143_s13 }
 0x213   : > { %s2549_s13 = smov %s2147_s14  ;;  %s2550_s14 = smov %s2316_s7 }
 0x214   : > { %s2551_s15 = smov %s2300_s4  ;;  %19 = sbr.rel (!%p17_p2) target bundleno = 6 (0x6), region = 93 }
 0x21b   :  { %1728 = vsyncpa [#allocation3], 1 }
 0x21c   :  { %1730 = vsyncpa [#allocation3 + $0x1], 1 }
 0x21d   :  { %1731 = vsyncpa [#allocation6], 1 }
 0x21e   :  { %1732 = vsyncpa [#allocation4], 1 }
 0x21f   :  { %1734 = vsyncpa [#allocation4 + $0x1], 1 }

// kernel: a_call__.30
= control target key start
LH: loop header
LB: loop body
LE: loop exit
PB: predicated region body
PF: predicated region fallthrough
CT: control target
= control target key end

     0   :  { %8 = vsyncpa [#allocation3], 0  ;;  %s1797_s0 = inlined_call_operand.hbm [shape: f32[2,24,256], index: 0, kind: input, shape index: {}]   ;;  %s1798_s1 = inlined_call_operand.hbm [shape: f32[9,8,6], index: 1, kind: input, shape index: {}]   ;;  %s1799_s2 = inlined_call_operand.hbm [shape: f32[8,1], index: 2, kind: input, shape index: {}]   ;;  %s1800_s3 = inlined_call_operand.hbm [shape: f32[2,8,128], index: 3, kind: output, shape index: {}]  }
   0x1   :  { %10 = vsyncpa [#allocation3 + $0x1], 0 }
   0x2   :  { %11 = vsyncpa [#allocation6], 0 }
   0x3   :  { %12 = vsyncpa [#allocation4], 0 }
   0x4   :  { %14 = vsyncpa [#allocation4 + $0x1], 0  ;;  %s1478_s12 = smov 0   ;;  %s1480_s13 = smov 0  }
   0x5   :  { %s1482_s14 = smov 0   ;;  %s1484_s15 = smov 0  }
   0x6 LB: > { %s1499_s16 = sadd.s32 4294967295, %s1442_s15   ;;  %s1110_s17 = sadd.s32 4294967294, %s1442_s15   ;;  %s1442_s15 = sphi %s1484_s15, %s1820_s15   ;;  %s1438_s14 = sphi %s1482_s14, %s1819_s14   ;;  %s1434_s13 = sphi %s1480_s13, %s1818_s13   ;;  %s1430_s12 = sphi %s1478_s12, %s1817_s12  }
   0x7   : > { %p40_p0 = scmp.ne.s32.totalorder %s1434_s13, %s1430_s12  ;;  %p1801_p1 = scmp.eq.s32.totalorder %s1499_s16, 0 }
   0x8   : > { %p112_p3 = scmp.eq.s32.totalorder %s1110_s17, 1  ;;  %p1111_p5 = scmp.ge.s32.totalorder %s1442_s15, 1 }
   0x9   : > { %p1508_p4 = por %p1801_p1, %p40_p0  ;;  %p119_p7 = scmp.lt.s32.totalorder %s1442_s15, 3 }
   0xa   : > { %p1513_p6 = por %p112_p3, %p40_p0  ;;  %s1444_s21 = smov [#allocation5]  }
   0xb   : > { %s1804_s18 = scalar_select %p1508_p4, 1, 0 }
   0xc   : > { %s1805_s19 = scalar_select %p1513_p6, 1, 0 }
   0xd   : > { %p1518_p8 = pnand %p1111_p5, %p119_p7  ;;  %s131_s22 = sshll.u32 %s1444_s21, 4  ;;  %s1522_s22 = int_to_ptr.vmem [resolvable:$true] %s131_s22 }
   0xe   : > { %s1445_s24 = smov [#allocation7]   ;;  %s1286_s28 = scalar_lea.hbm %s1798_s1, 1152 }
   0xf   : > { %p1220_p9 = pneg %p1518_p8  ;;  %s145_s25 = sshll.u32 %s1445_s24, 4  ;;  %s1533_s25 = int_to_ptr.vmem [resolvable:$true] %s145_s25 }
  0x10   : > { %p1287_p12 = scmp.ne.s32.totalorder %s1798_s1, %s1286_s28  ;;  %p1293_p5 = scmp.lt.u32.totalorder %s1286_s28, %s1798_s1 }
  0x11   : > { %p1529_p11 = pnand %p1220_p9, %p1801_p1 }
  0x13   : > { %p1288_p13 = pneg %p1529_p11 }
  0x15   : > { %p1289_p0 = pnand %p1288_p13, %p1287_p12 }
  0x17   : > { %p1290_p3 = pneg %p1289_p0 }
  0x19   : > { %p1295_p7 = pnand %p1293_p5, %p1290_p3 }
  0x1b   : > { %1298 = shalt.err (!%p1295_p7)
}
  0x1c   : > { %s1299_s6 = scalar_lea.vmem %s1522_s22, 1152  ;;  %p1307_p2 = scmp.lt.s32.totalorder %s1522_s22, %s1522_s22 }
  0x1d   : > { %p1300_p9 = scmp.ne.s32.totalorder %s1522_s22, %s1299_s6  ;;  %p1308_p12 = scmp.lt.s32.totalorder %s1299_s6, %s1299_s6 }
  0x1f   : > { %p1302_p10 = pnand %p1300_p9, %p1288_p13  ;;  %p1309_p0 = por %p1308_p12, %p1307_p2 }
  0x21   : > { %p1303_p1 = pneg %p1302_p10 }
  0x23   : > { %p1310_p6 = pnand %p1309_p0, %p1303_p1 }
  0x25   : > { %1313 = shalt.err (!%p1310_p6)
}
  0x26   : > { %s1446_s7 = smov 128   ;;  %s1447_s8 = smov 8  }
  0x27   : > { %1223 = dma.hbm_to_vmem [thread:$0]  (!%p1529_p11), %s1798_s1, 1152, %s1522_s22, [#allocation6], %s1446_s7, %s1446_s7, %s1447_s8  }
  0x28   : > { %s1314_s21 = scalar_lea.hbm %s1799_s2, 128 }
  0x29   : > { %p1315_p2 = scmp.ne.s32.totalorder %s1799_s2, %s1314_s21  ;;  %p1321_p10 = scmp.lt.u32.totalorder %s1314_s21, %s1799_s2 }
  0x2b   : > { %p1317_p1 = pnand %p1315_p2, %p1288_p13 }
  0x2d   : > { %p1318_p6 = pneg %p1317_p1 }
  0x2f   : > { %p1323_p3 = pnand %p1321_p10, %p1318_p6 }
  0x31   : > { %1326 = shalt.err (!%p1323_p3)
}
  0x32   : > { %s1327_s22 = scalar_lea.vmem %s1533_s25, 128  ;;  %p1335_p12 = scmp.lt.s32.totalorder %s1533_s25, %s1533_s25 }
  0x33   : > { %p1328_p5 = scmp.ne.s32.totalorder %s1533_s25, %s1327_s22  ;;  %p1336_p0 = scmp.lt.s32.totalorder %s1327_s22, %s1327_s22 }
  0x35   : > { %p1330_p7 = pnand %p1328_p5, %p1288_p13  ;;  %p1337_p2 = por %p1336_p0, %p1335_p12 }
  0x37   : > { %p1331_p9 = pneg %p1330_p7 }
  0x39   : > { %p1338_p1 = pnand %p1337_p2, %p1331_p9 }
  0x3b   : > { %1341 = shalt.err (!%p1338_p1)
}
  0x3c   : > { %1226 = dma.hbm_to_vmem [thread:$0]  (!%p1529_p11), %s1799_s2, 128, %s1533_s25, [#allocation6]  }
  0x3d   : > { %s1588_s4 = sadd.s32 1, %s1442_s15   ;;  %s27_s23 = sadd.s32 1, %s1438_s14 }
  0x3e   : > { %s24_s5 = ssub.s32 %s1442_s15, %s1588_s4  ;;  %p34_p13 = scmp.ne.s32.totalorder %s1438_s14, %s1434_s13 }
  0x3f   : > { %p25_p6 = scmp.eq.s32.totalorder %s24_s5, 0  ;;  %p35_p10 = scmp.eq.s32.totalorder %s1442_s15, 0 }
  0x40   : > { %p1808_p3 = scmp.eq.s32.totalorder %s1499_s16, 1  ;;  %p1237_p7 = scmp.lt.s32.totalorder %s1442_s15, 2 }
  0x41   : > { %s1604_s7 = scalar_select %p25_p6, %s1438_s14, %s27_s23  }
  0x42   : > { %p1598_p5 = por %p1808_p3, %p34_p13  ;;  %p36_p9 = por %p35_p10, %p34_p13 }
  0x43   : > { %s156_s8 = sand.u32 1, %s1438_s14   ;;  %s1206_s25 = smul.u32 768, %s1442_s15 }
  0x44   : > { %s1809_s6 = scalar_select %p1598_p5, 1, 0 }
  0x45   : > { %s1205_s9 = smul.u32 48, %s156_s8  ;;  %p1608_p11 = pnand %p1237_p7, %p36_p9 }
  0x46   : > { %s1615_s21 = scalar_lea.hbm %s1797_s0, %s1206_s25  ;;  %s1619_s27 = scalar_lea.sflag [#allocation3], %s156_s8 }
  0x47   : > { %s160_s24 = scalar_lea.vmem [#allocation2], %s1205_s9  ;;  %s1342_s28 = scalar_lea.hbm %s1615_s21, 768 }
  0x48   : > { %s167_s26 = sshll.u32 %s160_s24, 4  ;;  %p1343_p12 = scmp.ne.s32.totalorder %s1615_s21, %s1342_s28  ;;  %s1617_s26 = int_to_ptr.vmem [resolvable:$true] %s167_s26 }
  0x49   : > { %p1344_p0 = pneg %p1608_p11  ;;  %s1347_s30 = scalar_lea.hbm %s1797_s0, 1536 }
  0x4a   : > { %p1348_p13 = scmp.lt.u32.totalorder %s1615_s21, %s1797_s0  ;;  %p1349_p6 = scmp.lt.u32.totalorder %s1347_s30, %s1342_s28 }
  0x4b   : > { %p1345_p2 = pnand %p1344_p0, %p1343_p12  ;;  %p1351_p3 = scmp.lt.u32.totalorder %s1342_s28, %s1615_s21 }
  0x4c   : > { %p1350_p10 = por %p1349_p6, %p1348_p13 }
  0x4d   : > { %p1346_p1 = pneg %p1345_p2 }
  0x4e   : > { %p1352_p7 = por %p1351_p3, %p1350_p10 }
  0x50   : > { %p1353_p9 = pnand %p1352_p7, %p1346_p1 }
  0x52   : > { %1356 = shalt.err (!%p1353_p9)
}
  0x53   : > { %s1357_s8 = scalar_lea.vmem %s1617_s26, 768  ;;  %s1448_s9 = smov [#allocation2]  }
  0x54   : > { %p1358_p12 = scmp.ne.s32.totalorder %s1617_s26, %s1357_s8  ;;  %s1362_s25 = sshll.u32 %s1448_s9, 4  ;;  %s1363_s25 = int_to_ptr.vmem [resolvable:$false] %s1362_s25 }
  0x55   : > { %s1364_s11 = scalar_lea.vmem %s1363_s25, 1536  ;;  %p1365_p4 = scmp.lt.s32.totalorder %s1617_s26, %s1363_s25 }
  0x56   : > { %p1360_p2 = pnand %p1358_p12, %p1344_p0  ;;  %p1366_p13 = scmp.lt.s32.totalorder %s1364_s11, %s1357_s8 }
  0x58   : > { %p1361_p5 = pneg %p1360_p2  ;;  %p1367_p6 = por %p1366_p13, %p1365_p4 }
  0x5a   : > { %p1368_p10 = pnand %p1367_p6, %p1361_p5 }
  0x5c   : > { %1371 = shalt.err (!%p1368_p10)
}
  0x5d   : > { %s1449_s17 = smov 256   ;;  %s1450_s24 = smov 16  }
  0x5e   : > { %1230 = dma.hbm_to_vmem [thread:$0]  (!%p1608_p11), %s1615_s21, 768, %s1617_s26, %s1619_s27, %s1449_s17, %s1449_s17, %s1450_s24  }
  0x5f   : > { %179 = sbr.rel (%p1518_p8) target bundleno = 474 (0x1da), region = 32  ;;  %s1650_s28 = sand.u32 (!%p1518_p8), 1, %s1434_s13  }
  0x60   : > { %s1207_s22 = smul.u32 (!%p1518_p8), 48, %s1650_s28  ;;  %s182_s29 = scalar_lea.sflag (!%p1518_p8), [#allocation3], %s1650_s28 }
  0x61   : > { %p1811_p4 = scmp.ne.s32.totalorder (!%p1518_p8), %s1804_s18, 0 }
  0x62   : > { %s1654_s30 = scalar_lea.vmem (!%p1518_p8), [#allocation2], %s1207_s22 }
  0x66   : > { %1417 = dma.done.wait (%p1811_p4), %s182_s29, 768  }
  0x67   : > { %1419 = vsyncadd (%p1811_p4), %s182_s29, 4294966528  ;;  %p1812_p5 = scmp.eq.s32.totalorder %s1499_s16, 0 }
  0x69   : > { %1421 = dma.done.wait (%p1812_p5), [#allocation6], 1280   ;;  %p1813_p8 = pmov %p1812_p5 }
  0x6a   : > { %v1451_v0 = vmov 0.0   ;;  %vm1452_vm0 = vmmov 0   ;;  %v1671_v1 = vld [vmem:[%s1654_s30 + $0x8] sm:$0x3f]  ;;  %v1674_v2 = vld [vmem:[%s1654_s30] sm:$0x3f] }
  0x6b   : > { %1423 = vsyncadd (%p1813_p8), [#allocation6], 4294966016  ;;  %1160 = vmatprep.subr.mxu0 %v1451_v0  ;;  %1162 = vmatprep.mubr.msk.f32.mxu0 %vm1452_vm0, %v1451_v0  ;;  %v636_v3 = vld [vmem:[%s1654_s30 + $0x10] sm:$0xf0]  ;;  %s1453_s18 = smov 119   ;;  %s1454_s20 = smov 127  }
  0x6c   : > { %1165 = vmatprep.subr.mxu1 %v1451_v0  ;;  %1167 = vmatprep.mubr.msk.f32.mxu1 %vm1452_vm0, %v1451_v0  ;;  %vm475_vm1 = vcmask 1043456   ;;  %v638_v4 = vld [vmem:[%s1654_s30 + $0x20] sm:$0x3]  ;;  %v646_v5 = vrot.slane %v636_v3, 4  ;;  %v637_v6 = vld [vmem:[%s1654_s30 + $0x18] sm:$0xf0] }
  0x6d   : > { %737 = vrot.lane.b32.xlu1 %v1671_v1, %s1453_s18  ;;  %387 = vrot.lane.b32.xlu0 %v1674_v2, %s1454_s20  ;;  %v647_v7 = vrot.slane %v638_v4, 4  ;;  %v639_v8 = vld [vmem:[%s1654_s30 + $0x28] sm:$0x3]  ;;  %v649_v9 = vrot.slane %v637_v6, 4  ;;  %v818_v10 = vld [vmem:[%s1654_s30 + $0x8] sm:$0xc0] }
  0x6e   : > { %v650_v11 = vrot.slane %v639_v8, 4  ;;  %v820_v12 = vld [vmem:[%s1654_s30 + $0x18] sm:$0xf]  ;;  %v817_v13 = vld [vmem:[%s1654_s30] sm:$0xc0]  ;;  %vm232_vm2 = vcmask 1045504  }
  0x6f   : > { %v648_v14 = vsel %vm475_vm1, %v646_v5, %v647_v7  ;;  %v830_v15 = vrot.slane %v818_v10, 6  ;;  %v819_v16 = vld [vmem:[%s1654_s30 + $0x10] sm:$0xf]  ;;  %v218_v17 = vld [vmem:[%s1654_s30] sm:$0xc0]  ;;  %vm228_vm3 = vcmask 48128  }
  0x70   : > { %v831_v18 = vrot.slane %v820_v12, 6  ;;  %v219_v19 = vld [vmem:[%s1654_s30 + $0x10] sm:$0xf]  ;;  %v225_v20 = vrot.slane %v218_v17, 6  ;;  %v216_v21 = vld [vmem:[%s1654_s30] sm:$0x3f]  ;;  %v651_v22 = vsel %vm475_vm1, %v649_v9, %v650_v11 }
  0x71   : > { %652 = vrot.lane.b32.xlu1 %v648_v14, %s1454_s20  ;;  %389 = vrot.lane.b32.xlu0 %v1671_v1, %s1454_s20  ;;  %v827_v23 = vrot.slane %v817_v13, 6  ;;  %v828_v24 = vrot.slane %v819_v16, 6  ;;  %v226_v25 = vrot.slane %v219_v19, 6  ;;  %v217_v26 = vld [vmem:[#allocation5] sm:$0xff]  ;;  %vm224_vm4 = vcmask 1041408   ;;  %v221_v31 = vld [vmem:[#allocation5 + $0x8] sm:$0xff] }
  0x72   : > { %1166 = vmatpush3.msk.msra.mxu1 %vm232_vm2, %v216_v21  ;;  %v469_v27 = vld [vmem:[%s1654_s30 + $0x10] sm:$0xf0]  ;;  %v470_v28 = vld [vmem:[%s1654_s30 + $0x20] sm:$0x3]  ;;  %v832_v33 = vsel %vm224_vm4, %v830_v15, %v831_v18  ;;  %v1455_v36 = vmov 0   ;;  %v472_v37 = vld [vmem:[#allocation5 + $0x18] sm:$0xff] }
  0x73   : > { %1168 = vmatmul.mubr.msk.f32.vlgmr.msra.gmra.mrb[0].mxu1 %vm228_vm3, %v217_v26  ;;  %1175 = vmatprep.subr.mxu1 %v1451_v0  ;;  %v476_v29 = vrot.slane %v469_v27, 4  ;;  %v227_v30 = vsel %vm224_vm4, %v225_v20, %v226_v25  ;;  %v477_v32 = vrot.slane %v470_v28, 4  ;;  %v829_v34 = vsel %vm224_vm4, %v827_v23, %v828_v24  ;;  %s1456_s10 = smov 118   ;;  %v998_v38 = vld [vmem:[#allocation7] sm:$0xff]  ;;  %v555_v41 = vld [vmem:[%s1654_s30 + $0x20] sm:$0xfc] }
  0x74   : > { %1177 = vmatprep.mubr.msk.f32.mxu1 %vm1452_vm0, %v1451_v0  ;;  %1161 = vmatpush3.msk.msra.mxu0 %vm232_vm2, %v227_v30  ;;  %vm391_vm5 = vcmask 1039360   ;;  %v384_v44 = vld [vmem:[#allocation5 + $0x10] sm:$0xff]  ;;  %v559_v45 = vrot.slane %v555_v41, 2  ;;  %vm739_vm6 = vcmask 973824   ;;  %v557_v49 = vld [vmem:[#allocation5 + $0x20] sm:$0xff]  ;;  %v641_v52 = vld [vmem:[#allocation5 + $0x28] sm:$0xff] }
  0x75   : > { %654 = vrot.lane.b32.xlu1 %v651_v22, %s1454_s20  ;;  %735 = vrot.lane.b32.xlu0 %v1674_v2, %s1453_s18  ;;  %v478_v35 = vsel %vm475_vm1, %v476_v29, %v477_v32  ;;  %v734_v55 = vld [vmem:[#allocation5 + $0x30] sm:$0xff]  ;;  %v822_v57 = vld [vmem:[#allocation5 + $0x38] sm:$0xff]  ;;  %vm920_vm7 = vcmask 965632   ;;  %v915_v60 = vld [vmem:[#allocation5 + $0x40] sm:$0xff]  ;;  %s1119_s21 = sshll.u32 %s1650_s28, 3  ;;  %s1139_s26 = sshll.u32 %s1499_s16, 7 }
  0x76   : > { %1285 = vset.pattern.permute.xlu0 %v1455_v36  ;;  %1163 = vmatmul.mubr.msk.f32.vlgmr.msra.gmra.mrb[0].mxu0 %vm228_vm3, %v221_v31  ;;  %s215_s27 = scalar_lea.vmem [#allocation8], %s1119_s21  ;;  %s1753_s9 = scalar_lea.hbm %s1800_s3, %s1139_s26 }
  0x77   : > { %1170 = vmatprep.subr.mxu0 %v1451_v0  ;;  %1172 = vmatprep.mubr.msk.f32.mxu0 %vm1452_vm0, %v1451_v0  ;;  %s1021_s23 = sshll.u32 %s215_s27, 4  ;;  %s1008_s25 = scalar_lea.sflag [#allocation4], %s1650_s28  ;;  %s1755_s23 = int_to_ptr.vmem [resolvable:$true] %s1021_s23 }
  0x78   : > { %1176 = vmatpush3.msk.msra.mxu1 %vm232_vm2, %v478_v35  ;;  %s1372_s11 = scalar_lea.vmem %s1755_s23, 128  ;;  %p1814_p0 = scmp.ne.s32.totalorder %s1809_s6, 0 }
  0x79   : > { %835 = vrot.lane.b32.xlu1 %v832_v33, %s1453_s18  ;;  %833 = vrot.lane.b32.xlu0 %v829_v34, %s1453_s18  ;;  %p1373_p11 = scmp.ne.s32.totalorder %s1755_s23, %s1372_s11  ;;  %s1457_s16 = smov [#allocation8]  }
  0x7a   : > { %1185 = vmatprep.subr.mxu1 %v1451_v0  ;;  %1178 = vmatmul.mubr.msk.f32.vlgmr.msra.gmra.mrb[2].mxu1 %vm228_vm3, %v472_v37  ;;  %s1376_s17 = sshll.u32 %s1457_s16, 4  ;;  %s1377_s17 = int_to_ptr.vmem [resolvable:$false] %s1376_s17 }
  0x7b   : > { %1187 = vmatprep.mubr.msk.f32.mxu1 %vm1452_vm0, %v1451_v0  ;;  %p1374_p1 = pnand %p1373_p11, %p1814_p0  ;;  %s1378_s24 = scalar_lea.vmem %s1377_s17, 256 }
  0x7c   : > { %p1379_p7 = scmp.lt.s32.totalorder %s1755_s23, %s1377_s17  ;;  %p1380_p9 = scmp.lt.s32.totalorder %s1378_s24, %s1372_s11 }
  0x7d   : > { %918 = vrot.lane.b32.xlu1 %v1671_v1, %s1456_s10  ;;  %916 = vrot.lane.b32.xlu0 %v1674_v2, %s1456_s10  ;;  %p1375_p3 = pneg %p1374_p1 }
  0x7e   : > { %p1381_p12 = por %p1380_p9, %p1379_p7 }
  0x80   : > { %p1382_p2 = pnand %p1381_p12, %p1375_p3 }
  0x81   : > { %1001 = vperm.xlu0 %1285, %v998_v38  }
  0xdf   : > { %v738_v39 = vpop.permute.xlu1 %737  ;;  %v388_v40 = vpop.permute.xlu0 %387 }
  0xe3   : > { %v653_v42 = vpop.permute.xlu1 %652  ;;  %v390_v43 = vpop.permute.xlu0 %389 }
  0xe4   : > { %v392_v46 = vsel %vm391_vm5, %v388_v40, %v390_v43 }
  0xe5   : > { %1171 = vmatpush3.msk.msra.mxu0 %vm232_vm2, %v392_v46 }
  0xe6   : > { %1173 = vmatmul.mubr.msk.f32.vlgmr.msra.gmra.mrb[2].mxu0 %vm228_vm3, %v384_v44  ;;  %1180 = vmatprep.subr.mxu0 %v1451_v0 }
  0xe7   : > { %v655_v47 = vpop.permute.xlu1 %654  ;;  %v736_v48 = vpop.permute.xlu0 %735  ;;  %1181 = vmatpush3.msk.msra.mxu0 %vm232_vm2, %v559_v45  ;;  %1182 = vmatprep.mubr.msk.f32.mxu0 %vm1452_vm0, %v1451_v0 }
  0xe8   : > { %v656_v50 = vsel %vm391_vm5, %v653_v42, %v655_v47  ;;  %v740_v51 = vsel %vm739_vm6, %v736_v48, %v738_v39  ;;  %1190 = vmatprep.subr.mxu0 %v1451_v0 }
  0xe9   : > { %1186 = vmatpush3.msk.msra.mxu1 %vm232_vm2, %v656_v50 }
  0xea   : > { %1183 = vmatmul.mubr.msk.f32.vlgmr.msra.gmra.mrb[4].mxu0 %vm228_vm3, %v557_v49  ;;  %1195 = vmatprep.subr.mxu1 %v1451_v0 }
  0xeb   : > { %1191 = vmatpush3.msk.msra.mxu0 %vm232_vm2, %v740_v51  ;;  %v836_v53 = vpop.permute.xlu1 %835  ;;  %v834_v54 = vpop.permute.xlu0 %833  ;;  %1188 = vmatmul.mubr.msk.f32.vlgmr.msra.gmra.mrb[4].mxu1 %vm228_vm3, %v641_v52 }
  0xec   : > { %v837_v56 = vsel %vm739_vm6, %v834_v54, %v836_v53  ;;  %1192 = vmatprep.mubr.msk.f32.mxu0 %vm1452_vm0, %v1451_v0  ;;  %1197 = vmatprep.mubr.msk.f32.mxu1 %vm1452_vm0, %v1451_v0 }
  0xed   : > { %1196 = vmatpush3.msk.msra.mxu1 %vm232_vm2, %v837_v56  ;;  %1200 = vmatprep.subr.mxu0 %v1451_v0 }
  0xee   : > { %1193 = vmatmul.mubr.msk.f32.vlgmr.msra.gmra.mrb[6].mxu0 %vm228_vm3, %v734_v55 }
  0xef   : > { %v919_v58 = vpop.permute.xlu1 %918  ;;  %v917_v59 = vpop.permute.xlu0 %916  ;;  %1198 = vmatmul.mubr.msk.f32.vlgmr.msra.gmra.mrb[6].mxu1 %vm228_vm3, %v822_v57  ;;  %1202 = vmatprep.mubr.msk.f32.mxu0 %vm1452_vm0, %v1451_v0 }
  0xf0   : > { %v921_v61 = vsel %vm920_vm7, %v917_v59, %v919_v58 }
  0xf1   : > { %1201 = vmatpush3.msk.msra.mxu0 %vm232_vm2, %v921_v61 }
  0xf2   : > { %1203 = vmatmul.mubr.msk.f32.vlgmr.msra.gmra.mrb[8].mxu0 %vm228_vm3, %v915_v60 }
 0x100   : > { %v1002_v22 = vpop.permute.xlu0 %1001 }
 0x146   : > { %v377_v62 = vpop.f32.mrb[0].mxu1 }
 0x147   : > { %v1169_v63 = vpop.f32.mrb[1].mxu1 }
 0x149   : > { %v301_v1 = vpop.f32.mrb[0].mxu0 }
 0x14a   : > { %v1164_v2 = vpop.f32.mrb[1].mxu0  ;;  %v378_v3 = vadd.f32 %v377_v62, %v301_v1 }
 0x14d   : > { %v550_v4 = vpop.f32.mrb[2].mxu1 }
 0x14e   : > { %v1179_v5 = vpop.f32.mrb[3].mxu1 }
 0x1b9   : > { %v464_v6 = vpop.f32.mrb[2].mxu0 }
 0x1ba   : > { %v468_v7 = vadd.f32 %v464_v6, %v378_v3  ;;  %v1174_v8 = vpop.f32.mrb[3].mxu0 }
 0x1bc   : > { %v554_v9 = vadd.f32 %v550_v4, %v468_v7 }
 0x1bd   : > { %v631_v10 = vpop.f32.mrb[4].mxu0 }
 0x1be   : > { %v635_v0 = vadd.f32 %v631_v10, %v554_v9  ;;  %v1184_v11 = vpop.f32.mrb[5].mxu0  ;;  %v728_v12 = vpop.f32.mrb[4].mxu1 }
 0x1bf   : > { %v1189_v13 = vpop.f32.mrb[5].mxu1 }
 0x1c0   : > { %v732_v14 = vadd.f32 %v728_v12, %v635_v0 }
 0x1c1   : > { %v812_v15 = vpop.f32.mrb[6].mxu0 }
 0x1c2   : > { %v816_v16 = vadd.f32 %v812_v15, %v732_v14  ;;  %v1194_v17 = vpop.f32.mrb[7].mxu0  ;;  %v909_v18 = vpop.f32.mrb[6].mxu1 }
 0x1c3   : > { %v1199_v19 = vpop.f32.mrb[7].mxu1 }
 0x1c4   : > { %v913_v20 = vadd.f32 %v909_v18, %v816_v16 }
 0x1c5   : > { %v993_v21 = vpop.f32.mrb[8].mxu0 }
 0x1c6   : > { %v997_v23 = vadd.f32 %v993_v21, %v913_v20  ;;  %v1204_v24 = vpop.f32.mrb[9].mxu0 }
 0x1c8   : > { %v1004_v25 = vadd.f32 %v1002_v22, %v997_v23 }
 0x1ca   : > { %v1005_v26 = vmax.f32 %v1004_v25, 0.0 }
 0x1cc   : > { %1006 = vst [vmem:[%s215_s27] sm:$0xff] %v1005_v26 }
 0x1cd   : > { %1385 = shalt.err (!%p1382_p2)
}
 0x1ce   : > { %s1386_s28 = scalar_lea.hbm %s1753_s9, 128  ;;  %s1390_s30 = scalar_lea.hbm %s1800_s3, 256 }
 0x1cf   : > { %p1387_p13 = scmp.ne.s32.totalorder %s1753_s9, %s1386_s28  ;;  %p1391_p4 = scmp.lt.u32.totalorder %s1753_s9, %s1800_s3 }
 0x1d0   : > { %p1392_p5 = scmp.lt.u32.totalorder %s1390_s30, %s1386_s28  ;;  %p1394_p11 = scmp.lt.u32.totalorder %s1386_s28, %s1753_s9 }
 0x1d1   : > { %p1388_p6 = pnand %p1387_p13, %p1814_p0 }
 0x1d2   : > { %p1393_p8 = por %p1392_p5, %p1391_p4 }
 0x1d3   : > { %p1389_p10 = pneg %p1388_p6 }
 0x1d4   : > { %p1395_p1 = por %p1394_p11, %p1393_p8 }
 0x1d6   : > { %p1396_p3 = pnand %p1395_p1, %p1389_p10 }
 0x1d8   : > { %1399 = shalt.err (!%p1396_p3)
}
 0x1d9   : > { %1218 = dma.vmem_to_hbm [thread:$0]  (%p1814_p0), %s1755_s23, 128, %s1753_s9, %s1008_s25  }
 0x1da PF: > { %s1033_s10 = sand.u32 1, %s1430_s12   ;;  %p1815_p7 = scmp.ne.s32.totalorder %s1805_s19, 0 }
 0x1db   : > { %p1816_p9 = scmp.ge.s32.totalorder %s1442_s15, 2  ;;  %s1034_s21 = scalar_lea.sflag [#allocation4], %s1033_s10 }
 0x1dd   : > { %p1232_p12 = pnand %p1816_p9, %p1815_p7 }
 0x1df   : > { %1425 = dma.done.wait (!%p1232_p12), %s1034_s21, 128  }
 0x1e0   : > { %1427 = vsyncadd (!%p1232_p12), %s1034_s21, 4294967168  ;;  %p17_p2 = scmp.ge.s32.totalorder %s1588_s4, 4   ;;  %s1817_s12 = smov %s1434_s13 }
 0x1e1   : > { %s1818_s13 = smov %s1438_s14  ;;  %s1819_s14 = smov %s1604_s7 }
 0x1e2   : > { %s1820_s15 = smov %s1588_s4  ;;  %19 = sbr.rel (!%p17_p2) target bundleno = 6 (0x6), region = 93 }
 0x1e9   :  { %1039 = vsyncpa [#allocation3], 1 }
 0x1ea   :  { %1041 = vsyncpa [#allocation3 + $0x1], 1 }
 0x1eb   :  { %1042 = vsyncpa [#allocation6], 1 }
 0x1ec   :  { %1043 = vsyncpa [#allocation4], 1 }
 0x1ed   :  { %1045 = vsyncpa [#allocation4 + $0x1], 1 }

</bundles_post_ra>
